<compile_context>
chip_gen: v6e
topology: v6e:2x2x1
jax: 0.10.0
libtpu: 0.0.40
codegen_flags: <defaults>
</compile_context>

<pallas_src>
import numpy as np
import jax
import jax.numpy as jnp
from jax import lax
from jax.experimental import pallas as pl
from jax.experimental.pallas import tpu as pltpu

EPS = 1e-5                      # PyTorch BatchNorm default eps
ACT_DTYPE = jnp.float32         # HBM dtype of intermediate activations
VMEM_LIMIT = 32 * 1024 * 1024   # explicit scoped-VMEM budget (safe on v5e/v6e/v7x)


# ----------------------------- Pallas kernels ------------------------------

def make_conv_kernel(D, HWCI, HWCO, with_residual, out_dtype):
    """Fused BN(train-stats)+ReLU -> 3x3x3 conv (+bias, +optional residual).

    One grid step = one batch element.  x_ref block is (1, D, H*W*Cin); the three
    depth taps are three row-shifted slices of a 2-row zero-padded copy, each
    contracted against its block-Toeplitz weight T[kd] on the MXU (bf16 operands,
    f32 accumulation).  The kernel also writes the per-(h,w,c) partial sums /
    sum-of-squares of its own output so the next BatchNorm's statistics never
    need an extra HBM pass.
    """
    def kernel(*refs):
        if with_residual:
            x_ref, r_ref, w_ref, b_ref, sc_ref, sh_ref, o_ref, st_ref = refs
        else:
            x_ref, w_ref, b_ref, sc_ref, sh_ref, o_ref, st_ref = refs
            r_ref = None

        x = x_ref[0].astype(jnp.float32)                       # (D, HWCI)
        y = jnp.maximum(x * sc_ref[...] + sh_ref[...], 0.0)    # BN + ReLU (f32)

        # depth zero-padding: rows 0 and D+1 are zero
        zero = jnp.zeros((1, HWCI), jnp.float32)
        ypad = jnp.concatenate([zero, y, zero], axis=0).astype(jnp.bfloat16)

        acc = jnp.dot(ypad[0:D, :], w_ref[0],
                      preferred_element_type=jnp.float32)       # kd = 0
        acc += jnp.dot(ypad[1:D + 1, :], w_ref[1],
                       preferred_element_type=jnp.float32)      # kd = 1
        acc += jnp.dot(ypad[2:D + 2, :], w_ref[2],
                       preferred_element_type=jnp.float32)      # kd = 2
        acc += b_ref[...]                                       # bias
        if with_residual:
            acc += r_ref[0].astype(jnp.float32)                 # residual add

        # partial stats of this element's output (feeds the next BatchNorm)
        s1 = jnp.sum(acc, axis=0, keepdims=True)                # (1, HWCO)
        s2 = jnp.sum(acc * acc, axis=0, keepdims=True)
        st_ref[0] = jnp.concatenate([s1, s2], axis=0)           # (2, HWCO)

        o_ref[0] = acc.astype(out_dtype)                        # lane-dense store
    return kernel


def make_pool_kernel():
    """Fused BN(train-stats)+ReLU -> AvgPool3d(2,2,2).

    Depth pairs are summed by a (D/2, D) pairing matmul on the left; the 2x2
    (h, w) window plus channel selection is one (H*W*C, Ho*Wo*C) pooling matmul
    on the right (entries 1/8), so the kernel needs no in-VMEM reshapes and the
    output is written lane-dense.
    """
    def kernel(x_ref, sc_ref, sh_ref, dm_ref, pm_ref, o_ref):
        x = x_ref[0].astype(jnp.float32)                        # (D, HWC)
        y = jnp.maximum(x * sc_ref[...] + sh_ref[...], 0.0)
        s = jnp.dot(dm_ref[...], y, preferred_element_type=jnp.float32)   # (Do, HWC)
        o_ref[0] = jnp.dot(s, pm_ref[...], preferred_element_type=jnp.float32)
    return kernel


# ------------------------------- wrappers -----------------------------------

def bn_relu_conv3d(x, w_toe, bias_t, scale_t, shift_t, residual=None,
                   out_dtype=ACT_DTYPE):
    """x: (N, D, H*W*Cin) -> (h: (N, D, H*W*Cout), partial stats: (N, 2, H*W*Cout))."""
    N, D, HWCI = x.shape
    HWCO = w_toe.shape[2]
    kernel = make_conv_kernel(D, HWCI, HWCO, residual is not None, out_dtype)

    in_specs = [pl.BlockSpec((1, D, HWCI), lambda n: (n, 0, 0))]
    args = [x]
    if residual is not None:
        in_specs.append(pl.BlockSpec((1, D, HWCO), lambda n: (n, 0, 0)))
        args.append(residual)
    in_specs += [
        pl.BlockSpec((3, HWCI, HWCO), lambda n: (0, 0, 0)),   # Toeplitz weight
        pl.BlockSpec((1, HWCO), lambda n: (0, 0)),            # tiled bias
        pl.BlockSpec((1, HWCI), lambda n: (0, 0)),            # tiled BN scale
        pl.BlockSpec((1, HWCI), lambda n: (0, 0)),            # tiled BN shift
    ]
    args += [w_toe, bias_t, scale_t, shift_t]

    h, partial = pl.pallas_call(
        kernel,
        out_shape=(jax.ShapeDtypeStruct((N, D, HWCO), out_dtype),
                   jax.ShapeDtypeStruct((N, 2, HWCO), jnp.float32)),
        grid=(N,),
        in_specs=in_specs,
        out_specs=(pl.BlockSpec((1, D, HWCO), lambda n: (n, 0, 0)),
                   pl.BlockSpec((1, 2, HWCO), lambda n: (n, 0, 0))),
        compiler_params=pltpu.CompilerParams(
            dimension_semantics=("parallel",),
            vmem_limit_bytes=VMEM_LIMIT),
    )(*args)
    return h, partial


def bn_relu_pool(h, scale_t, shift_t, depth_mat, pool_mat):
    """h: (N, D, H*W*C) -> (N, D/2, Ho*Wo*C) after BN+ReLU+AvgPool3d(2,2,2)."""
    N, D, HWC = h.shape
    Do = D // 2
    HWC_out = pool_mat.shape[1]
    return pl.pallas_call(
        make_pool_kernel(),
        out_shape=jax.ShapeDtypeStruct((N, Do, HWC_out), jnp.float32),
        grid=(N,),
        in_specs=[
            pl.BlockSpec((1, D, HWC), lambda n: (n, 0, 0)),
            pl.BlockSpec((1, HWC), lambda n: (0, 0)),
            pl.BlockSpec((1, HWC), lambda n: (0, 0)),
            pl.BlockSpec((Do, D), lambda n: (0, 0)),
            pl.BlockSpec((HWC, HWC_out), lambda n: (0, 0)),
        ],
        out_specs=pl.BlockSpec((1, Do, HWC_out), lambda n: (n, 0, 0)),
        compiler_params=pltpu.CompilerParams(
            dimension_semantics=("parallel",),
            vmem_limit_bytes=VMEM_LIMIT),
    )(h, scale_t, shift_t, depth_mat, pool_mat)


# ----------------------- constant builders (plain JAX / numpy) ---------------

def build_toeplitz_weight(w, H, W):
    """PyTorch Conv3d weight (Cout, Cin, 3, 3, 3) -> per-kd block-Toeplitz matmul
    weight T of shape (3, H*W*Cin, H*W*Cout) with
        T[kd, (h_in*W + w_in)*Cin + ci, (h_out*W + w_out)*Cout + co]
            = w[co, ci, kd, h_in - h_out + 1, w_in - w_out + 1]
    (zero outside the 3x3 window).  Zero rows at the image border implement the
    H/W zero padding of the convolution for free.
    """
    Sh = np.zeros((3, H, H), np.float32)
    Sw = np.zeros((3, W, W), np.float32)
    for k in range(3):
        for o in range(H):
            i = o + k - 1
            if 0 <= i < H:
                Sh[k, i, o] = 1.0
        for o in range(W):
            i = o + k - 1
            if 0 <= i < W:
                Sw[k, i, o] = 1.0
    Cout, Cin = w.shape[0], w.shape[1]
    t = jnp.einsum("oidpq,pab,qce->dacibeo", w.astype(jnp.float32),
                   jnp.asarray(Sh), jnp.asarray(Sw))
    return t.reshape(3, H * W * Cin, H * W * Cout).astype(jnp.bfloat16)


def build_pool_matrix(H, W, C):
    """(H*W*C, Ho*Wo*C) matrix with 1/8 entries: 2x2 (h,w) window average
    (the remaining 1/2 of the 2x2x2 average comes from the depth-pair matmul)."""
    Ho, Wo = H // 2, W // 2
    P = np.zeros((H * W * C, Ho * Wo * C), np.float32)
    for h in range(H):
        for w in range(W):
            for c in range(C):
                P[(h * W + w) * C + c, ((h // 2) * Wo + (w // 2)) * C + c] = 0.125
    return jnp.asarray(P)


def build_depth_pair_matrix(D):
    """(D/2, D) matrix summing consecutive depth pairs."""
    Do = D // 2
    M = np.zeros((Do, D), np.float32)
    for do in range(Do):
        M[do, 2 * do] = 1.0
        M[do, 2 * do + 1] = 1.0
    return jnp.asarray(M)


# ------------------------------ full forward ---------------------------------

@jax.jit
def down_block3d(x_ncdhw, params):
    N, Cin, D, H, W = x_ncdhw.shape
    Cout = params["conv_w"].shape[0]
    HW = H * W
    count = float(N * D * H * W)

    # channels-last, lane-dense (N, D, H*W*C)
    x_l = jnp.transpose(x_ncdhw, (0, 2, 3, 4, 1)).reshape(N, D, HW * Cin)
    x_l = x_l.astype(jnp.float32)

    t1 = build_toeplitz_weight(params["res_c1_w"], H, W)   # (3, HW*Cin, HW*Cin)
    t2 = build_toeplitz_weight(params["res_c2_w"], H, W)
    t3 = build_toeplitz_weight(params["conv_w"], H, W)     # (3, HW*Cin, HW*Cout)

    def tile_vec(v):
        # per-channel vector -> (1, HW*C), lane pattern (h, w, c)
        return jnp.tile(v.astype(jnp.float32), HW).reshape(1, HW * v.shape[0])

    def scale_shift(sums, gamma, beta):
        # training-mode (biased) BatchNorm scale/shift from channel sum / sum-sq
        mean = sums[0] / count
        var = sums[1] / count - mean * mean
        scale = gamma * lax.rsqrt(var + EPS)
        shift = beta - mean * scale
        return tile_vec(scale), tile_vec(shift)

    def fold(partial, C):
        # (N, 2, HW*C) per-(h,w,c) partial sums -> (2, C) channel sums
        return partial.sum(axis=0).reshape(2, HW, C).sum(axis=1)

    # first BN stats directly over x with a plain XLA reduce (no tiny stats kernel)
    x4 = x_l.reshape(N, D, HW, Cin)
    sums0 = jnp.stack([x4.sum(axis=(0, 1, 2)), (x4 * x4).sum(axis=(0, 1, 2))])

    # ---- ResBlock3d: BN -> ReLU -> conv1 -> BN -> ReLU -> conv2 -> (+x) ----
    sc, sh = scale_shift(sums0, params["res_n1_g"], params["res_n1_b"])
    h1, p1 = bn_relu_conv3d(x_l, t1, tile_vec(params["res_c1_b"]), sc, sh)

    sc, sh = scale_shift(fold(p1, Cin), params["res_n2_g"], params["res_n2_b"])
    h2, p2 = bn_relu_conv3d(h1, t2, tile_vec(params["res_c2_b"]), sc, sh,
                            residual=x_l)

    # ---- DownBlock tail: BN -> ReLU -> conv -> BN -> ReLU -> AvgPool(2) ----
    sc, sh = scale_shift(fold(p2, Cin), params["norm_res_g"], params["norm_res_b"])
    h3, p3 = bn_relu_conv3d(h2, t3, tile_vec(params["conv_b"]), sc, sh)

    sc, sh = scale_shift(fold(p3, Cout), params["norm_g"], params["norm_b"])
    out = bn_relu_pool(h3, sc, sh,
                       build_depth_pair_matrix(D),
                       build_pool_matrix(H, W, Cout))       # (N, D/2, Ho*Wo*Cout)

    Do, Ho, Wo = D // 2, H // 2, W // 2
    out = out.reshape(N, Do, Ho, Wo, Cout)
    return jnp.transpose(out, (0, 4, 1, 2, 3))               # back to NCDHW


# ------------------------------ pure-JAX reference --------------------------

def ref_bn_relu(x, g, b):
    mean = jnp.mean(x, axis=(0, 2, 3, 4), keepdims=True)
    var = jnp.mean((x - mean) ** 2, axis=(0, 2, 3, 4), keepdims=True)
    y = (x - mean) * lax.rsqrt(var + EPS) * g.reshape(1, -1, 1, 1, 1) \
        + b.reshape(1, -1, 1, 1, 1)
    return jnp.maximum(y, 0.0)


def ref_conv3d(x, w, b):
    out = lax.conv_general_dilated(
        x, w, window_strides=(1, 1, 1),
        padding=((1, 1), (1, 1), (1, 1)),
        dimension_numbers=("NCDHW", "OIDHW", "NCDHW"))
    return out + b.reshape(1, -1, 1, 1, 1)


def ref_down_block3d(x, p):
    h = ref_conv3d(ref_bn_relu(x, p["res_n1_g"], p["res_n1_b"]),
                   p["res_c1_w"], p["res_c1_b"])
    h = ref_conv3d(ref_bn_relu(h, p["res_n2_g"], p["res_n2_b"]),
                   p["res_c2_w"], p["res_c2_b"]) + x
    h = ref_conv3d(ref_bn_relu(h, p["norm_res_g"], p["norm_res_b"]),
                   p["conv_w"], p["conv_b"])
    h = ref_bn_relu(h, p["norm_g"], p["norm_b"])
    N, C, D, H, W = h.shape
    return h.reshape(N, C, D // 2, 2, H // 2, 2, W // 2, 2).mean(axis=(3, 5, 7))


# ----------------------------------- main ------------------------------------

if __name__ == "__main__":
    key = jax.random.PRNGKey(0)
    N, Cin, Cout, D, H, W = 2, 4, 8, 8, 8, 8
    ks = jax.random.split(key, 4)

    def conv_init(k, cout, cin):
        # deterministic synthetic init (kaiming-uniform-style bounds like nn.Conv3d)
        fan_in = cin * 27
        bound = 1.0 / np.sqrt(fan_in)
        kw_, kb_ = jax.random.split(k)
        w = jax.random.uniform(kw_, (cout, cin, 3, 3, 3), jnp.float32, -bound, bound)
        b = jax.random.uniform(kb_, (cout,), jnp.float32, -bound, bound)
        return w, b

    w1, b1 = conv_init(ks[0], Cin, Cin)    # res.conv1
    w2, b2 = conv_init(ks[1], Cin, Cin)    # res.conv2
    w3, b3 = conv_init(ks[2], Cout, Cin)   # down conv (groups=1)

    params = {
        "res_c1_w": w1, "res_c1_b": b1,
        "res_c2_w": w2, "res_c2_b": b2,
        "conv_w": w3, "conv_b": b3,
        # BatchNorm3d(affine=True) default init: gamma=1, beta=0
        "res_n1_g": jnp.ones((Cin,), jnp.float32), "res_n1_b": jnp.zeros((Cin,), jnp.float32),
        "res_n2_g": jnp.ones((Cin,), jnp.float32), "res_n2_b": jnp.zeros((Cin,), jnp.float32),
        "norm_res_g": jnp.ones((Cin,), jnp.float32), "norm_res_b": jnp.zeros((Cin,), jnp.float32),
        "norm_g": jnp.ones((Cout,), jnp.float32), "norm_b": jnp.zeros((Cout,), jnp.float32),
    }

    x = jax.random.normal(ks[3], (N, Cin, D, H, W), jnp.float32)

    out = jax.block_until_ready(down_block3d(x, params))
    ref = jax.block_until_ready(ref_down_block3d(x, params))

    assert out.shape == (N, Cout, D // 2, H // 2, W // 2), out.shape
    np.testing.assert_allclose(np.asarray(out), np.asarray(ref), rtol=2e-2, atol=2e-2)
    print("KERNEL_OK")
</pallas_src>

<mosaic_0001>
module attributes {stable_mosaic.version = 11 : i64} {
  func.func @kernel(%arg0: i32, %arg1: memref<1x8x256xf32, #tpu.memory_space<vmem>>, %arg2: memref<3x256x256xbf16, #tpu.memory_space<vmem>>, %arg3: memref<1x256xf32, #tpu.memory_space<vmem>>, %arg4: memref<1x256xf32, #tpu.memory_space<vmem>>, %arg5: memref<1x256xf32, #tpu.memory_space<vmem>>, %arg6: memref<1x8x256xf32, #tpu.memory_space<vmem>>, %arg7: memref<1x2x256xf32, #tpu.memory_space<vmem>>) attributes {dimension_semantics = [#tpu.dimension_semantics<parallel>], iteration_bounds = array<i64: 2>, scalar_prefetch = 0 : i64, scratch_operands = 0 : i64, tpu.core_type = #tpu.core_type<tc>, window_params = [{transform_indices = @transform_0, window_bounds = array<i64: 1, 8, 256>}, {pipeline_mode = #tpu.pipeline_mode<synchronous>, transform_indices = @transform_1, window_bounds = array<i64: 3, 256, 256>}, {pipeline_mode = #tpu.pipeline_mode<synchronous>, transform_indices = @transform_2, window_bounds = array<i64: 1, 256>}, {pipeline_mode = #tpu.pipeline_mode<synchronous>, transform_indices = @transform_3, window_bounds = array<i64: 1, 256>}, {pipeline_mode = #tpu.pipeline_mode<synchronous>, transform_indices = @transform_4, window_bounds = array<i64: 1, 256>}, {transform_indices = @transform_5, window_bounds = array<i64: 1, 8, 256>}, {transform_indices = @transform_6, window_bounds = array<i64: 1, 2, 256>}]} {
    %c0 = arith.constant 0 : index
    %c0_0 = arith.constant 0 : index
    %c0_1 = arith.constant 0 : index
    %0 = vector.load %arg1[%c0, %c0_0, %c0_1] : memref<1x8x256xf32, #tpu.memory_space<vmem>>, vector<1x8x256xf32>
    %1 = vector.shape_cast %0 : vector<1x8x256xf32> to vector<8x256xf32>
    %c0_2 = arith.constant 0 : index
    %c0_3 = arith.constant 0 : index
    %2 = vector.load %arg4[%c0_2, %c0_3] : memref<1x256xf32, #tpu.memory_space<vmem>>, vector<1x256xf32>
    %3 = vector.broadcast %2 : vector<1x256xf32> to vector<8x256xf32>
    %4 = arith.mulf %1, %3 : vector<8x256xf32>
    %c0_4 = arith.constant 0 : index
    %c0_5 = arith.constant 0 : index
    %5 = vector.load %arg5[%c0_4, %c0_5] : memref<1x256xf32, #tpu.memory_space<vmem>>, vector<1x256xf32>
    %6 = vector.broadcast %5 : vector<1x256xf32> to vector<8x256xf32>
    %7 = arith.addf %4, %6 : vector<8x256xf32>
    %cst = arith.constant 0.000000e+00 : f32
    %8 = vector.broadcast %cst : f32 to vector<8x256xf32>
    %9 = arith.maximumf %7, %8 : vector<8x256xf32>
    %cst_6 = arith.constant 0.000000e+00 : f32
    %10 = vector.broadcast %cst_6 : f32 to vector<1x256xf32>
    %11 = tpu.concatenate %10, %9, %10 in 0 : vector<1x256xf32>, vector<8x256xf32>, vector<1x256xf32> -> vector<10x256xf32>
    %12 = arith.truncf %11 : vector<10x256xf32> to vector<10x256xbf16>
    %13 = vector.extract_strided_slice %12 {offsets = [0, 0], sizes = [8, 256], strides = [1, 1]} : vector<10x256xbf16> to vector<8x256xbf16>
    %c0_7 = arith.constant 0 : index
    %c0_8 = arith.constant 0 : index
    %c0_9 = arith.constant 0 : index
    %14 = vector.load %arg2[%c0_7, %c0_8, %c0_9] : memref<3x256x256xbf16, #tpu.memory_space<vmem>>, vector<1x256x256xbf16>
    %15 = vector.shape_cast %14 : vector<1x256x256xbf16> to vector<256x256xbf16>
    %cst_10 = arith.constant dense<0.000000e+00> : vector<8x256xf32>
    %16 = tpu.matmul %13, %15, %cst_10 {dimension_numbers = #tpu.dot_dimension_numbers<[1], [0], [0], [1], [0, 0, 1, 1], [], []>} : vector<8x256xbf16>, vector<256x256xbf16>, vector<8x256xf32> -> vector<8x256xf32>
    %17 = vector.extract_strided_slice %12 {offsets = [1, 0], sizes = [8, 256], strides = [1, 1]} : vector<10x256xbf16> to vector<8x256xbf16>
    %c1 = arith.constant 1 : index
    %c0_11 = arith.constant 0 : index
    %c0_12 = arith.constant 0 : index
    %18 = vector.load %arg2[%c1, %c0_11, %c0_12] : memref<3x256x256xbf16, #tpu.memory_space<vmem>>, vector<1x256x256xbf16>
    %19 = vector.shape_cast %18 : vector<1x256x256xbf16> to vector<256x256xbf16>
    %cst_13 = arith.constant dense<0.000000e+00> : vector<8x256xf32>
    %20 = tpu.matmul %17, %19, %cst_13 {dimension_numbers = #tpu.dot_dimension_numbers<[1], [0], [0], [1], [0, 0, 1, 1], [], []>} : vector<8x256xbf16>, vector<256x256xbf16>, vector<8x256xf32> -> vector<8x256xf32>
    %21 = arith.addf %16, %20 : vector<8x256xf32>
    %22 = vector.extract_strided_slice %12 {offsets = [2, 0], sizes = [8, 256], strides = [1, 1]} : vector<10x256xbf16> to vector<8x256xbf16>
    %c2 = arith.constant 2 : index
    %c0_14 = arith.constant 0 : index
    %c0_15 = arith.constant 0 : index
    %23 = vector.load %arg2[%c2, %c0_14, %c0_15] : memref<3x256x256xbf16, #tpu.memory_space<vmem>>, vector<1x256x256xbf16>
    %24 = vector.shape_cast %23 : vector<1x256x256xbf16> to vector<256x256xbf16>
    %cst_16 = arith.constant dense<0.000000e+00> : vector<8x256xf32>
    %25 = tpu.matmul %22, %24, %cst_16 {dimension_numbers = #tpu.dot_dimension_numbers<[1], [0], [0], [1], [0, 0, 1, 1], [], []>} : vector<8x256xbf16>, vector<256x256xbf16>, vector<8x256xf32> -> vector<8x256xf32>
    %26 = arith.addf %21, %25 : vector<8x256xf32>
    %c0_17 = arith.constant 0 : index
    %c0_18 = arith.constant 0 : index
    %27 = vector.load %arg3[%c0_17, %c0_18] : memref<1x256xf32, #tpu.memory_space<vmem>>, vector<1x256xf32>
    %28 = vector.broadcast %27 : vector<1x256xf32> to vector<8x256xf32>
    %29 = arith.addf %26, %28 : vector<8x256xf32>
    %cst_19 = arith.constant dense<0.000000e+00> : vector<256xf32>
    %30 = vector.multi_reduction <add>, %29, %cst_19 [0] : vector<8x256xf32> to vector<256xf32>
    %31 = vector.shape_cast %30 : vector<256xf32> to vector<1x256xf32>
    %32 = arith.mulf %29, %29 : vector<8x256xf32>
    %cst_20 = arith.constant dense<0.000000e+00> : vector<256xf32>
    %33 = vector.multi_reduction <add>, %32, %cst_20 [0] : vector<8x256xf32> to vector<256xf32>
    %34 = vector.shape_cast %33 : vector<256xf32> to vector<1x256xf32>
    %35 = tpu.concatenate %31, %34 in 0 : vector<1x256xf32>, vector<1x256xf32> -> vector<2x256xf32>
    %c0_21 = arith.constant 0 : index
    %c0_22 = arith.constant 0 : index
    %c0_23 = arith.constant 0 : index
    %36 = vector.load %arg7[%c0_21, %c0_22, %c0_23] : memref<1x2x256xf32, #tpu.memory_space<vmem>>, vector<1x2x256xf32>
    %37 = vector.shape_cast %36 : vector<1x2x256xf32> to vector<2x256xf32>
    %38 = vector.shape_cast %35 : vector<2x256xf32> to vector<1x2x256xf32>
    tpu.vector_store %arg7[%c0_21, %c0_22, %c0_23], %38 {strides = array<i32>} : memref<1x2x256xf32, #tpu.memory_space<vmem>>, vector<1x2x256xf32>,
    %c0_24 = arith.constant 0 : index
    %c0_25 = arith.constant 0 : index
    %c0_26 = arith.constant 0 : index
    %39 = vector.load %arg6[%c0_24, %c0_25, %c0_26] : memref<1x8x256xf32, #tpu.memory_space<vmem>>, vector<1x8x256xf32>
    %40 = vector.shape_cast %39 : vector<1x8x256xf32> to vector<8x256xf32>
    %41 = vector.shape_cast %29 : vector<8x256xf32> to vector<1x8x256xf32>
    tpu.vector_store %arg6[%c0_24, %c0_25, %c0_26], %41 {strides = array<i32>} : memref<1x8x256xf32, #tpu.memory_space<vmem>>, vector<1x8x256xf32>,
    return
  }
  func.func @transform_0(%arg0: i32) -> (i32, i32, i32) {
    %c0_i32 = arith.constant 0 : i32
    %c0_i32_0 = arith.constant 0 : i32
    %c0_i32_1 = arith.constant 0 : i32
    return %arg0, %c0_i32, %c0_i32_0 : i32, i32, i32
  }
  func.func @transform_1(%arg0: i32) -> (i32, i32, i32) {
    %c0_i32 = arith.constant 0 : i32
    %c0_i32_0 = arith.constant 0 : i32
    %c0_i32_1 = arith.constant 0 : i32
    %c0_i32_2 = arith.constant 0 : i32
    return %c0_i32, %c0_i32_0, %c0_i32_1 : i32, i32, i32
  }
  func.func @transform_2(%arg0: i32) -> (i32, i32) {
    %c0_i32 = arith.constant 0 : i32
    %c0_i32_0 = arith.constant 0 : i32
    %c0_i32_1 = arith.constant 0 : i32
    return %c0_i32, %c0_i32_0 : i32, i32
  }
  func.func @transform_3(%arg0: i32) -> (i32, i32) {
    %c0_i32 = arith.constant 0 : i32
    %c0_i32_0 = arith.constant 0 : i32
    %c0_i32_1 = arith.constant 0 : i32
    return %c0_i32, %c0_i32_0 : i32, i32
  }
  func.func @transform_4(%arg0: i32) -> (i32, i32) {
    %c0_i32 = arith.constant 0 : i32
    %c0_i32_0 = arith.constant 0 : i32
    %c0_i32_1 = arith.constant 0 : i32
    return %c0_i32, %c0_i32_0 : i32, i32
  }
  func.func @transform_5(%arg0: i32) -> (i32, i32, i32) {
    %c0_i32 = arith.constant 0 : i32
    %c0_i32_0 = arith.constant 0 : i32
    %c0_i32_1 = arith.constant 0 : i32
    return %arg0, %c0_i32, %c0_i32_0 : i32, i32, i32
  }
  func.func @transform_6(%arg0: i32) -> (i32, i32, i32) {
    %c0_i32 = arith.constant 0 : i32
    %c0_i32_0 = arith.constant 0 : i32
    %c0_i32_1 = arith.constant 0 : i32
    return %arg0, %c0_i32, %c0_i32_0 : i32, i32, i32
  }
}

module attributes {stable_mosaic.version = 11 : i64} {
  func.func @kernel(%arg0: i32, %arg1: memref<1x8x256xf32, #tpu.memory_space<vmem>>, %arg2: memref<1x8x256xf32, #tpu.memory_space<vmem>>, %arg3: memref<3x256x256xbf16, #tpu.memory_space<vmem>>, %arg4: memref<1x256xf32, #tpu.memory_space<vmem>>, %arg5: memref<1x256xf32, #tpu.memory_space<vmem>>, %arg6: memref<1x256xf32, #tpu.memory_space<vmem>>, %arg7: memref<1x8x256xf32, #tpu.memory_space<vmem>>, %arg8: memref<1x2x256xf32, #tpu.memory_space<vmem>>) attributes {dimension_semantics = [#tpu.dimension_semantics<parallel>], iteration_bounds = array<i64: 2>, scalar_prefetch = 0 : i64, scratch_operands = 0 : i64, tpu.core_type = #tpu.core_type<tc>, window_params = [{transform_indices = @transform_0, window_bounds = array<i64: 1, 8, 256>}, {transform_indices = @transform_1, window_bounds = array<i64: 1, 8, 256>}, {pipeline_mode = #tpu.pipeline_mode<synchronous>, transform_indices = @transform_2, window_bounds = array<i64: 3, 256, 256>}, {pipeline_mode = #tpu.pipeline_mode<synchronous>, transform_indices = @transform_3, window_bounds = array<i64: 1, 256>}, {pipeline_mode = #tpu.pipeline_mode<synchronous>, transform_indices = @transform_4, window_bounds = array<i64: 1, 256>}, {pipeline_mode = #tpu.pipeline_mode<synchronous>, transform_indices = @transform_5, window_bounds = array<i64: 1, 256>}, {transform_indices = @transform_6, window_bounds = array<i64: 1, 8, 256>}, {transform_indices = @transform_7, window_bounds = array<i64: 1, 2, 256>}]} {
    %c0 = arith.constant 0 : index
    %c0_0 = arith.constant 0 : index
    %c0_1 = arith.constant 0 : index
    %0 = vector.load %arg1[%c0, %c0_0, %c0_1] : memref<1x8x256xf32, #tpu.memory_space<vmem>>, vector<1x8x256xf32>
    %1 = vector.shape_cast %0 : vector<1x8x256xf32> to vector<8x256xf32>
    %c0_2 = arith.constant 0 : index
    %c0_3 = arith.constant 0 : index
    %2 = vector.load %arg5[%c0_2, %c0_3] : memref<1x256xf32, #tpu.memory_space<vmem>>, vector<1x256xf32>
    %3 = vector.broadcast %2 : vector<1x256xf32> to vector<8x256xf32>
    %4 = arith.mulf %1, %3 : vector<8x256xf32>
    %c0_4 = arith.constant 0 : index
    %c0_5 = arith.constant 0 : index
    %5 = vector.load %arg6[%c0_4, %c0_5] : memref<1x256xf32, #tpu.memory_space<vmem>>, vector<1x256xf32>
    %6 = vector.broadcast %5 : vector<1x256xf32> to vector<8x256xf32>
    %7 = arith.addf %4, %6 : vector<8x256xf32>
    %cst = arith.constant 0.000000e+00 : f32
    %8 = vector.broadcast %cst : f32 to vector<8x256xf32>
    %9 = arith.maximumf %7, %8 : vector<8x256xf32>
    %cst_6 = arith.constant 0.000000e+00 : f32
    %10 = vector.broadcast %cst_6 : f32 to vector<1x256xf32>
    %11 = tpu.concatenate %10, %9, %10 in 0 : vector<1x256xf32>, vector<8x256xf32>, vector<1x256xf32> -> vector<10x256xf32>
    %12 = arith.truncf %11 : vector<10x256xf32> to vector<10x256xbf16>
    %13 = vector.extract_strided_slice %12 {offsets = [0, 0], sizes = [8, 256], strides = [1, 1]} : vector<10x256xbf16> to vector<8x256xbf16>
    %c0_7 = arith.constant 0 : index
    %c0_8 = arith.constant 0 : index
    %c0_9 = arith.constant 0 : index
    %14 = vector.load %arg3[%c0_7, %c0_8, %c0_9] : memref<3x256x256xbf16, #tpu.memory_space<vmem>>, vector<1x256x256xbf16>
    %15 = vector.shape_cast %14 : vector<1x256x256xbf16> to vector<256x256xbf16>
    %cst_10 = arith.constant dense<0.000000e+00> : vector<8x256xf32>
    %16 = tpu.matmul %13, %15, %cst_10 {dimension_numbers = #tpu.dot_dimension_numbers<[1], [0], [0], [1], [0, 0, 1, 1], [], []>} : vector<8x256xbf16>, vector<256x256xbf16>, vector<8x256xf32> -> vector<8x256xf32>
    %17 = vector.extract_strided_slice %12 {offsets = [1, 0], sizes = [8, 256], strides = [1, 1]} : vector<10x256xbf16> to vector<8x256xbf16>
    %c1 = arith.constant 1 : index
    %c0_11 = arith.constant 0 : index
    %c0_12 = arith.constant 0 : index
    %18 = vector.load %arg3[%c1, %c0_11, %c0_12] : memref<3x256x256xbf16, #tpu.memory_space<vmem>>, vector<1x256x256xbf16>
    %19 = vector.shape_cast %18 : vector<1x256x256xbf16> to vector<256x256xbf16>
    %cst_13 = arith.constant dense<0.000000e+00> : vector<8x256xf32>
    %20 = tpu.matmul %17, %19, %cst_13 {dimension_numbers = #tpu.dot_dimension_numbers<[1], [0], [0], [1], [0, 0, 1, 1], [], []>} : vector<8x256xbf16>, vector<256x256xbf16>, vector<8x256xf32> -> vector<8x256xf32>
    %21 = arith.addf %16, %20 : vector<8x256xf32>
    %22 = vector.extract_strided_slice %12 {offsets = [2, 0], sizes = [8, 256], strides = [1, 1]} : vector<10x256xbf16> to vector<8x256xbf16>
    %c2 = arith.constant 2 : index
    %c0_14 = arith.constant 0 : index
    %c0_15 = arith.constant 0 : index
    %23 = vector.load %arg3[%c2, %c0_14, %c0_15] : memref<3x256x256xbf16, #tpu.memory_space<vmem>>, vector<1x256x256xbf16>
    %24 = vector.shape_cast %23 : vector<1x256x256xbf16> to vector<256x256xbf16>
    %cst_16 = arith.constant dense<0.000000e+00> : vector<8x256xf32>
    %25 = tpu.matmul %22, %24, %cst_16 {dimension_numbers = #tpu.dot_dimension_numbers<[1], [0], [0], [1], [0, 0, 1, 1], [], []>} : vector<8x256xbf16>, vector<256x256xbf16>, vector<8x256xf32> -> vector<8x256xf32>
    %26 = arith.addf %21, %25 : vector<8x256xf32>
    %c0_17 = arith.constant 0 : index
    %c0_18 = arith.constant 0 : index
    %27 = vector.load %arg4[%c0_17, %c0_18] : memref<1x256xf32, #tpu.memory_space<vmem>>, vector<1x256xf32>
    %28 = vector.broadcast %27 : vector<1x256xf32> to vector<8x256xf32>
    %29 = arith.addf %26, %28 : vector<8x256xf32>
    %c0_19 = arith.constant 0 : index
    %c0_20 = arith.constant 0 : index
    %c0_21 = arith.constant 0 : index
    %30 = vector.load %arg2[%c0_19, %c0_20, %c0_21] : memref<1x8x256xf32, #tpu.memory_space<vmem>>, vector<1x8x256xf32>
    %31 = vector.shape_cast %30 : vector<1x8x256xf32> to vector<8x256xf32>
    %32 = arith.addf %29, %31 : vector<8x256xf32>
    %cst_22 = arith.constant dense<0.000000e+00> : vector<256xf32>
    %33 = vector.multi_reduction <add>, %32, %cst_22 [0] : vector<8x256xf32> to vector<256xf32>
    %34 = vector.shape_cast %33 : vector<256xf32> to vector<1x256xf32>
    %35 = arith.mulf %32, %32 : vector<8x256xf32>
    %cst_23 = arith.constant dense<0.000000e+00> : vector<256xf32>
    %36 = vector.multi_reduction <add>, %35, %cst_23 [0] : vector<8x256xf32> to vector<256xf32>
    %37 = vector.shape_cast %36 : vector<256xf32> to vector<1x256xf32>
    %38 = tpu.concatenate %34, %37 in 0 : vector<1x256xf32>, vector<1x256xf32> -> vector<2x256xf32>
    %c0_24 = arith.constant 0 : index
    %c0_25 = arith.constant 0 : index
    %c0_26 = arith.constant 0 : index
    %39 = vector.load %arg8[%c0_24, %c0_25, %c0_26] : memref<1x2x256xf32, #tpu.memory_space<vmem>>, vector<1x2x256xf32>
    %40 = vector.shape_cast %39 : vector<1x2x256xf32> to vector<2x256xf32>
    %41 = vector.shape_cast %38 : vector<2x256xf32> to vector<1x2x256xf32>
    tpu.vector_store %arg8[%c0_24, %c0_25, %c0_26], %41 {strides = array<i32>} : memref<1x2x256xf32, #tpu.memory_space<vmem>>, vector<1x2x256xf32>,
    %c0_27 = arith.constant 0 : index
    %c0_28 = arith.constant 0 : index
    %c0_29 = arith.constant 0 : index
    %42 = vector.load %arg7[%c0_27, %c0_28, %c0_29] : memref<1x8x256xf32, #tpu.memory_space<vmem>>, vector<1x8x256xf32>
    %43 = vector.shape_cast %42 : vector<1x8x256xf32> to vector<8x256xf32>
    %44 = vector.shape_cast %32 : vector<8x256xf32> to vector<1x8x256xf32>
    tpu.vector_store %arg7[%c0_27, %c0_28, %c0_29], %44 {strides = array<i32>} : memref<1x8x256xf32, #tpu.memory_space<vmem>>, vector<1x8x256xf32>,
    return
  }
  func.func @transform_0(%arg0: i32) -> (i32, i32, i32) {
    %c0_i32 = arith.constant 0 : i32
    %c0_i32_0 = arith.constant 0 : i32
    %c0_i32_1 = arith.constant 0 : i32
    return %arg0, %c0_i32, %c0_i32_0 : i32, i32, i32
  }
  func.func @transform_1(%arg0: i32) -> (i32, i32, i32) {
    %c0_i32 = arith.constant 0 : i32
    %c0_i32_0 = arith.constant 0 : i32
    %c0_i32_1 = arith.constant 0 : i32
    return %arg0, %c0_i32, %c0_i32_0 : i32, i32, i32
  }
  func.func @transform_2(%arg0: i32) -> (i32, i32, i32) {
    %c0_i32 = arith.constant 0 : i32
    %c0_i32_0 = arith.constant 0 : i32
    %c0_i32_1 = arith.constant 0 : i32
    %c0_i32_2 = arith.constant 0 : i32
    return %c0_i32, %c0_i32_0, %c0_i32_1 : i32, i32, i32
  }
  func.func @transform_3(%arg0: i32) -> (i32, i32) {
    %c0_i32 = arith.constant 0 : i32
    %c0_i32_0 = arith.constant 0 : i32
    %c0_i32_1 = arith.constant 0 : i32
    return %c0_i32, %c0_i32_0 : i32, i32
  }
  func.func @transform_4(%arg0: i32) -> (i32, i32) {
    %c0_i32 = arith.constant 0 : i32
    %c0_i32_0 = arith.constant 0 : i32
    %c0_i32_1 = arith.constant 0 : i32
    return %c0_i32, %c0_i32_0 : i32, i32
  }
  func.func @transform_5(%arg0: i32) -> (i32, i32) {
    %c0_i32 = arith.constant 0 : i32
    %c0_i32_0 = arith.constant 0 : i32
    %c0_i32_1 = arith.constant 0 : i32
    return %c0_i32, %c0_i32_0 : i32, i32
  }
  func.func @transform_6(%arg0: i32) -> (i32, i32, i32) {
    %c0_i32 = arith.constant 0 : i32
    %c0_i32_0 = arith.constant 0 : i32
    %c0_i32_1 = arith.constant 0 : i32
    return %arg0, %c0_i32, %c0_i32_0 : i32, i32, i32
  }
  func.func @transform_7(%arg0: i32) -> (i32, i32, i32) {
    %c0_i32 = arith.constant 0 : i32
    %c0_i32_0 = arith.constant 0 : i32
    %c0_i32_1 = arith.constant 0 : i32
    return %arg0, %c0_i32, %c0_i32_0 : i32, i32, i32
  }
}

module attributes {stable_mosaic.version = 11 : i64} {
  func.func @kernel(%arg0: i32, %arg1: memref<1x8x256xf32, #tpu.memory_space<vmem>>, %arg2: memref<3x256x512xbf16, #tpu.memory_space<vmem>>, %arg3: memref<1x512xf32, #tpu.memory_space<vmem>>, %arg4: memref<1x256xf32, #tpu.memory_space<vmem>>, %arg5: memref<1x256xf32, #tpu.memory_space<vmem>>, %arg6: memref<1x8x512xf32, #tpu.memory_space<vmem>>, %arg7: memref<1x2x512xf32, #tpu.memory_space<vmem>>) attributes {dimension_semantics = [#tpu.dimension_semantics<parallel>], iteration_bounds = array<i64: 2>, scalar_prefetch = 0 : i64, scratch_operands = 0 : i64, tpu.core_type = #tpu.core_type<tc>, window_params = [{transform_indices = @transform_0, window_bounds = array<i64: 1, 8, 256>}, {pipeline_mode = #tpu.pipeline_mode<synchronous>, transform_indices = @transform_1, window_bounds = array<i64: 3, 256, 512>}, {pipeline_mode = #tpu.pipeline_mode<synchronous>, transform_indices = @transform_2, window_bounds = array<i64: 1, 512>}, {pipeline_mode = #tpu.pipeline_mode<synchronous>, transform_indices = @transform_3, window_bounds = array<i64: 1, 256>}, {pipeline_mode = #tpu.pipeline_mode<synchronous>, transform_indices = @transform_4, window_bounds = array<i64: 1, 256>}, {transform_indices = @transform_5, window_bounds = array<i64: 1, 8, 512>}, {transform_indices = @transform_6, window_bounds = array<i64: 1, 2, 512>}]} {
    %c0 = arith.constant 0 : index
    %c0_0 = arith.constant 0 : index
    %c0_1 = arith.constant 0 : index
    %0 = vector.load %arg1[%c0, %c0_0, %c0_1] : memref<1x8x256xf32, #tpu.memory_space<vmem>>, vector<1x8x256xf32>
    %1 = vector.shape_cast %0 : vector<1x8x256xf32> to vector<8x256xf32>
    %c0_2 = arith.constant 0 : index
    %c0_3 = arith.constant 0 : index
    %2 = vector.load %arg4[%c0_2, %c0_3] : memref<1x256xf32, #tpu.memory_space<vmem>>, vector<1x256xf32>
    %3 = vector.broadcast %2 : vector<1x256xf32> to vector<8x256xf32>
    %4 = arith.mulf %1, %3 : vector<8x256xf32>
    %c0_4 = arith.constant 0 : index
    %c0_5 = arith.constant 0 : index
    %5 = vector.load %arg5[%c0_4, %c0_5] : memref<1x256xf32, #tpu.memory_space<vmem>>, vector<1x256xf32>
    %6 = vector.broadcast %5 : vector<1x256xf32> to vector<8x256xf32>
    %7 = arith.addf %4, %6 : vector<8x256xf32>
    %cst = arith.constant 0.000000e+00 : f32
    %8 = vector.broadcast %cst : f32 to vector<8x256xf32>
    %9 = arith.maximumf %7, %8 : vector<8x256xf32>
    %cst_6 = arith.constant 0.000000e+00 : f32
    %10 = vector.broadcast %cst_6 : f32 to vector<1x256xf32>
    %11 = tpu.concatenate %10, %9, %10 in 0 : vector<1x256xf32>, vector<8x256xf32>, vector<1x256xf32> -> vector<10x256xf32>
    %12 = arith.truncf %11 : vector<10x256xf32> to vector<10x256xbf16>
    %13 = vector.extract_strided_slice %12 {offsets = [0, 0], sizes = [8, 256], strides = [1, 1]} : vector<10x256xbf16> to vector<8x256xbf16>
    %c0_7 = arith.constant 0 : index
    %c0_8 = arith.constant 0 : index
    %c0_9 = arith.constant 0 : index
    %14 = vector.load %arg2[%c0_7, %c0_8, %c0_9] : memref<3x256x512xbf16, #tpu.memory_space<vmem>>, vector<1x256x512xbf16>
    %15 = vector.shape_cast %14 : vector<1x256x512xbf16> to vector<256x512xbf16>
    %cst_10 = arith.constant dense<0.000000e+00> : vector<8x512xf32>
    %16 = tpu.matmul %13, %15, %cst_10 {dimension_numbers = #tpu.dot_dimension_numbers<[1], [0], [0], [1], [0, 0, 1, 1], [], []>} : vector<8x256xbf16>, vector<256x512xbf16>, vector<8x512xf32> -> vector<8x512xf32>
    %17 = vector.extract_strided_slice %12 {offsets = [1, 0], sizes = [8, 256], strides = [1, 1]} : vector<10x256xbf16> to vector<8x256xbf16>
    %c1 = arith.constant 1 : index
    %c0_11 = arith.constant 0 : index
    %c0_12 = arith.constant 0 : index
    %18 = vector.load %arg2[%c1, %c0_11, %c0_12] : memref<3x256x512xbf16, #tpu.memory_space<vmem>>, vector<1x256x512xbf16>
    %19 = vector.shape_cast %18 : vector<1x256x512xbf16> to vector<256x512xbf16>
    %cst_13 = arith.constant dense<0.000000e+00> : vector<8x512xf32>
    %20 = tpu.matmul %17, %19, %cst_13 {dimension_numbers = #tpu.dot_dimension_numbers<[1], [0], [0], [1], [0, 0, 1, 1], [], []>} : vector<8x256xbf16>, vector<256x512xbf16>, vector<8x512xf32> -> vector<8x512xf32>
    %21 = arith.addf %16, %20 : vector<8x512xf32>
    %22 = vector.extract_strided_slice %12 {offsets = [2, 0], sizes = [8, 256], strides = [1, 1]} : vector<10x256xbf16> to vector<8x256xbf16>
    %c2 = arith.constant 2 : index
    %c0_14 = arith.constant 0 : index
    %c0_15 = arith.constant 0 : index
    %23 = vector.load %arg2[%c2, %c0_14, %c0_15] : memref<3x256x512xbf16, #tpu.memory_space<vmem>>, vector<1x256x512xbf16>
    %24 = vector.shape_cast %23 : vector<1x256x512xbf16> to vector<256x512xbf16>
    %cst_16 = arith.constant dense<0.000000e+00> : vector<8x512xf32>
    %25 = tpu.matmul %22, %24, %cst_16 {dimension_numbers = #tpu.dot_dimension_numbers<[1], [0], [0], [1], [0, 0, 1, 1], [], []>} : vector<8x256xbf16>, vector<256x512xbf16>, vector<8x512xf32> -> vector<8x512xf32>
    %26 = arith.addf %21, %25 : vector<8x512xf32>
    %c0_17 = arith.constant 0 : index
    %c0_18 = arith.constant 0 : index
    %27 = vector.load %arg3[%c0_17, %c0_18] : memref<1x512xf32, #tpu.memory_space<vmem>>, vector<1x512xf32>
    %28 = vector.broadcast %27 : vector<1x512xf32> to vector<8x512xf32>
    %29 = arith.addf %26, %28 : vector<8x512xf32>
    %cst_19 = arith.constant dense<0.000000e+00> : vector<512xf32>
    %30 = vector.multi_reduction <add>, %29, %cst_19 [0] : vector<8x512xf32> to vector<512xf32>
    %31 = vector.shape_cast %30 : vector<512xf32> to vector<1x512xf32>
    %32 = arith.mulf %29, %29 : vector<8x512xf32>
    %cst_20 = arith.constant dense<0.000000e+00> : vector<512xf32>
    %33 = vector.multi_reduction <add>, %32, %cst_20 [0] : vector<8x512xf32> to vector<512xf32>
    %34 = vector.shape_cast %33 : vector<512xf32> to vector<1x512xf32>
    %35 = tpu.concatenate %31, %34 in 0 : vector<1x512xf32>, vector<1x512xf32> -> vector<2x512xf32>
    %c0_21 = arith.constant 0 : index
    %c0_22 = arith.constant 0 : index
    %c0_23 = arith.constant 0 : index
    %36 = vector.load %arg7[%c0_21, %c0_22, %c0_23] : memref<1x2x512xf32, #tpu.memory_space<vmem>>, vector<1x2x512xf32>
    %37 = vector.shape_cast %36 : vector<1x2x512xf32> to vector<2x512xf32>
    %38 = vector.shape_cast %35 : vector<2x512xf32> to vector<1x2x512xf32>
    tpu.vector_store %arg7[%c0_21, %c0_22, %c0_23], %38 {strides = array<i32>} : memref<1x2x512xf32, #tpu.memory_space<vmem>>, vector<1x2x512xf32>,
    %c0_24 = arith.constant 0 : index
    %c0_25 = arith.constant 0 : index
    %c0_26 = arith.constant 0 : index
    %39 = vector.load %arg6[%c0_24, %c0_25, %c0_26] : memref<1x8x512xf32, #tpu.memory_space<vmem>>, vector<1x8x512xf32>
    %40 = vector.shape_cast %39 : vector<1x8x512xf32> to vector<8x512xf32>
    %41 = vector.shape_cast %29 : vector<8x512xf32> to vector<1x8x512xf32>
    tpu.vector_store %arg6[%c0_24, %c0_25, %c0_26], %41 {strides = array<i32>} : memref<1x8x512xf32, #tpu.memory_space<vmem>>, vector<1x8x512xf32>,
    return
  }
  func.func @transform_0(%arg0: i32) -> (i32, i32, i32) {
    %c0_i32 = arith.constant 0 : i32
    %c0_i32_0 = arith.constant 0 : i32
    %c0_i32_1 = arith.constant 0 : i32
    return %arg0, %c0_i32, %c0_i32_0 : i32, i32, i32
  }
  func.func @transform_1(%arg0: i32) -> (i32, i32, i32) {
    %c0_i32 = arith.constant 0 : i32
    %c0_i32_0 = arith.constant 0 : i32
    %c0_i32_1 = arith.constant 0 : i32
    %c0_i32_2 = arith.constant 0 : i32
    return %c0_i32, %c0_i32_0, %c0_i32_1 : i32, i32, i32
  }
  func.func @transform_2(%arg0: i32) -> (i32, i32) {
    %c0_i32 = arith.constant 0 : i32
    %c0_i32_0 = arith.constant 0 : i32
    %c0_i32_1 = arith.constant 0 : i32
    return %c0_i32, %c0_i32_0 : i32, i32
  }
  func.func @transform_3(%arg0: i32) -> (i32, i32) {
    %c0_i32 = arith.constant 0 : i32
    %c0_i32_0 = arith.constant 0 : i32
    %c0_i32_1 = arith.constant 0 : i32
    return %c0_i32, %c0_i32_0 : i32, i32
  }
  func.func @transform_4(%arg0: i32) -> (i32, i32) {
    %c0_i32 = arith.constant 0 : i32
    %c0_i32_0 = arith.constant 0 : i32
    %c0_i32_1 = arith.constant 0 : i32
    return %c0_i32, %c0_i32_0 : i32, i32
  }
  func.func @transform_5(%arg0: i32) -> (i32, i32, i32) {
    %c0_i32 = arith.constant 0 : i32
    %c0_i32_0 = arith.constant 0 : i32
    %c0_i32_1 = arith.constant 0 : i32
    return %arg0, %c0_i32, %c0_i32_0 : i32, i32, i32
  }
  func.func @transform_6(%arg0: i32) -> (i32, i32, i32) {
    %c0_i32 = arith.constant 0 : i32
    %c0_i32_0 = arith.constant 0 : i32
    %c0_i32_1 = arith.constant 0 : i32
    return %arg0, %c0_i32, %c0_i32_0 : i32, i32, i32
  }
}

module attributes {stable_mosaic.version = 11 : i64} {
  func.func @kernel(%arg0: i32, %arg1: memref<1x8x512xf32, #tpu.memory_space<vmem>>, %arg2: memref<1x512xf32, #tpu.memory_space<vmem>>, %arg3: memref<1x512xf32, #tpu.memory_space<vmem>>, %arg4: memref<4x8xf32, #tpu.memory_space<vmem>>, %arg5: memref<512x128xf32, #tpu.memory_space<vmem>>, %arg6: memref<1x4x128xf32, #tpu.memory_space<vmem>>) attributes {dimension_semantics = [#tpu.dimension_semantics<parallel>], iteration_bounds = array<i64: 2>, scalar_prefetch = 0 : i64, scratch_operands = 0 : i64, tpu.core_type = #tpu.core_type<tc>, window_params = [{transform_indices = @transform_0, window_bounds = array<i64: 1, 8, 512>}, {pipeline_mode = #tpu.pipeline_mode<synchronous>, transform_indices = @transform_1, window_bounds = array<i64: 1, 512>}, {pipeline_mode = #tpu.pipeline_mode<synchronous>, transform_indices = @transform_2, window_bounds = array<i64: 1, 512>}, {pipeline_mode = #tpu.pipeline_mode<synchronous>, transform_indices = @transform_3, window_bounds = array<i64: 4, 8>}, {pipeline_mode = #tpu.pipeline_mode<synchronous>, transform_indices = @transform_4, window_bounds = array<i64: 512, 128>}, {transform_indices = @transform_5, window_bounds = array<i64: 1, 4, 128>}]} {
    %c0 = arith.constant 0 : index
    %c0_0 = arith.constant 0 : index
    %c0_1 = arith.constant 0 : index
    %0 = vector.load %arg1[%c0, %c0_0, %c0_1] : memref<1x8x512xf32, #tpu.memory_space<vmem>>, vector<1x8x512xf32>
    %1 = vector.shape_cast %0 : vector<1x8x512xf32> to vector<8x512xf32>
    %c0_2 = arith.constant 0 : index
    %c0_3 = arith.constant 0 : index
    %2 = vector.load %arg2[%c0_2, %c0_3] : memref<1x512xf32, #tpu.memory_space<vmem>>, vector<1x512xf32>
    %3 = vector.broadcast %2 : vector<1x512xf32> to vector<8x512xf32>
    %4 = arith.mulf %1, %3 : vector<8x512xf32>
    %c0_4 = arith.constant 0 : index
    %c0_5 = arith.constant 0 : index
    %5 = vector.load %arg3[%c0_4, %c0_5] : memref<1x512xf32, #tpu.memory_space<vmem>>, vector<1x512xf32>
    %6 = vector.broadcast %5 : vector<1x512xf32> to vector<8x512xf32>
    %7 = arith.addf %4, %6 : vector<8x512xf32>
    %cst = arith.constant 0.000000e+00 : f32
    %8 = vector.broadcast %cst : f32 to vector<8x512xf32>
    %9 = arith.maximumf %7, %8 : vector<8x512xf32>
    %c0_6 = arith.constant 0 : index
    %c0_7 = arith.constant 0 : index
    %10 = vector.load %arg4[%c0_6, %c0_7] : memref<4x8xf32, #tpu.memory_space<vmem>>, vector<4x8xf32>
    %cst_8 = arith.constant dense<0.000000e+00> : vector<4x512xf32>
    %11 = tpu.matmul %10, %9, %cst_8 {dimension_numbers = #tpu.dot_dimension_numbers<[1], [0], [0], [1], [0, 0, 1, 1], [], []>} : vector<4x8xf32>, vector<8x512xf32>, vector<4x512xf32> -> vector<4x512xf32>
    %c0_9 = arith.constant 0 : index
    %c0_10 = arith.constant 0 : index
    %12 = vector.load %arg5[%c0_9, %c0_10] : memref<512x128xf32, #tpu.memory_space<vmem>>, vector<512x128xf32>
    %cst_11 = arith.constant dense<0.000000e+00> : vector<4x128xf32>
    %13 = tpu.matmul %11, %12, %cst_11 {dimension_numbers = #tpu.dot_dimension_numbers<[1], [0], [0], [1], [0, 0, 1, 1], [], []>} : vector<4x512xf32>, vector<512x128xf32>, vector<4x128xf32> -> vector<4x128xf32>
    %c0_12 = arith.constant 0 : index
    %c0_13 = arith.constant 0 : index
    %c0_14 = arith.constant 0 : index
    %14 = vector.load %arg6[%c0_12, %c0_13, %c0_14] : memref<1x4x128xf32, #tpu.memory_space<vmem>>, vector<1x4x128xf32>
    %15 = vector.shape_cast %14 : vector<1x4x128xf32> to vector<4x128xf32>
    %16 = vector.shape_cast %13 : vector<4x128xf32> to vector<1x4x128xf32>
    tpu.vector_store %arg6[%c0_12, %c0_13, %c0_14], %16 {strides = array<i32>} : memref<1x4x128xf32, #tpu.memory_space<vmem>>, vector<1x4x128xf32>,
    return
  }
  func.func @transform_0(%arg0: i32) -> (i32, i32, i32) {
    %c0_i32 = arith.constant 0 : i32
    %c0_i32_0 = arith.constant 0 : i32
    %c0_i32_1 = arith.constant 0 : i32
    return %arg0, %c0_i32, %c0_i32_0 : i32, i32, i32
  }
  func.func @transform_1(%arg0: i32) -> (i32, i32) {
    %c0_i32 = arith.constant 0 : i32
    %c0_i32_0 = arith.constant 0 : i32
    %c0_i32_1 = arith.constant 0 : i32
    return %c0_i32, %c0_i32_0 : i32, i32
  }
  func.func @transform_2(%arg0: i32) -> (i32, i32) {
    %c0_i32 = arith.constant 0 : i32
    %c0_i32_0 = arith.constant 0 : i32
    %c0_i32_1 = arith.constant 0 : i32
    return %c0_i32, %c0_i32_0 : i32, i32
  }
  func.func @transform_3(%arg0: i32) -> (i32, i32) {
    %c0_i32 = arith.constant 0 : i32
    %c0_i32_0 = arith.constant 0 : i32
    %c0_i32_1 = arith.constant 0 : i32
    return %c0_i32, %c0_i32_0 : i32, i32
  }
  func.func @transform_4(%arg0: i32) -> (i32, i32) {
    %c0_i32 = arith.constant 0 : i32
    %c0_i32_0 = arith.constant 0 : i32
    %c0_i32_1 = arith.constant 0 : i32
    return %c0_i32, %c0_i32_0 : i32, i32
  }
  func.func @transform_5(%arg0: i32) -> (i32, i32, i32) {
    %c0_i32 = arith.constant 0 : i32
    %c0_i32_0 = arith.constant 0 : i32
    %c0_i32_1 = arith.constant 0 : i32
    return %arg0, %c0_i32, %c0_i32_0 : i32, i32, i32
  }
}

</mosaic_0001>

<bundles_post_ra>
// kernel: tile.58
= control target key start
LH: loop header
LB: loop body
LE: loop exit
PB: predicated region body
PF: predicated region fallthrough
CT: control target
= control target key end

     0   :  { %s64_s0 = inlined_call_operand.vmem [shape: f32[4], index: 0, kind: input, shape index: {}]   ;;  %s65_s1 = inlined_call_operand.vmem [shape: f32[64,4], index: 1, kind: output, shape index: {}]  }
   0x1   :  { %v4_v0 = vld [vmem:[%s64_s0] ss:$0 sm:$0xff] }
   0x2   :  { %5 = vst [vmem:[%s65_s1] sm:$0xff] %v4_v0  ;;  %20 = vst [vmem:[%s65_s1 + $0x8] sm:$0xff] %v4_v0 }
   0x3   :  { %21 = vst [vmem:[%s65_s1 + $0x10] sm:$0xff] %v4_v0  ;;  %22 = vst [vmem:[%s65_s1 + $0x18] sm:$0xff] %v4_v0 }
   0x4   :  { %23 = vst [vmem:[%s65_s1 + $0x20] sm:$0xff] %v4_v0  ;;  %24 = vst [vmem:[%s65_s1 + $0x28] sm:$0xff] %v4_v0 }
   0x5   :  { %25 = vst [vmem:[%s65_s1 + $0x30] sm:$0xff] %v4_v0  ;;  %26 = vst [vmem:[%s65_s1 + $0x38] sm:$0xff] %v4_v0 }

// kernel: tile.59
= control target key start
LH: loop header
LB: loop body
LE: loop exit
PB: predicated region body
PF: predicated region fallthrough
CT: control target
= control target key end

     0   :  { %vm5_vm0 = vcmask 1041409   ;;  %s428_s14 = smov 124   ;;  %s429_s21 = smov 116   ;;  %vm7_vm1 = vcmask 31744   ;;  %vm17_vm2 = vcmask 1048544   ;;  %vm27_vm3 = vcmask 1015744   ;;  %s699_s0 = inlined_call_operand.vmem [shape: f32[64,4], index: 0, kind: input, shape index: {}]   ;;  %s700_s1 = inlined_call_operand.vmem [shape: f32[1,256], index: 1, kind: output, shape index: {}]  }
   0x1   :  { %v334_v0 = vld [vmem:[%s699_s0 + $0x1f] sm:$0x1]   ;;  %v338_v3 = vld [vmem:[%s699_s0 + $0x1d] sm:$0x1]   ;;  %v336_v6 = vld [vmem:[%s699_s0 + $0x1e] sm:$0x1]  }
   0x2   :  { %v335_v1 = vld [vmem:[%s699_s0 + $0x3e] sm:$0x2]   ;;  %v339_v4 = vld [vmem:[%s699_s0 + $0x3c] sm:$0x2]   ;;  %v337_v7 = vld [vmem:[%s699_s0 + $0x3d] sm:$0x2]  }
   0x3   :  { %v14_v2 = vsel %vm5_vm0, %v335_v1, %v334_v0  ;;  %v34_v5 = vsel %vm5_vm0, %v339_v4, %v338_v3  ;;  %v340_v8 = vld [vmem:[%s699_s0 + $0x1c] sm:$0x1]   ;;  %v24_v9 = vsel %vm5_vm0, %v337_v7, %v336_v6  ;;  %v342_v12 = vld [vmem:[%s699_s0 + $0x1b] sm:$0x1]   ;;  %v344_v14 = vld [vmem:[%s699_s0 + $0x1a] sm:$0x1]  }
   0x4   :  { %15 = vrot.lane.b32.xlu0 %v14_v2, %s428_s14  ;;  %35 = vrot.lane.b32.xlu1 %v34_v5, %s429_s21  ;;  %v341_v10 = vld [vmem:[%s699_s0 + $0x3b] sm:$0x2]   ;;  %v343_v13 = vld [vmem:[%s699_s0 + $0x3a] sm:$0x2]   ;;  %s430_s3 = smov 120   ;;  %s431_s4 = smov 112  }
   0x5   :  { %v44_v11 = vsel %vm5_vm0, %v341_v10, %v340_v8  ;;  %v345_v15 = vld [vmem:[%s699_s0 + $0x39] sm:$0x2]   ;;  %v54_v16 = vsel %vm5_vm0, %v343_v13, %v342_v12  ;;  %v346_v18 = vld [vmem:[%s699_s0 + $0x19] sm:$0x1]   ;;  %v348_v20 = vld [vmem:[%s699_s0 + $0x18] sm:$0x1]  }
   0x6   :  { %v64_v17 = vsel %vm5_vm0, %v345_v15, %v344_v14  ;;  %v347_v19 = vld [vmem:[%s699_s0 + $0x38] sm:$0x2]   ;;  %v349_v21 = vld [vmem:[%s699_s0 + $0x37] sm:$0x2]   ;;  %s432_s13 = smov 108   ;;  %s433_s14 = smov 104  }
   0x7   :  { %v74_v22 = vsel %vm5_vm0, %v347_v19, %v346_v18  ;;  %v84_v23 = vsel %vm5_vm0, %v349_v21, %v348_v20  ;;  %v350_v24 = vld [vmem:[%s699_s0 + $0x17] sm:$0x1]   ;;  %v352_v26 = vld [vmem:[%s699_s0 + $0x16] sm:$0x1]   ;;  %s434_s23 = smov 100   ;;  %s435_s24 = smov 96  }
   0x8   :  { %25 = vrot.lane.b32.xlu0 %v24_v9, %s430_s3  ;;  %45 = vrot.lane.b32.xlu1 %v44_v11, %s431_s4  ;;  %v351_v25 = vld [vmem:[%s699_s0 + $0x36] sm:$0x2]   ;;  %v353_v27 = vld [vmem:[%s699_s0 + $0x35] sm:$0x2]   ;;  %s436_s4 = smov 92   ;;  %s437_s5 = smov 88  }
   0x9   :  { %v94_v28 = vsel %vm5_vm0, %v351_v25, %v350_v24  ;;  %v104_v29 = vsel %vm5_vm0, %v353_v27, %v352_v26  ;;  %v354_v30 = vld [vmem:[%s699_s0 + $0x15] sm:$0x1]   ;;  %v356_v32 = vld [vmem:[%s699_s0 + $0x14] sm:$0x1]   ;;  %v358_v36 = vld [vmem:[%s699_s0 + $0x13] sm:$0x1]  }
   0xa   :  { %v355_v31 = vld [vmem:[%s699_s0 + $0x34] sm:$0x2]   ;;  %v357_v33 = vld [vmem:[%s699_s0 + $0x33] sm:$0x2]   ;;  %v359_v37 = vld [vmem:[%s699_s0 + $0x32] sm:$0x2]  }
   0xb   :  { %v114_v34 = vsel %vm5_vm0, %v355_v31, %v354_v30  ;;  %v124_v35 = vsel %vm5_vm0, %v357_v33, %v356_v32  ;;  %v360_v38 = vld [vmem:[%s699_s0 + $0x12] sm:$0x1]   ;;  %s439_s15 = smov 80   ;;  %v134_v40 = vsel %vm5_vm0, %v359_v37, %v358_v36  ;;  %v362_v42 = vld [vmem:[%s699_s0 + $0x11] sm:$0x1]   ;;  %s441_s29 = smov 72  }
   0xc   :  { %55 = vrot.lane.b32.xlu0 %v54_v16, %s432_s13  ;;  %65 = vrot.lane.b32.xlu1 %v64_v17, %s433_s14  ;;  %v361_v39 = vld [vmem:[%s699_s0 + $0x31] sm:$0x2]   ;;  %s438_s14 = smov 84   ;;  %v363_v43 = vld [vmem:[%s699_s0 + $0x30] sm:$0x2]   ;;  %s442_s9 = smov 68  }
   0xd   :  { %v144_v41 = vsel %vm5_vm0, %v361_v39, %v360_v38  ;;  %v364_v44 = vld [vmem:[%s699_s0 + $0x10] sm:$0x1]   ;;  %v2_v46 = vld [vmem:[%s699_s0] sm:$0x1]   ;;  %v154_v48 = vsel %vm5_vm0, %v363_v43, %v362_v42  ;;  %v366_v51 = vld [vmem:[%s699_s0 + $0xf] sm:$0x1]  }
   0xe   :  { %v365_v45 = vld [vmem:[%s699_s0 + $0x2f] sm:$0x2]   ;;  %v333_v47 = vld [vmem:[%s699_s0 + $0x1f] sm:$0x2]   ;;  %v367_v52 = vld [vmem:[%s699_s0 + $0x2e] sm:$0x2]  }
   0xf   :  { %v6_v49 = vsel %vm5_vm0, %v333_v47, %v2_v46  ;;  %v164_v50 = vsel %vm5_vm0, %v365_v45, %v364_v44  ;;  %v368_v53 = vld [vmem:[%s699_s0 + $0xe] sm:$0x1]   ;;  %s443_s10 = smov 64   ;;  %v174_v55 = vsel %vm5_vm0, %v367_v52, %v366_v51  ;;  %v370_v57 = vld [vmem:[%s699_s0 + $0xd] sm:$0x1]   ;;  %s444_s19 = smov 60  }
  0x10   :  { %75 = vrot.lane.b32.xlu0 %v74_v22, %s434_s23  ;;  %85 = vrot.lane.b32.xlu1 %v84_v23, %s435_s24  ;;  %s440_s24 = smov 76   ;;  %8 = vst.msk [vmem:[#allocation0] ss:$8 sm:$0x3] %vm7_vm1, %v6_v49   ;;  %v369_v54 = vld [vmem:[%s699_s0 + $0x2d] sm:$0x2]  }
  0x11   :  { %v184_v56 = vsel %vm5_vm0, %v369_v54, %v368_v53  ;;  %v371_v58 = vld [vmem:[%s699_s0 + $0x2c] sm:$0x2]   ;;  %v372_v59 = vld [vmem:[%s699_s0 + $0xc] sm:$0x1]   ;;  %s445_s20 = smov 56   ;;  %s447_s30 = smov 48  }
  0x12   :  { %v373_v60 = vld [vmem:[%s699_s0 + $0x2b] sm:$0x2]   ;;  %v194_v61 = vsel %vm5_vm0, %v371_v58, %v370_v57  ;;  %v374_v63 = vld [vmem:[%s699_s0 + $0xb] sm:$0x1]   ;;  %v376_v1 = vld [vmem:[%s699_s0 + $0xa] sm:$0x1]  }
  0x13   :  { %v204_v62 = vsel %vm5_vm0, %v373_v60, %v372_v59  ;;  %v375_v0 = vld [vmem:[%s699_s0 + $0x2a] sm:$0x2]   ;;  %v377_v2 = vld [vmem:[%s699_s0 + $0x29] sm:$0x2]   ;;  %v378_v5 = vld [vmem:[%s699_s0 + $0x9] sm:$0x1]  }
  0x14   :  { %95 = vrot.lane.b32.xlu0 %v94_v28, %s436_s4  ;;  %105 = vrot.lane.b32.xlu1 %v104_v29, %s437_s5  ;;  %v214_v3 = vsel %vm5_vm0, %v375_v0, %v374_v63  ;;  %v224_v4 = vsel %vm5_vm0, %v377_v2, %v376_v1  ;;  %v379_v6 = vld [vmem:[%s699_s0 + $0x28] sm:$0x2]   ;;  %v380_v7 = vld [vmem:[%s699_s0 + $0x8] sm:$0x1]   ;;  %s449_s11 = smov 40   ;;  %s451_s21 = smov 32  }
  0x15   :  { %v381_v8 = vld [vmem:[%s699_s0 + $0x27] sm:$0x2]   ;;  %v234_v9 = vsel %vm5_vm0, %v379_v6, %v378_v5  ;;  %v382_v11 = vld [vmem:[%s699_s0 + $0x7] sm:$0x1]   ;;  %v384_v13 = vld [vmem:[%s699_s0 + $0x6] sm:$0x1]  }
  0x16   :  { %v244_v10 = vsel %vm5_vm0, %v381_v8, %v380_v7  ;;  %v383_v12 = vld [vmem:[%s699_s0 + $0x26] sm:$0x2]   ;;  %v385_v14 = vld [vmem:[%s699_s0 + $0x25] sm:$0x2]   ;;  %v386_v17 = vld [vmem:[%s699_s0 + $0x5] sm:$0x1]  }
  0x17   :  { %v254_v15 = vsel %vm5_vm0, %v383_v12, %v382_v11  ;;  %v264_v16 = vsel %vm5_vm0, %v385_v14, %v384_v13  ;;  %v387_v18 = vld [vmem:[%s699_s0 + $0x24] sm:$0x2]   ;;  %v388_v19 = vld [vmem:[%s699_s0 + $0x4] sm:$0x1]   ;;  %s453_s2 = smov 24   ;;  %s455_s12 = smov 16  }
  0x18   :  { %115 = vrot.lane.b32.xlu0 %v114_v34, %s438_s14  ;;  %125 = vrot.lane.b32.xlu1 %v124_v35, %s439_s15  ;;  %v389_v20 = vld [vmem:[%s699_s0 + $0x23] sm:$0x2]   ;;  %v274_v21 = vsel %vm5_vm0, %v387_v18, %v386_v17  ;;  %v390_v23 = vld [vmem:[%s699_s0 + $0x3] sm:$0x1]   ;;  %s457_s17 = smov 8   ;;  %s458_s18 = smov 4  }
  0x19   :  { %v284_v22 = vsel %vm5_vm0, %v389_v20, %v388_v19  ;;  %v391_v24 = vld [vmem:[%s699_s0 + $0x22] sm:$0x2]   ;;  %v392_v25 = vld [vmem:[%s699_s0 + $0x2] sm:$0x1]   ;;  %v394_v29 = vld [vmem:[%s699_s0 + $0x1] sm:$0x1]  }
  0x1a   :  { %v393_v26 = vld [vmem:[%s699_s0 + $0x21] sm:$0x2]   ;;  %v294_v27 = vsel %vm5_vm0, %v391_v24, %v390_v23  ;;  %v395_v30 = vld [vmem:[%s699_s0 + $0x20] sm:$0x2]   ;;  %s456_s0 = smov 12   ;;  %vm37_vm4 = vcmask 982944  }
  0x1b   :  { %v304_v28 = vsel %vm5_vm0, %v393_v26, %v392_v25  ;;  %v314_v31 = vsel %vm5_vm0, %v395_v30, %v394_v29  ;;  %vm47_vm5 = vcmask 950144   ;;  %vm57_vm6 = vcmask 917344  }
  0x1c   :  { %135 = vrot.lane.b32.xlu0 %v134_v40, %s440_s24  ;;  %145 = vrot.lane.b32.xlu1 %v144_v41, %s441_s29  ;;  %s446_s29 = smov 52   ;;  %vm67_vm7 = vcmask 884544   ;;  %vm77_vm8 = vcmask 851744   ;;  %vm87_vm9 = vcmask 818944   ;;  %vm97_vm10 = vcmask 786144  }
  0x1d   :  { %vm107_vm11 = vcmask 753344   ;;  %vm117_vm12 = vcmask 720544   ;;  %vm127_vm13 = vcmask 687744   ;;  %vm137_vm14 = vcmask 654944  }
  0x1e   :  { %vm147_vm15 = vcmask 622144   ;;  %vm157_vm0 = vcmask 589344   ;;  %vm167_vm1 = vcmask 556544  }
  0x20   :  { %155 = vrot.lane.b32.xlu0 %v154_v48, %s442_s9  ;;  %165 = vrot.lane.b32.xlu1 %v164_v50, %s443_s10  ;;  %s448_s10 = smov 44  }
  0x24   :  { %175 = vrot.lane.b32.xlu0 %v174_v55, %s444_s19  ;;  %185 = vrot.lane.b32.xlu1 %v184_v56, %s445_s20  ;;  %s450_s20 = smov 36  }
  0x28   :  { %195 = vrot.lane.b32.xlu0 %v194_v61, %s446_s29  ;;  %205 = vrot.lane.b32.xlu1 %v204_v62, %s447_s30  ;;  %s452_s30 = smov 28  }
  0x2c   :  { %215 = vrot.lane.b32.xlu0 %v214_v3, %s448_s10  ;;  %225 = vrot.lane.b32.xlu1 %v224_v4, %s449_s11  ;;  %s454_s11 = smov 20  }
  0x30   :  { %235 = vrot.lane.b32.xlu0 %v234_v9, %s450_s20  ;;  %245 = vrot.lane.b32.xlu1 %v244_v10, %s451_s21 }
  0x34   :  { %255 = vrot.lane.b32.xlu0 %v254_v15, %s452_s30  ;;  %265 = vrot.lane.b32.xlu1 %v264_v16, %s453_s2 }
  0x38   :  { %275 = vrot.lane.b32.xlu0 %v274_v21, %s454_s11  ;;  %285 = vrot.lane.b32.xlu1 %v284_v22, %s455_s12 }
  0x3c   :  { %295 = vrot.lane.b32.xlu0 %v294_v27, %s456_s0  ;;  %305 = vrot.lane.b32.xlu1 %v304_v28, %s457_s17 }
  0x40   :  { %315 = vrot.lane.b32.xlu0 %v314_v31, %s458_s18 }
  0x76   :  { %v16_v32 = vpop.permute.xlu0 %15   ;;  %v36_v33 = vpop.permute.xlu1 %35  }
  0x77   :  { %18 = vst.msk [vmem:[#allocation0] ss:$8 sm:$0x3] %vm17_vm2, %v16_v32   ;;  %vm177_vm2 = vcmask 523744  }
  0x7a   :  { %v26_v34 = vpop.permute.xlu0 %25   ;;  %v46_v35 = vpop.permute.xlu1 %45  }
  0x7b   :  { %28 = vst.msk [vmem:[#allocation0] ss:$8 sm:$0x3] %vm27_vm3, %v26_v34   ;;  %vm187_vm3 = vcmask 490944  }
  0x7c   :  { %38 = vst.msk [vmem:[#allocation0] ss:$8 sm:$0x3] %vm37_vm4, %v36_v33   ;;  %vm197_vm4 = vcmask 458144  }
  0x7d   :  { %48 = vst.msk [vmem:[#allocation0] ss:$8 sm:$0x3] %vm47_vm5, %v46_v35   ;;  %vm207_vm5 = vcmask 425344  }
  0x7e   :  { %v56_v36 = vpop.permute.xlu0 %55   ;;  %v66_v37 = vpop.permute.xlu1 %65  }
  0x7f   :  { %58 = vst.msk [vmem:[#allocation0] ss:$8 sm:$0x3] %vm57_vm6, %v56_v36   ;;  %vm217_vm6 = vcmask 392544  }
  0x80   :  { %68 = vst.msk [vmem:[#allocation0] ss:$8 sm:$0x3] %vm67_vm7, %v66_v37   ;;  %vm227_vm7 = vcmask 359744  }
  0x82   :  { %v76_v38 = vpop.permute.xlu0 %75   ;;  %v86_v39 = vpop.permute.xlu1 %85  }
  0x83   :  { %78 = vst.msk [vmem:[#allocation0] ss:$8 sm:$0x3] %vm77_vm8, %v76_v38   ;;  %vm237_vm8 = vcmask 326944  }
  0x84   :  { %88 = vst.msk [vmem:[#allocation0] ss:$8 sm:$0x3] %vm87_vm9, %v86_v39   ;;  %vm247_vm9 = vcmask 294144  }
  0x86   :  { %v96_v40 = vpop.permute.xlu0 %95   ;;  %v106_v41 = vpop.permute.xlu1 %105  }
  0x87   :  { %98 = vst.msk [vmem:[#allocation0] ss:$8 sm:$0x3] %vm97_vm10, %v96_v40   ;;  %vm257_vm10 = vcmask 261344  }
  0x88   :  { %108 = vst.msk [vmem:[#allocation0] ss:$8 sm:$0x3] %vm107_vm11, %v106_v41   ;;  %vm267_vm11 = vcmask 228544  }
  0x8a   :  { %v116_v42 = vpop.permute.xlu0 %115   ;;  %v126_v43 = vpop.permute.xlu1 %125  }
  0x8b   :  { %118 = vst.msk [vmem:[#allocation0] ss:$8 sm:$0x3] %vm117_vm12, %v116_v42   ;;  %vm277_vm12 = vcmask 195744  }
  0x8c   :  { %128 = vst.msk [vmem:[#allocation0] ss:$8 sm:$0x3] %vm127_vm13, %v126_v43   ;;  %vm287_vm13 = vcmask 162944  }
  0x8e   :  { %v136_v44 = vpop.permute.xlu0 %135   ;;  %v146_v45 = vpop.permute.xlu1 %145  }
  0x8f   :  { %138 = vst.msk [vmem:[#allocation0] ss:$8 sm:$0x3] %vm137_vm14, %v136_v44   ;;  %vm297_vm14 = vcmask 130144  }
  0x90   :  { %148 = vst.msk [vmem:[#allocation0] ss:$8 sm:$0x3] %vm147_vm15, %v146_v45   ;;  %vm307_vm15 = vcmask 97344  }
  0x92   :  { %v156_v46 = vpop.permute.xlu0 %155   ;;  %v166_v47 = vpop.permute.xlu1 %165  }
  0x93   :  { %158 = vst.msk [vmem:[#allocation0] ss:$8 sm:$0x3] %vm157_vm0, %v156_v46   ;;  %vm317_vm0 = vcmask 64544  }
  0x94   :  { %168 = vst.msk [vmem:[#allocation0] ss:$8 sm:$0x3] %vm167_vm1, %v166_v47  }
  0x96   :  { %v176_v48 = vpop.permute.xlu0 %175   ;;  %v186_v49 = vpop.permute.xlu1 %185  }
  0x97   :  { %178 = vst.msk [vmem:[#allocation0] ss:$8 sm:$0x3] %vm177_vm2, %v176_v48  }
  0x98   :  { %188 = vst.msk [vmem:[#allocation0] ss:$8 sm:$0x3] %vm187_vm3, %v186_v49  }
  0x9a   :  { %v196_v50 = vpop.permute.xlu0 %195   ;;  %v206_v51 = vpop.permute.xlu1 %205  }
  0x9b   :  { %198 = vst.msk [vmem:[#allocation0] ss:$8 sm:$0x3] %vm197_vm4, %v196_v50  }
  0x9c   :  { %208 = vst.msk [vmem:[#allocation0] ss:$8 sm:$0x3] %vm207_vm5, %v206_v51  }
  0x9e   :  { %v216_v52 = vpop.permute.xlu0 %215   ;;  %v226_v53 = vpop.permute.xlu1 %225  }
  0x9f   :  { %218 = vst.msk [vmem:[#allocation0] ss:$8 sm:$0x3] %vm217_vm6, %v216_v52  }
  0xa0   :  { %228 = vst.msk [vmem:[#allocation0] ss:$8 sm:$0x3] %vm227_vm7, %v226_v53  }
  0xa2   :  { %v236_v54 = vpop.permute.xlu0 %235   ;;  %v246_v55 = vpop.permute.xlu1 %245  }
  0xa3   :  { %238 = vst.msk [vmem:[#allocation0] ss:$8 sm:$0x3] %vm237_vm8, %v236_v54  }
  0xa4   :  { %248 = vst.msk [vmem:[#allocation0] ss:$8 sm:$0x3] %vm247_vm9, %v246_v55  }
  0xa6   :  { %v256_v56 = vpop.permute.xlu0 %255   ;;  %v266_v57 = vpop.permute.xlu1 %265  }
  0xa7   :  { %258 = vst.msk [vmem:[#allocation0] ss:$8 sm:$0x3] %vm257_vm10, %v256_v56  }
  0xa8   :  { %268 = vst.msk [vmem:[#allocation0] ss:$8 sm:$0x3] %vm267_vm11, %v266_v57  }
  0xaa   :  { %v276_v58 = vpop.permute.xlu0 %275   ;;  %v286_v59 = vpop.permute.xlu1 %285  }
  0xab   :  { %278 = vst.msk [vmem:[#allocation0] ss:$8 sm:$0x3] %vm277_vm12, %v276_v58  }
  0xac   :  { %288 = vst.msk [vmem:[#allocation0] ss:$8 sm:$0x3] %vm287_vm13, %v286_v59  }
  0xae   :  { %v296_v60 = vpop.permute.xlu0 %295   ;;  %v306_v61 = vpop.permute.xlu1 %305  }
  0xaf   :  { %298 = vst.msk [vmem:[#allocation0] ss:$8 sm:$0x3] %vm297_vm14, %v296_v60  }
  0xb0   :  { %308 = vst.msk [vmem:[#allocation0] ss:$8 sm:$0x3] %vm307_vm15, %v306_v61  }
  0xb2   :  { %v316_v62 = vpop.permute.xlu0 %315  }
  0xb3   :  { %318 = vst.msk [vmem:[#allocation0] ss:$8 sm:$0x3] %vm317_vm0, %v316_v62  }
  0xba   :  { %v323_v63 = vld [vmem:[#allocation0] sm:$0x1]  ;;  %v328_v0 = vld [vmem:[#allocation0 + $0x8] sm:$0x1] }
  0xbb   :  { %326 = vst [vmem:[%s700_s1] sm:$0x1] %v323_v63  ;;  %396 = vst [vmem:[%s700_s1 + $0x1] sm:$0x1] %v328_v0 }

// kernel: down_block3d.4
= control target key start
LH: loop header
LB: loop body
LE: loop exit
PB: predicated region body
PF: predicated region fallthrough
CT: control target
= control target key end

     0   :  { %s1559_s21 = smov 0   ;;  %s1919_s0 = inlined_call_operand.vmem [shape: f32[2,8,256], index: 0, kind: input, shape index: {}]   ;;  %s1920_s1 = inlined_call_operand.vmem [shape: bf16[3,256,256], index: 1, kind: input, shape index: {}]   ;;  %s1921_s2 = inlined_call_operand.vmem [shape: f32[1,256], index: 2, kind: input, shape index: {}]   ;;  %s1922_s3 = inlined_call_operand.vmem [shape: f32[1,256], index: 3, kind: input, shape index: {}]   ;;  %s1923_s4 = inlined_call_operand.vmem [shape: f32[1,256], index: 4, kind: input, shape index: {}]   ;;  %s1924_s5 = inlined_call_operand.vmem [shape: f32[2,8,256], index: 5, kind: output, shape index: {0}]   ;;  %s1925_s6 = inlined_call_operand.vmem [shape: f32[2,2,256], index: 6, kind: output, shape index: {1}]  }
   0x1 LB: > { %s1179_s22 = sadd.s32 4294967295, %s1522_s21   ;;  %p1183_p0 = scmp.ge.s32.totalorder %s1522_s21, 1  ;;  %s1522_s21 = sphi %s1559_s21, %s17_s21  }
   0x2   : > { %p215_p1 = scmp.lt.s32.totalorder %s1522_s21, 3 }
   0x4   : > { %p216_p2 = pnand %p1183_p0, %p215_p1 }
   0x5   : > { %p250_p3 = scmp.lt.s32.totalorder (!%p216_p2), %s1179_s22, 1 }
   0x6   : > { %219 = sbr.rel (%p216_p2) target bundleno = 357 (0x165), region = 40 }
   0xb   : > { %v1372_v0 = vld [vmem:[%s1920_s1 + $0x174] ss:$8 sps:$4 sm:$0xff]   ;;  %v1376_v2 = vld [vmem:[%s1920_s1 + $0x170] ss:$8 sps:$4 sm:$0xff]   ;;  %v1378_v4 = vld [vmem:[%s1920_s1 + $0x164] ss:$8 sps:$4 sm:$0xff]   ;;  %v269_v36 = vlaneseq }
   0xc   : > { %v1374_v1 = vld [vmem:[%s1920_s1 + $0x74] ss:$8 sps:$4 sm:$0xff]   ;;  %551 = vmatprep.subr.bf16.mxu0 %v1372_v0  ;;  %v1377_v3 = vld [vmem:[%s1920_s1 + $0x70] ss:$8 sps:$4 sm:$0xff]   ;;  %v1380_v5 = vld [vmem:[%s1920_s1 + $0x64] ss:$8 sps:$4 sm:$0xff]  }
   0xd   : > { %752 = vmatprep.subr.bf16.mxu1 %v1374_v1  ;;  %552 = vmatpush1.bf16.msra.mxu0 %v1376_v2  ;;  %v1382_v6 = vld [vmem:[%s1920_s1 + $0x160] ss:$8 sps:$4 sm:$0xff]   ;;  %v1384_v8 = vld [vmem:[%s1920_s1 + $0x154] ss:$8 sps:$4 sm:$0xff]   ;;  %v1388_v10 = vld [vmem:[%s1920_s1 + $0x150] ss:$8 sps:$4 sm:$0xff]  }
   0xe   : > { %753 = vmatpush1.bf16.msra.mxu1 %v1377_v3  ;;  %553 = vmatprep.subr.bf16.mxu0 %v1378_v4  ;;  %v1383_v7 = vld [vmem:[%s1920_s1 + $0x60] ss:$8 sps:$4 sm:$0xff]   ;;  %v1386_v9 = vld [vmem:[%s1920_s1 + $0x54] ss:$8 sps:$4 sm:$0xff]   ;;  %v1389_v11 = vld [vmem:[%s1920_s1 + $0x50] ss:$8 sps:$4 sm:$0xff]  }
   0xf   : > { %754 = vmatprep.subr.bf16.mxu1 %v1380_v5  ;;  %v1390_v12 = vld [vmem:[%s1920_s1 + $0x144] ss:$8 sps:$4 sm:$0xff]   ;;  %v1394_v14 = vld [vmem:[%s1920_s1 + $0x140] ss:$8 sps:$4 sm:$0xff]   ;;  %v1396_v16 = vld [vmem:[%s1920_s1 + $0x134] ss:$8 sps:$4 sm:$0xff]  }
  0x10   : > { %v1392_v13 = vld [vmem:[%s1920_s1 + $0x44] ss:$8 sps:$4 sm:$0xff]   ;;  %v1395_v15 = vld [vmem:[%s1920_s1 + $0x40] ss:$8 sps:$4 sm:$0xff]   ;;  %v1398_v17 = vld [vmem:[%s1920_s1 + $0x34] ss:$8 sps:$4 sm:$0xff]  }
  0x11   : > { %554 = vmatpush1.bf16.msra.mxu0 %v1382_v6  ;;  %v1400_v18 = vld [vmem:[%s1920_s1 + $0x130] ss:$8 sps:$4 sm:$0xff]   ;;  %v1402_v20 = vld [vmem:[%s1920_s1 + $0x124] ss:$8 sps:$4 sm:$0xff]   ;;  %v1406_v22 = vld [vmem:[%s1920_s1 + $0x120] ss:$8 sps:$4 sm:$0xff]  }
  0x12   : > { %755 = vmatpush1.bf16.msra.mxu1 %v1383_v7  ;;  %555 = vmatprep.subr.bf16.mxu0 %v1384_v8  ;;  %v1401_v19 = vld [vmem:[%s1920_s1 + $0x30] ss:$8 sps:$4 sm:$0xff]   ;;  %v1404_v21 = vld [vmem:[%s1920_s1 + $0x24] ss:$8 sps:$4 sm:$0xff]   ;;  %v1407_v23 = vld [vmem:[%s1920_s1 + $0x20] ss:$8 sps:$4 sm:$0xff]  }
  0x13   : > { %756 = vmatprep.subr.bf16.mxu1 %v1386_v9  ;;  %v1408_v24 = vld [vmem:[%s1920_s1 + $0x114] ss:$8 sps:$4 sm:$0xff]   ;;  %v1412_v26 = vld [vmem:[%s1920_s1 + $0x110] ss:$8 sps:$4 sm:$0xff]   ;;  %v1414_v28 = vld [vmem:[%s1920_s1 + $0x104] ss:$8 sps:$4 sm:$0xff]  }
  0x14   : > { %v1410_v25 = vld [vmem:[%s1920_s1 + $0x14] ss:$8 sps:$4 sm:$0xff]   ;;  %v1413_v27 = vld [vmem:[%s1920_s1 + $0x10] ss:$8 sps:$4 sm:$0xff]   ;;  %v1416_v29 = vld [vmem:[%s1920_s1 + $0x4] ss:$8 sps:$4 sm:$0xff]  }
  0x15   : > { %556 = vmatpush1.bf16.msra.mxu0 %v1388_v10  ;;  %v1418_v30 = vld [vmem:[%s1920_s1 + $0x100] ss:$8 sps:$4 sm:$0xff]   ;;  %v1420_v32 = vld [vmem:[%s1920_s1 + $0x1f4] ss:$8 sps:$4 sm:$0xff]   ;;  %v1424_v34 = vld [vmem:[%s1920_s1 + $0x1f0] ss:$8 sps:$4 sm:$0xff]  }
  0x16   : > { %757 = vmatpush1.bf16.msra.mxu1 %v1389_v11  ;;  %557 = vmatprep.subr.bf16.mxu0 %v1390_v12  ;;  %v1419_v31 = vld [vmem:[%s1920_s1] ss:$8 sps:$4 sm:$0xff]   ;;  %v1422_v33 = vld [vmem:[%s1920_s1 + $0xf4] ss:$8 sps:$4 sm:$0xff]   ;;  %v1425_v35 = vld [vmem:[%s1920_s1 + $0xf0] ss:$8 sps:$4 sm:$0xff]  }
  0x17   : > { %758 = vmatprep.subr.bf16.mxu1 %v1392_v13  ;;  %v1426_v37 = vld [vmem:[%s1920_s1 + $0x1e4] ss:$8 sps:$4 sm:$0xff]   ;;  %s1929_s22 = smov (!%p250_p3, %s1179_s22), 1  ;;  %v1430_v39 = vld [vmem:[%s1920_s1 + $0x1e0] ss:$8 sps:$4 sm:$0xff]   ;;  %v270_v40 = vshrl.u32 %v269_v36, 7 }
  0x18   : > { %v1428_v38 = vld [vmem:[%s1920_s1 + $0xe4] ss:$8 sps:$4 sm:$0xff]   ;;  %v1431_v41 = vld [vmem:[%s1920_s1 + $0xe0] ss:$8 sps:$4 sm:$0xff]   ;;  %v1432_v42 = vld [vmem:[%s1920_s1 + $0x1d4] ss:$8 sps:$4 sm:$0xff]  }
  0x19   : > { %558 = vmatpush1.bf16.msra.mxu0 %v1394_v14  ;;  %s1361_s15 = sshll.u32 %s1929_s22, 4  ;;  %v1434_v43 = vld [vmem:[%s1920_s1 + $0xd4] ss:$8 sps:$4 sm:$0xff]   ;;  %v1436_v44 = vld [vmem:[%s1920_s1 + $0x1d0] ss:$8 sps:$4 sm:$0xff]   ;;  %v1714_v47 = vsub.s32 0, %v270_v40 }
  0x1a   : > { %759 = vmatpush1.bf16.msra.mxu1 %v1395_v15  ;;  %559 = vmatprep.subr.bf16.mxu0 %v1396_v16  ;;  %v1437_v45 = vld [vmem:[%s1920_s1 + $0xd0] ss:$8 sps:$4 sm:$0xff]   ;;  %s254_s26 = scalar_lea.vmem %s1919_s0, %s1361_s15  ;;  %v1438_v46 = vld [vmem:[%s1920_s1 + $0x1c4] ss:$8 sps:$4 sm:$0xff]   ;;  %v1716_v48 = vsub.s32 1, %v270_v40  ;;  %vm303_vm0 = vcmask 1040384   ;;  %s259_s10 = scalar_lea.vmem %s1924_s5, %s1361_s15 }
  0x1b   : > { %760 = vmatprep.subr.bf16.mxu1 %v1398_v17  ;;  %v1440_v49 = vld [vmem:[%s1920_s1 + $0xc4] ss:$8 sps:$4 sm:$0xff]   ;;  %v1442_v50 = vld [vmem:[%s1920_s1 + $0x1c0] ss:$8 sps:$4 sm:$0xff]   ;;  %v1444_v59 = vld [vmem:[%s1920_s1 + $0x1b4] ss:$8 sps:$4 sm:$0xff]  }
  0x1c   : > { %v265_v51 = vld [vmem:[%s254_s26] sm:$0xff]  ;;  %v266_v52 = vld [vmem:[%s254_s26 + $0x8] sm:$0xff]  ;;  %v1446_v60 = vld [vmem:[%s1920_s1 + $0xb4] ss:$8 sps:$4 sm:$0xff]   ;;  %s1363_s15 = sshll.u32 %s1929_s22, 2 }
  0x1d   : > { %560 = vmatpush1.bf16.msra.mxu0 %v1400_v18  ;;  %v267_v53 = vld [vmem:[%s1922_s3] sm:$0x3]  ;;  %v1448_v0 = vld [vmem:[%s1920_s1 + $0x1b0] ss:$8 sps:$4 sm:$0xff]   ;;  %v1450_v4 = vld [vmem:[%s1920_s1 + $0x1a4] ss:$8 sps:$4 sm:$0xff]   ;;  %s264_s13 = scalar_lea.vmem %s1925_s6, %s1363_s15 }
  0x1e   : > { %761 = vmatpush1.bf16.msra.mxu1 %v1401_v19  ;;  %561 = vmatprep.subr.bf16.mxu0 %v1402_v20  ;;  %v281_v54 = vld [vmem:[%s1923_s4] sm:$0x3]  ;;  %v272_v56 = vrot.slane %v267_v53, %v1714_v47  ;;  %v276_v57 = vrot.slane %v267_v53, %v1716_v48  ;;  %v1449_v1 = vld [vmem:[%s1920_s1 + $0xb0] ss:$8 sps:$4 sm:$0xff]   ;;  %v1452_v5 = vld [vmem:[%s1920_s1 + $0xa4] ss:$8 sps:$4 sm:$0xff]  }
  0x1f   : > { %762 = vmatprep.subr.bf16.mxu1 %v1404_v21  ;;  %v1443_v55 = vld [vmem:[%s1920_s1 + $0xc0] ss:$8 sps:$4 sm:$0xff]   ;;  %v286_v58 = vrot.slane %v281_v54, %v1714_v47  ;;  %v290_v61 = vrot.slane %v281_v54, %v1716_v48  ;;  %v1456_v10 = vld [vmem:[%s1920_s1 + $0x194] ss:$8 sps:$4 sm:$0xff]   ;;  %vm1286_vm1 = vmneg %vm303_vm0 }
  0x20   : > { %v280_v62 = vmul.f32 %v276_v57, %v266_v52  ;;  %v279_v63 = vmul.f32 %v272_v56, %v265_v51  ;;  %v1454_v8 = vld [vmem:[%s1920_s1 + $0x1a0] ss:$8 sps:$4 sm:$0xff]   ;;  %v1458_v13 = vld [vmem:[%s1920_s1 + $0x94] ss:$8 sps:$4 sm:$0xff]   ;;  %v1460_v14 = vld [vmem:[%s1920_s1 + $0x190] ss:$8 sps:$4 sm:$0xff]  }
  0x21   : > { %562 = vmatpush1.bf16.msra.mxu0 %v1406_v22  ;;  %v1455_v9 = vld [vmem:[%s1920_s1 + $0xa0] ss:$8 sps:$4 sm:$0xff]   ;;  %v1461_v19 = vld [vmem:[%s1920_s1 + $0x90] ss:$8 sps:$4 sm:$0xff]   ;;  %vm1778_vm2 = vmpackc.low %vm303_vm0, %vm1286_vm1 }
  0x22   : > { %763 = vmatpush1.bf16.msra.mxu1 %v1407_v23  ;;  %563 = vmatprep.subr.bf16.mxu0 %v1408_v24  ;;  %v294_v2 = vadd.f32 %v290_v61, %v280_v62  ;;  %v293_v3 = vadd.f32 %v286_v58, %v279_v63  ;;  %v1462_v23 = vld [vmem:[%s1920_s1 + $0x184] ss:$8 sps:$4 sm:$0xff]   ;;  %v1483_v51 = vld [vmem:[%s1920_s1 + $0x220] ss:$8 sps:$4 sm:$0xff]   ;;  %v1488_v52 = vld [vmem:[%s1920_s1 + $0x214] ss:$8 sps:$4 sm:$0xff]  }
  0x23   : > { %764 = vmatprep.subr.bf16.mxu1 %v1410_v25  ;;  %v1464_v25 = vld [vmem:[%s1920_s1 + $0x84] ss:$8 sps:$4 sm:$0xff]   ;;  %v1486_v53 = vld [vmem:[%s1920_s1 + $0x210] ss:$8 sps:$4 sm:$0xff]   ;;  %v1494_v56 = vld [vmem:[%s1920_s1 + $0x2f4] ss:$8 sps:$4 sm:$0xff]  }
  0x24   : > { %v296_v6 = vmax.f32 %v294_v2, 0.0  ;;  %v295_v7 = vmax.f32 %v293_v3, 0.0  ;;  %v1473_v40 = vld [vmem:[%s1920_s1 + $0x264] ss:$8 sps:$4 sm:$0xff]   ;;  %v1492_v57 = vld [vmem:[%s1920_s1 + $0x2f0] ss:$8 sps:$4 sm:$0xff]  }
  0x25   : > { %564 = vmatpush1.bf16.msra.mxu0 %v1412_v26  ;;  %v1491_v54 = vld [vmem:[%s1920_s1 + $0x204] ss:$8 sps:$4 sm:$0xff]   ;;  %v1498_v61 = vld [vmem:[%s1920_s1 + $0x2d0] ss:$8 sps:$4 sm:$0xff]   ;;  %v1501_v63 = vld [vmem:[%s1920_s1 + $0x2c0] ss:$8 sps:$4 sm:$0xff]  }
  0x26   : > { %765 = vmatpush1.bf16.msra.mxu1 %v1413_v27  ;;  %565 = vmatprep.subr.bf16.mxu0 %v1414_v28  ;;  %v300_v11 = vrot.slane %v296_v6, 7  ;;  %v299_v12 = vrot.slane %v295_v7, 7  ;;  %v1497_v58 = vld [vmem:[%s1920_s1 + $0x2e4] ss:$8 sps:$4 sm:$0xff]   ;;  %v1507_v3 = vld [vmem:[%s1920_s1 + $0x2a0] ss:$8 sps:$4 sm:$0xff]  }
  0x27   : > { %766 = vmatprep.subr.bf16.mxu1 %v1416_v29  ;;  %v1466_v29 = vld [vmem:[%s1920_s1 + $0x180] ss:$8 sps:$4 sm:$0xff]   ;;  %v1503_v62 = vld [vmem:[%s1920_s1 + $0x2c4] ss:$8 sps:$4 sm:$0xff]  }
  0x28   : > { %v305_v15 = vsel %vm303_vm0, 0.0, %v300_v11  ;;  %v307_v16 = vsel %vm303_vm0, %v300_v11, 0.0  ;;  %v1288_v17 = vpack.c.bf16 %v300_v11, %v300_v11  ;;  %v304_v18 = vsel %vm303_vm0, 0.0, %v299_v12  ;;  %v1509_v2 = vld [vmem:[%s1920_s1 + $0x2a4] ss:$8 sps:$4 sm:$0xff]  }
  0x29   : > { %566 = vmatpush1.bf16.msra.mxu0 %v1418_v30  ;;  %v309_v20 = vpack.c.bf16 %v307_v16, %v305_v15  ;;  %v306_v22 = vsel %vm303_vm0, %v299_v12, 0.0  ;;  %v1515_v6 = vld [vmem:[%s1920_s1 + $0x284] ss:$8 sps:$4 sm:$0xff]   ;;  %v1513_v7 = vld [vmem:[%s1920_s1 + $0x280] ss:$8 sps:$4 sm:$0xff]  }
  0x2a   : > { %767 = vmatpush1.bf16.msra.mxu1 %v1419_v31  ;;  %567 = vmatprep.subr.bf16.mxu0 %v1420_v32  ;;  %v1786_v24 = vpack.c.bf16 %v306_v22, %v304_v18  ;;  %v1467_v32 = vld [vmem:[%s1920_s1 + $0x80] ss:$8 sps:$4 sm:$0xff]  }
  0x2b   : > { %768 = vmatprep.subr.bf16.mxu1 %v1422_v33  ;;  %v383_v26 = vshrl.u32 %v309_v20, 16  ;;  %v385_v27 = vshll.u32 %v309_v20, 16  ;;  %1289 = vmatprep.mubr.msk.bf16.mxu1 %vm1778_vm2, %v1288_v17  ;;  %v1035_v17 = vld [vmem:[%s1921_s2] sm:$0x3] }
  0x2c   : > { %v378_v28 = vshll.u32 %v1786_v24, 16  ;;  %v376_v31 = vshrl.u32 %v1786_v24, 16 }
  0x2d   : > { %568 = vmatpush2.bf16.msra.mxu0 %v1424_v34  ;;  %v387_v30 = vrot.slane %v385_v27, 1 }
  0x2e   : > { %769 = vmatpush2.bf16.msra.mxu1 %v1425_v35  ;;  %569 = vmatprep.subr.bf16.mxu0 %v1426_v37  ;;  %v380_v33 = vrot.slane %v378_v28, 1  ;;  %v1470_v35 = vld [vmem:[%s1920_s1 + $0x274] ss:$8 sps:$4 sm:$0xff]   ;;  %v1292_v37 = vpack.c.bf16 %v299_v12, %v299_v12 }
  0x2f   : > { %770 = vmatprep.subr.bf16.mxu1 %v1428_v38  ;;  %v388_v34 = vor.u32 %v387_v30, %v383_v26  ;;  %v1468_v38 = vld [vmem:[%s1920_s1 + $0x270] ss:$8 sps:$4 sm:$0xff]  }
  0x30   : > { %v381_v36 = vor.u32 %v380_v33, %v376_v31 }
  0x31   : > { %570 = vmatpush2.bf16.msra.mxu0 %v1430_v39  ;;  %583 = vmatprep.mubr.bf16.mxu0 %v388_v34  ;;  %v829_v39 = vrot.slane %v309_v20, 1 }
  0x32   : > { %771 = vmatpush2.bf16.msra.mxu1 %v1431_v41  ;;  %571 = vmatprep.subr.bf16.mxu0 %v1432_v42  ;;  %v1471_v41 = vld [vmem:[%s1920_s1 + $0x260] ss:$8 sps:$4 sm:$0xff]   ;;  %v1476_v42 = vld [vmem:[%s1920_s1 + $0x254] ss:$8 sps:$4 sm:$0xff]  }
  0x33   : > { %772 = vmatprep.subr.bf16.mxu1 %v1434_v43  ;;  %v1474_v43 = vld [vmem:[%s1920_s1 + $0x250] ss:$8 sps:$4 sm:$0xff]  }
  0x35   : > { %572 = vmatpush2.bf16.msra.mxu0 %v1436_v44  ;;  %v1479_v44 = vld [vmem:[%s1920_s1 + $0x244] ss:$8 sps:$4 sm:$0xff]  }
  0x36   : > { %773 = vmatpush2.bf16.msra.mxu1 %v1437_v45  ;;  %573 = vmatprep.subr.bf16.mxu0 %v1438_v46  ;;  %v1477_v45 = vld [vmem:[%s1920_s1 + $0x240] ss:$8 sps:$4 sm:$0xff]   ;;  %v1482_v46 = vld [vmem:[%s1920_s1 + $0x234] ss:$8 sps:$4 sm:$0xff]  }
  0x37   : > { %774 = vmatprep.subr.bf16.mxu1 %v1440_v49  ;;  %v1480_v49 = vld [vmem:[%s1920_s1 + $0x230] ss:$8 sps:$4 sm:$0xff]  }
  0x39   : > { %574 = vmatpush2.bf16.msra.mxu0 %v1442_v50  ;;  %v1485_v50 = vld [vmem:[%s1920_s1 + $0x224] ss:$8 sps:$4 sm:$0xff]  }
  0x3a   : > { %775 = vmatpush2.bf16.msra.mxu1 %v1443_v55  ;;  %575 = vmatprep.subr.bf16.mxu0 %v1444_v59  ;;  %v1489_v55 = vld [vmem:[%s1920_s1 + $0x200] ss:$8 sps:$4 sm:$0xff]  }
  0x3b   : > { %776 = vmatprep.subr.bf16.mxu1 %v1446_v60  ;;  %v1495_v59 = vld [vmem:[%s1920_s1 + $0x2e0] ss:$8 sps:$4 sm:$0xff]   ;;  %v1500_v60 = vld [vmem:[%s1920_s1 + $0x2d4] ss:$8 sps:$4 sm:$0xff]  }
  0x3d   : > { %576 = vmatpush2.bf16.msra.mxu0 %v1448_v0  ;;  %v1506_v0 = vld [vmem:[%s1920_s1 + $0x2b4] ss:$8 sps:$4 sm:$0xff]  }
  0x3e   : > { %777 = vmatpush2.bf16.msra.mxu1 %v1449_v1  ;;  %577 = vmatprep.subr.bf16.mxu0 %v1450_v4  ;;  %v1504_v1 = vld [vmem:[%s1920_s1 + $0x2b0] ss:$8 sps:$4 sm:$0xff]   ;;  %v1512_v4 = vld [vmem:[%s1920_s1 + $0x294] ss:$8 sps:$4 sm:$0xff]  }
  0x3f   : > { %778 = vmatprep.subr.bf16.mxu1 %v1452_v5  ;;  %v1510_v5 = vld [vmem:[%s1920_s1 + $0x290] ss:$8 sps:$4 sm:$0xff]  }
  0x41   : > { %578 = vmatpush2.bf16.msra.mxu0 %v1454_v8  ;;  %v828_v8 = vrot.slane %v1786_v24, 1 }
  0x42   : > { %779 = vmatpush2.bf16.msra.mxu1 %v1455_v9  ;;  %579 = vmatprep.subr.bf16.mxu0 %v1456_v10 }
  0x43   : > { %780 = vmatprep.subr.bf16.mxu1 %v1458_v13 }
  0x45   : > { %580 = vmatpush2.bf16.msra.mxu0 %v1460_v14 }
  0x46   : > { %781 = vmatpush2.bf16.msra.mxu1 %v1461_v19  ;;  %581 = vmatprep.subr.bf16.mxu0 %v1462_v23  ;;  %v1040_v19 = vrot.slane %v1035_v17, %v1714_v47  ;;  %v1044_v23 = vrot.slane %v1035_v17, %v1716_v48 }
  0x47   : > { %782 = vmatprep.subr.bf16.mxu1 %v1464_v25 }
  0x49   : > { %582 = vmatpush2.bf16.msra.mxu0 %v1466_v29 }
  0x4a   : > { %783 = vmatpush2.bf16.msra.mxu1 %v1467_v32  ;;  %992 = vmatprep.subr.bf16.mxu0 %v1470_v35 }
  0x4c   : > { %584 = vmatmul.mubr.bf16.vlgmr.msra.gmra.mxu0 %v381_v36 }
  0x4d   : > { %1293 = vmatmul.mubr.msk.bf16.vlgmr.msra.gmra.mxu1 %vm1778_vm2, %v1292_v37  ;;  %993 = vmatpush1.bf16.msra.mxu0 %v1468_v38 }
  0x4e   : > { %1024 = vmatprep.mubr.bf16.mxu0 %v829_v39  ;;  %994 = vmatprep.subr.bf16.mxu0 %v1473_v40 }
  0x51   : > { %995 = vmatpush1.bf16.msra.mxu0 %v1471_v41 }
  0x52   : > { %996 = vmatprep.subr.bf16.mxu0 %v1476_v42 }
  0x55   : > { %997 = vmatpush1.bf16.msra.mxu0 %v1474_v43 }
  0x56   : > { %998 = vmatprep.subr.bf16.mxu0 %v1479_v44 }
  0x59   : > { %999 = vmatpush1.bf16.msra.mxu0 %v1477_v45 }
  0x5a   : > { %1000 = vmatprep.subr.bf16.mxu0 %v1482_v46 }
  0x5d   : > { %1001 = vmatpush1.bf16.msra.mxu0 %v1480_v49 }
  0x5e   : > { %1002 = vmatprep.subr.bf16.mxu0 %v1485_v50 }
  0x61   : > { %1003 = vmatpush1.bf16.msra.mxu0 %v1483_v51 }
  0x62   : > { %1004 = vmatprep.subr.bf16.mxu0 %v1488_v52 }
  0x65   : > { %1005 = vmatpush1.bf16.msra.mxu0 %v1486_v53 }
  0x66   : > { %1006 = vmatprep.subr.bf16.mxu0 %v1491_v54 }
  0x69   : > { %1007 = vmatpush1.bf16.msra.mxu0 %v1489_v55 }
  0x6a   : > { %1008 = vmatprep.subr.bf16.mxu0 %v1494_v56 }
  0x6d   : > { %1009 = vmatpush2.bf16.msra.mxu0 %v1492_v57 }
  0x6e   : > { %1010 = vmatprep.subr.bf16.mxu0 %v1497_v58 }
  0x71   : > { %1011 = vmatpush2.bf16.msra.mxu0 %v1495_v59 }
  0x72   : > { %1012 = vmatprep.subr.bf16.mxu0 %v1500_v60 }
  0x75   : > { %1013 = vmatpush2.bf16.msra.mxu0 %v1498_v61 }
  0x76   : > { %1014 = vmatprep.subr.bf16.mxu0 %v1503_v62 }
  0x79   : > { %1015 = vmatpush2.bf16.msra.mxu0 %v1501_v63 }
  0x7a   : > { %1016 = vmatprep.subr.bf16.mxu0 %v1506_v0 }
  0x7d   : > { %1017 = vmatpush2.bf16.msra.mxu0 %v1504_v1 }
  0x7e   : > { %1018 = vmatprep.subr.bf16.mxu0 %v1509_v2 }
  0x81   : > { %1019 = vmatpush2.bf16.msra.mxu0 %v1507_v3 }
  0x82   : > { %1020 = vmatprep.subr.bf16.mxu0 %v1512_v4 }
  0x85   : > { %1021 = vmatpush2.bf16.msra.mxu0 %v1510_v5 }
  0x86   : > { %1022 = vmatprep.subr.bf16.mxu0 %v1515_v6 }
  0x89   : > { %1023 = vmatpush2.bf16.msra.mxu0 %v1513_v7 }
  0x8c   : > { %1025 = vmatmul.mubr.bf16.vlgmr.msra.gmra.mxu0 %v828_v8 }
 0x10c   : > { %v585_v9 = vpop.f32.mrf.mxu0 }
 0x10d   : > { %v786_v10 = vpop.f32.mrf.mxu1 }
 0x10e   : > { %v587_v11 = vpop.f32.mrf.mxu0  ;;  %v787_v18 = vadd.f32 %v786_v10, %v585_v9 }
 0x10f   : > { %v788_v12 = vpop.f32.mrf.mxu1 }
 0x110   : > { %v589_v13 = vpop.f32.mrf.mxu0  ;;  %v789_v21 = vadd.f32 %v788_v12, %v587_v11 }
 0x111   : > { %v790_v14 = vpop.f32.mrf.mxu1 }
 0x112   : > { %v590_v15 = vpop.f32.mrf.mxu0 }
 0x113   : > { %v791_v16 = vpop.f32.mrf.mxu1 }
 0x14c   : > { %v1026_v20 = vpop.f32.mrf.mxu0 }
 0x14d   : > { %v1033_v22 = vadd.f32 %v1026_v20, %v787_v18 }
 0x14e   : > { %v1028_v24 = vpop.f32.mrf.mxu0 }
 0x14f   : > { %v1047_v25 = vadd.f32 %v1040_v19, %v1033_v22  ;;  %v1034_v26 = vadd.f32 %v1028_v24, %v789_v21 }
 0x150   : > { %v1030_v27 = vpop.f32.mrf.mxu0 }
 0x151   : > { %v1049_v28 = vrot.slane %v1047_v25, 4  ;;  %v1061_v29 = vmul.f32 %v1047_v25, %v1047_v25  ;;  %1089 = vst [vmem:[%s259_s10] sm:$0xff] %v1047_v25  ;;  %v1048_v30 = vadd.f32 %v1044_v23, %v1034_v26 }
 0x152   : > { %v1031_v31 = vpop.f32.mrf.mxu0 }
 0x153   : > { %v1050_v47 = vadd.f32 %v1049_v28, %v1047_v25  ;;  %v1063_v32 = vrot.slane %v1061_v29, 4  ;;  %v1055_v33 = vrot.slane %v1048_v30, 4  ;;  %v1062_v34 = vmul.f32 %v1048_v30, %v1048_v30  ;;  %1090 = vst [vmem:[%s259_s10 + $0x8] sm:$0xff] %v1048_v30 }
 0x155   : > { %v1051_v48 = vrot.slane %v1050_v47, 2  ;;  %v1064_v35 = vadd.f32 %v1063_v32, %v1061_v29  ;;  %v1056_v36 = vadd.f32 %v1055_v33, %v1048_v30  ;;  %v1069_v37 = vrot.slane %v1062_v34, 4 }
 0x157   : > { %v1052_v38 = vadd.f32 %v1051_v48, %v1050_v47  ;;  %v1065_v39 = vrot.slane %v1064_v35, 2  ;;  %v1057_v40 = vrot.slane %v1056_v36, 2  ;;  %v1070_v41 = vadd.f32 %v1069_v37, %v1062_v34 }
 0x159   : > { %v1066_v42 = vadd.f32 %v1065_v39, %v1064_v35  ;;  %v1058_v43 = vadd.f32 %v1057_v40, %v1056_v36  ;;  %v1071_v44 = vrot.slane %v1070_v41, 2  ;;  %v1053_v45 = vrot.slane %v1052_v38, 1 }
 0x15b   : > { %v1067_v46 = vrot.slane %v1066_v42, 1  ;;  %v1059_v49 = vrot.slane %v1058_v43, 1  ;;  %v1072_v50 = vadd.f32 %v1071_v44, %v1070_v41  ;;  %v1054_v53 = vadd.f32 %v1053_v45, %v1052_v38 }
 0x15d   : > { %v1068_v51 = vadd.f32 %v1067_v46, %v1066_v42  ;;  %v1073_v52 = vrot.slane %v1072_v50, 1  ;;  %v1060_v54 = vadd.f32 %v1059_v49, %v1058_v43 }
 0x15f   : > { %v1074_v55 = vadd.f32 %v1073_v52, %v1072_v50  ;;  %v1075_v56 = vsel %vm303_vm0, %v1054_v53, %v1068_v51 }
 0x161   : > { %v1076_v57 = vsel %vm303_vm0, %v1060_v54, %v1074_v55 }
 0x162   : > { %v1079_v58 = vcombine.low %v1075_v56, %v1076_v57 }
 0x164   : > { %1358 = vst.sshfl [vmem:[%s264_s13] sm:$0x33 pattern:$0x76325410] %v1079_v58 }
 0x165 PF: > { %s17_s21 = sadd.s32 1, %s1522_s21  }
 0x166   : > { %p14_p4 = scmp.ge.s32.totalorder %s17_s21, 4  }
 0x168   :  { %16 = sbr.rel (!%p14_p4) target bundleno = 1 (0x1), region = 84 }

// kernel: down_block3d.5
= control target key start
LH: loop header
LB: loop body
LE: loop exit
PB: predicated region body
PF: predicated region fallthrough
CT: control target
= control target key end

     0   :  { %s1630_s24 = smov 0   ;;  %s1994_s0 = inlined_call_operand.vmem [shape: f32[2,8,256], index: 0, kind: input, shape index: {}]   ;;  %s1995_s1 = inlined_call_operand.vmem [shape: f32[2,8,256], index: 1, kind: input, shape index: {}]   ;;  %s1996_s2 = inlined_call_operand.vmem [shape: bf16[3,256,256], index: 2, kind: input, shape index: {}]   ;;  %s1997_s3 = inlined_call_operand.vmem [shape: f32[1,256], index: 3, kind: input, shape index: {}]   ;;  %s1998_s4 = inlined_call_operand.vmem [shape: f32[1,256], index: 4, kind: input, shape index: {}]   ;;  %s1999_s5 = inlined_call_operand.vmem [shape: f32[1,256], index: 5, kind: input, shape index: {}]   ;;  %s2000_s6 = inlined_call_operand.vmem [shape: f32[2,8,256], index: 6, kind: output, shape index: {0}]   ;;  %s2001_s7 = inlined_call_operand.vmem [shape: f32[2,2,256], index: 7, kind: output, shape index: {1}]  }
   0x1 LB: > { %s1242_s25 = sadd.s32 4294967295, %s1588_s24   ;;  %p1246_p0 = scmp.ge.s32.totalorder %s1588_s24, 1  ;;  %s1588_s24 = sphi %s1630_s24, %s18_s24  }
   0x2   : > { %p250_p1 = scmp.lt.s32.totalorder %s1588_s24, 3 }
   0x4   : > { %p251_p2 = pnand %p1246_p0, %p250_p1 }
   0x5   : > { %p292_p3 = scmp.lt.s32.totalorder (!%p251_p2), %s1242_s25, 1 }
   0x6   : > { %254 = sbr.rel (%p251_p2) target bundleno = 359 (0x167), region = 44 }
   0xb   : > { %v1438_v0 = vld [vmem:[%s1996_s2 + $0x174] ss:$8 sps:$4 sm:$0xff]   ;;  %v1442_v2 = vld [vmem:[%s1996_s2 + $0x170] ss:$8 sps:$4 sm:$0xff]   ;;  %v1444_v4 = vld [vmem:[%s1996_s2 + $0x164] ss:$8 sps:$4 sm:$0xff]   ;;  %v316_v36 = vlaneseq }
   0xc   : > { %v1440_v1 = vld [vmem:[%s1996_s2 + $0x74] ss:$8 sps:$4 sm:$0xff]   ;;  %598 = vmatprep.subr.bf16.mxu0 %v1438_v0  ;;  %v1443_v3 = vld [vmem:[%s1996_s2 + $0x70] ss:$8 sps:$4 sm:$0xff]   ;;  %v1446_v5 = vld [vmem:[%s1996_s2 + $0x64] ss:$8 sps:$4 sm:$0xff]  }
   0xd   : > { %799 = vmatprep.subr.bf16.mxu1 %v1440_v1  ;;  %599 = vmatpush1.bf16.msra.mxu0 %v1442_v2  ;;  %v1448_v6 = vld [vmem:[%s1996_s2 + $0x160] ss:$8 sps:$4 sm:$0xff]   ;;  %v1450_v8 = vld [vmem:[%s1996_s2 + $0x154] ss:$8 sps:$4 sm:$0xff]   ;;  %v1454_v10 = vld [vmem:[%s1996_s2 + $0x150] ss:$8 sps:$4 sm:$0xff]  }
   0xe   : > { %800 = vmatpush1.bf16.msra.mxu1 %v1443_v3  ;;  %600 = vmatprep.subr.bf16.mxu0 %v1444_v4  ;;  %v1449_v7 = vld [vmem:[%s1996_s2 + $0x60] ss:$8 sps:$4 sm:$0xff]   ;;  %v1452_v9 = vld [vmem:[%s1996_s2 + $0x54] ss:$8 sps:$4 sm:$0xff]   ;;  %v1455_v11 = vld [vmem:[%s1996_s2 + $0x50] ss:$8 sps:$4 sm:$0xff]  }
   0xf   : > { %801 = vmatprep.subr.bf16.mxu1 %v1446_v5  ;;  %v1456_v12 = vld [vmem:[%s1996_s2 + $0x144] ss:$8 sps:$4 sm:$0xff]   ;;  %v1460_v14 = vld [vmem:[%s1996_s2 + $0x140] ss:$8 sps:$4 sm:$0xff]   ;;  %v1462_v16 = vld [vmem:[%s1996_s2 + $0x134] ss:$8 sps:$4 sm:$0xff]  }
  0x10   : > { %v1458_v13 = vld [vmem:[%s1996_s2 + $0x44] ss:$8 sps:$4 sm:$0xff]   ;;  %v1461_v15 = vld [vmem:[%s1996_s2 + $0x40] ss:$8 sps:$4 sm:$0xff]   ;;  %v1464_v17 = vld [vmem:[%s1996_s2 + $0x34] ss:$8 sps:$4 sm:$0xff]  }
  0x11   : > { %601 = vmatpush1.bf16.msra.mxu0 %v1448_v6  ;;  %v1466_v18 = vld [vmem:[%s1996_s2 + $0x130] ss:$8 sps:$4 sm:$0xff]   ;;  %v1468_v20 = vld [vmem:[%s1996_s2 + $0x124] ss:$8 sps:$4 sm:$0xff]   ;;  %v1472_v22 = vld [vmem:[%s1996_s2 + $0x120] ss:$8 sps:$4 sm:$0xff]  }
  0x12   : > { %802 = vmatpush1.bf16.msra.mxu1 %v1449_v7  ;;  %602 = vmatprep.subr.bf16.mxu0 %v1450_v8  ;;  %v1467_v19 = vld [vmem:[%s1996_s2 + $0x30] ss:$8 sps:$4 sm:$0xff]   ;;  %v1470_v21 = vld [vmem:[%s1996_s2 + $0x24] ss:$8 sps:$4 sm:$0xff]   ;;  %v1473_v23 = vld [vmem:[%s1996_s2 + $0x20] ss:$8 sps:$4 sm:$0xff]  }
  0x13   : > { %803 = vmatprep.subr.bf16.mxu1 %v1452_v9  ;;  %v1474_v24 = vld [vmem:[%s1996_s2 + $0x114] ss:$8 sps:$4 sm:$0xff]   ;;  %v1478_v26 = vld [vmem:[%s1996_s2 + $0x110] ss:$8 sps:$4 sm:$0xff]   ;;  %v1480_v28 = vld [vmem:[%s1996_s2 + $0x104] ss:$8 sps:$4 sm:$0xff]  }
  0x14   : > { %v1476_v25 = vld [vmem:[%s1996_s2 + $0x14] ss:$8 sps:$4 sm:$0xff]   ;;  %v1479_v27 = vld [vmem:[%s1996_s2 + $0x10] ss:$8 sps:$4 sm:$0xff]   ;;  %v1482_v29 = vld [vmem:[%s1996_s2 + $0x4] ss:$8 sps:$4 sm:$0xff]  }
  0x15   : > { %603 = vmatpush1.bf16.msra.mxu0 %v1454_v10  ;;  %v1484_v30 = vld [vmem:[%s1996_s2 + $0x100] ss:$8 sps:$4 sm:$0xff]   ;;  %v1486_v32 = vld [vmem:[%s1996_s2 + $0x1f4] ss:$8 sps:$4 sm:$0xff]   ;;  %v1490_v34 = vld [vmem:[%s1996_s2 + $0x1f0] ss:$8 sps:$4 sm:$0xff]  }
  0x16   : > { %804 = vmatpush1.bf16.msra.mxu1 %v1455_v11  ;;  %604 = vmatprep.subr.bf16.mxu0 %v1456_v12  ;;  %v1485_v31 = vld [vmem:[%s1996_s2] ss:$8 sps:$4 sm:$0xff]   ;;  %v1488_v33 = vld [vmem:[%s1996_s2 + $0xf4] ss:$8 sps:$4 sm:$0xff]   ;;  %v1491_v35 = vld [vmem:[%s1996_s2 + $0xf0] ss:$8 sps:$4 sm:$0xff]  }
  0x17   : > { %805 = vmatprep.subr.bf16.mxu1 %v1458_v13  ;;  %v1492_v37 = vld [vmem:[%s1996_s2 + $0x1e4] ss:$8 sps:$4 sm:$0xff]   ;;  %s2005_s25 = smov (!%p292_p3, %s1242_s25), 1  ;;  %v1496_v39 = vld [vmem:[%s1996_s2 + $0x1e0] ss:$8 sps:$4 sm:$0xff]   ;;  %v317_v40 = vshrl.u32 %v316_v36, 7 }
  0x18   : > { %v1494_v38 = vld [vmem:[%s1996_s2 + $0xe4] ss:$8 sps:$4 sm:$0xff]   ;;  %v1497_v41 = vld [vmem:[%s1996_s2 + $0xe0] ss:$8 sps:$4 sm:$0xff]   ;;  %v1498_v42 = vld [vmem:[%s1996_s2 + $0x1d4] ss:$8 sps:$4 sm:$0xff]  }
  0x19   : > { %605 = vmatpush1.bf16.msra.mxu0 %v1460_v14  ;;  %s1768_s22 = sshll.u32 %s2005_s25, 4  ;;  %v1500_v43 = vld [vmem:[%s1996_s2 + $0xd4] ss:$8 sps:$4 sm:$0xff]   ;;  %v1502_v44 = vld [vmem:[%s1996_s2 + $0x1d0] ss:$8 sps:$4 sm:$0xff]   ;;  %v1786_v47 = vsub.s32 0, %v317_v40 }
  0x1a   : > { %806 = vmatpush1.bf16.msra.mxu1 %v1461_v15  ;;  %606 = vmatprep.subr.bf16.mxu0 %v1462_v16  ;;  %v1503_v45 = vld [vmem:[%s1996_s2 + $0xd0] ss:$8 sps:$4 sm:$0xff]   ;;  %s296_s10 = scalar_lea.vmem %s1994_s0, %s1768_s22  ;;  %v1504_v46 = vld [vmem:[%s1996_s2 + $0x1c4] ss:$8 sps:$4 sm:$0xff]   ;;  %v1788_v48 = vsub.s32 1, %v317_v40  ;;  %vm350_vm0 = vcmask 1040384   ;;  %s301_s26 = scalar_lea.vmem %s1995_s1, %s1768_s22 }
  0x1b   : > { %807 = vmatprep.subr.bf16.mxu1 %v1464_v17  ;;  %v1506_v49 = vld [vmem:[%s1996_s2 + $0xc4] ss:$8 sps:$4 sm:$0xff]   ;;  %v1508_v50 = vld [vmem:[%s1996_s2 + $0x1c0] ss:$8 sps:$4 sm:$0xff]   ;;  %v1510_v59 = vld [vmem:[%s1996_s2 + $0x1b4] ss:$8 sps:$4 sm:$0xff]   ;;  %s306_s29 = scalar_lea.vmem %s2000_s6, %s1768_s22 }
  0x1c   : > { %v312_v51 = vld [vmem:[%s296_s10] sm:$0xff]  ;;  %v313_v52 = vld [vmem:[%s296_s10 + $0x8] sm:$0xff]  ;;  %v1512_v60 = vld [vmem:[%s1996_s2 + $0xb4] ss:$8 sps:$4 sm:$0xff]   ;;  %s1429_s22 = sshll.u32 %s2005_s25, 2 }
  0x1d   : > { %607 = vmatpush1.bf16.msra.mxu0 %v1466_v18  ;;  %v314_v53 = vld [vmem:[%s1998_s4] sm:$0x3]  ;;  %v1514_v0 = vld [vmem:[%s1996_s2 + $0x1b0] ss:$8 sps:$4 sm:$0xff]   ;;  %v1516_v4 = vld [vmem:[%s1996_s2 + $0x1a4] ss:$8 sps:$4 sm:$0xff]   ;;  %s311_s9 = scalar_lea.vmem %s2001_s7, %s1429_s22 }
  0x1e   : > { %808 = vmatpush1.bf16.msra.mxu1 %v1467_v19  ;;  %608 = vmatprep.subr.bf16.mxu0 %v1468_v20  ;;  %v328_v54 = vld [vmem:[%s1999_s5] sm:$0x3]  ;;  %v319_v56 = vrot.slane %v314_v53, %v1786_v47  ;;  %v323_v57 = vrot.slane %v314_v53, %v1788_v48  ;;  %v1515_v1 = vld [vmem:[%s1996_s2 + $0xb0] ss:$8 sps:$4 sm:$0xff]   ;;  %v1518_v5 = vld [vmem:[%s1996_s2 + $0xa4] ss:$8 sps:$4 sm:$0xff]  }
  0x1f   : > { %809 = vmatprep.subr.bf16.mxu1 %v1470_v21  ;;  %v1509_v55 = vld [vmem:[%s1996_s2 + $0xc0] ss:$8 sps:$4 sm:$0xff]   ;;  %v333_v58 = vrot.slane %v328_v54, %v1786_v47  ;;  %v337_v61 = vrot.slane %v328_v54, %v1788_v48  ;;  %v1522_v10 = vld [vmem:[%s1996_s2 + $0x194] ss:$8 sps:$4 sm:$0xff]   ;;  %vm1351_vm1 = vmneg %vm350_vm0 }
  0x20   : > { %v327_v62 = vmul.f32 %v323_v57, %v313_v52  ;;  %v326_v63 = vmul.f32 %v319_v56, %v312_v51  ;;  %v1520_v8 = vld [vmem:[%s1996_s2 + $0x1a0] ss:$8 sps:$4 sm:$0xff]   ;;  %v1524_v13 = vld [vmem:[%s1996_s2 + $0x94] ss:$8 sps:$4 sm:$0xff]   ;;  %v1526_v14 = vld [vmem:[%s1996_s2 + $0x190] ss:$8 sps:$4 sm:$0xff]  }
  0x21   : > { %609 = vmatpush1.bf16.msra.mxu0 %v1472_v22  ;;  %v1521_v9 = vld [vmem:[%s1996_s2 + $0xa0] ss:$8 sps:$4 sm:$0xff]   ;;  %v1527_v19 = vld [vmem:[%s1996_s2 + $0x90] ss:$8 sps:$4 sm:$0xff]   ;;  %vm1850_vm2 = vmpackc.low %vm350_vm0, %vm1351_vm1 }
  0x22   : > { %810 = vmatpush1.bf16.msra.mxu1 %v1473_v23  ;;  %610 = vmatprep.subr.bf16.mxu0 %v1474_v24  ;;  %v341_v2 = vadd.f32 %v337_v61, %v327_v62  ;;  %v340_v3 = vadd.f32 %v333_v58, %v326_v63  ;;  %v1528_v23 = vld [vmem:[%s1996_s2 + $0x184] ss:$8 sps:$4 sm:$0xff]   ;;  %v1549_v51 = vld [vmem:[%s1996_s2 + $0x220] ss:$8 sps:$4 sm:$0xff]   ;;  %v1554_v52 = vld [vmem:[%s1996_s2 + $0x214] ss:$8 sps:$4 sm:$0xff]  }
  0x23   : > { %811 = vmatprep.subr.bf16.mxu1 %v1476_v25  ;;  %v1530_v25 = vld [vmem:[%s1996_s2 + $0x84] ss:$8 sps:$4 sm:$0xff]   ;;  %v1552_v53 = vld [vmem:[%s1996_s2 + $0x210] ss:$8 sps:$4 sm:$0xff]   ;;  %v1560_v56 = vld [vmem:[%s1996_s2 + $0x2f4] ss:$8 sps:$4 sm:$0xff]  }
  0x24   : > { %v343_v6 = vmax.f32 %v341_v2, 0.0  ;;  %v342_v7 = vmax.f32 %v340_v3, 0.0  ;;  %v1539_v40 = vld [vmem:[%s1996_s2 + $0x264] ss:$8 sps:$4 sm:$0xff]   ;;  %v1558_v57 = vld [vmem:[%s1996_s2 + $0x2f0] ss:$8 sps:$4 sm:$0xff]  }
  0x25   : > { %611 = vmatpush1.bf16.msra.mxu0 %v1478_v26  ;;  %v1557_v54 = vld [vmem:[%s1996_s2 + $0x204] ss:$8 sps:$4 sm:$0xff]   ;;  %v1564_v61 = vld [vmem:[%s1996_s2 + $0x2d0] ss:$8 sps:$4 sm:$0xff]   ;;  %v1567_v63 = vld [vmem:[%s1996_s2 + $0x2c0] ss:$8 sps:$4 sm:$0xff]  }
  0x26   : > { %812 = vmatpush1.bf16.msra.mxu1 %v1479_v27  ;;  %612 = vmatprep.subr.bf16.mxu0 %v1480_v28  ;;  %v347_v11 = vrot.slane %v343_v6, 7  ;;  %v346_v12 = vrot.slane %v342_v7, 7  ;;  %v1563_v58 = vld [vmem:[%s1996_s2 + $0x2e4] ss:$8 sps:$4 sm:$0xff]   ;;  %v1573_v3 = vld [vmem:[%s1996_s2 + $0x2a0] ss:$8 sps:$4 sm:$0xff]  }
  0x27   : > { %813 = vmatprep.subr.bf16.mxu1 %v1482_v29  ;;  %v1532_v29 = vld [vmem:[%s1996_s2 + $0x180] ss:$8 sps:$4 sm:$0xff]   ;;  %v1569_v62 = vld [vmem:[%s1996_s2 + $0x2c4] ss:$8 sps:$4 sm:$0xff]  }
  0x28   : > { %v352_v15 = vsel %vm350_vm0, 0.0, %v347_v11  ;;  %v354_v16 = vsel %vm350_vm0, %v347_v11, 0.0  ;;  %v1353_v17 = vpack.c.bf16 %v347_v11, %v347_v11  ;;  %v351_v18 = vsel %vm350_vm0, 0.0, %v346_v12  ;;  %v1575_v2 = vld [vmem:[%s1996_s2 + $0x2a4] ss:$8 sps:$4 sm:$0xff]  }
  0x29   : > { %613 = vmatpush1.bf16.msra.mxu0 %v1484_v30  ;;  %v356_v20 = vpack.c.bf16 %v354_v16, %v352_v15  ;;  %v353_v22 = vsel %vm350_vm0, %v346_v12, 0.0  ;;  %v1581_v6 = vld [vmem:[%s1996_s2 + $0x284] ss:$8 sps:$4 sm:$0xff]   ;;  %v1579_v7 = vld [vmem:[%s1996_s2 + $0x280] ss:$8 sps:$4 sm:$0xff]  }
  0x2a   : > { %814 = vmatpush1.bf16.msra.mxu1 %v1485_v31  ;;  %614 = vmatprep.subr.bf16.mxu0 %v1486_v32  ;;  %v1858_v24 = vpack.c.bf16 %v353_v22, %v351_v18  ;;  %v1533_v32 = vld [vmem:[%s1996_s2 + $0x80] ss:$8 sps:$4 sm:$0xff]  }
  0x2b   : > { %815 = vmatprep.subr.bf16.mxu1 %v1488_v33  ;;  %v430_v26 = vshrl.u32 %v356_v20, 16  ;;  %v432_v27 = vshll.u32 %v356_v20, 16  ;;  %1354 = vmatprep.mubr.msk.bf16.mxu1 %vm1850_vm2, %v1353_v17  ;;  %v1082_v17 = vld [vmem:[%s1997_s3] sm:$0x3] }
  0x2c   : > { %v425_v28 = vshll.u32 %v1858_v24, 16  ;;  %v423_v31 = vshrl.u32 %v1858_v24, 16 }
  0x2d   : > { %615 = vmatpush2.bf16.msra.mxu0 %v1490_v34  ;;  %v434_v30 = vrot.slane %v432_v27, 1 }
  0x2e   : > { %816 = vmatpush2.bf16.msra.mxu1 %v1491_v35  ;;  %616 = vmatprep.subr.bf16.mxu0 %v1492_v37  ;;  %v427_v33 = vrot.slane %v425_v28, 1  ;;  %v1536_v35 = vld [vmem:[%s1996_s2 + $0x274] ss:$8 sps:$4 sm:$0xff]   ;;  %v1357_v37 = vpack.c.bf16 %v346_v12, %v346_v12  ;;  %v1097_v28 = vld [vmem:[%s301_s26 + $0x8] sm:$0xff] }
  0x2f   : > { %817 = vmatprep.subr.bf16.mxu1 %v1494_v38  ;;  %v435_v34 = vor.u32 %v434_v30, %v430_v26  ;;  %v1534_v38 = vld [vmem:[%s1996_s2 + $0x270] ss:$8 sps:$4 sm:$0xff]  }
  0x30   : > { %v428_v36 = vor.u32 %v427_v33, %v423_v31 }
  0x31   : > { %617 = vmatpush2.bf16.msra.mxu0 %v1496_v39  ;;  %630 = vmatprep.mubr.bf16.mxu0 %v435_v34  ;;  %v876_v39 = vrot.slane %v356_v20, 1 }
  0x32   : > { %818 = vmatpush2.bf16.msra.mxu1 %v1497_v41  ;;  %618 = vmatprep.subr.bf16.mxu0 %v1498_v42  ;;  %v1537_v41 = vld [vmem:[%s1996_s2 + $0x260] ss:$8 sps:$4 sm:$0xff]   ;;  %v1542_v42 = vld [vmem:[%s1996_s2 + $0x254] ss:$8 sps:$4 sm:$0xff]  }
  0x33   : > { %819 = vmatprep.subr.bf16.mxu1 %v1500_v43  ;;  %v1540_v43 = vld [vmem:[%s1996_s2 + $0x250] ss:$8 sps:$4 sm:$0xff]  }
  0x35   : > { %619 = vmatpush2.bf16.msra.mxu0 %v1502_v44  ;;  %v1545_v44 = vld [vmem:[%s1996_s2 + $0x244] ss:$8 sps:$4 sm:$0xff]  }
  0x36   : > { %820 = vmatpush2.bf16.msra.mxu1 %v1503_v45  ;;  %620 = vmatprep.subr.bf16.mxu0 %v1504_v46  ;;  %v1543_v45 = vld [vmem:[%s1996_s2 + $0x240] ss:$8 sps:$4 sm:$0xff]   ;;  %v1548_v46 = vld [vmem:[%s1996_s2 + $0x234] ss:$8 sps:$4 sm:$0xff]  }
  0x37   : > { %821 = vmatprep.subr.bf16.mxu1 %v1506_v49  ;;  %v1546_v49 = vld [vmem:[%s1996_s2 + $0x230] ss:$8 sps:$4 sm:$0xff]  }
  0x39   : > { %621 = vmatpush2.bf16.msra.mxu0 %v1508_v50  ;;  %v1551_v50 = vld [vmem:[%s1996_s2 + $0x224] ss:$8 sps:$4 sm:$0xff]  }
  0x3a   : > { %822 = vmatpush2.bf16.msra.mxu1 %v1509_v55  ;;  %622 = vmatprep.subr.bf16.mxu0 %v1510_v59  ;;  %v1555_v55 = vld [vmem:[%s1996_s2 + $0x200] ss:$8 sps:$4 sm:$0xff]  }
  0x3b   : > { %823 = vmatprep.subr.bf16.mxu1 %v1512_v60  ;;  %v1561_v59 = vld [vmem:[%s1996_s2 + $0x2e0] ss:$8 sps:$4 sm:$0xff]   ;;  %v1566_v60 = vld [vmem:[%s1996_s2 + $0x2d4] ss:$8 sps:$4 sm:$0xff]  }
  0x3d   : > { %623 = vmatpush2.bf16.msra.mxu0 %v1514_v0  ;;  %v1572_v0 = vld [vmem:[%s1996_s2 + $0x2b4] ss:$8 sps:$4 sm:$0xff]  }
  0x3e   : > { %824 = vmatpush2.bf16.msra.mxu1 %v1515_v1  ;;  %624 = vmatprep.subr.bf16.mxu0 %v1516_v4  ;;  %v1570_v1 = vld [vmem:[%s1996_s2 + $0x2b0] ss:$8 sps:$4 sm:$0xff]   ;;  %v1578_v4 = vld [vmem:[%s1996_s2 + $0x294] ss:$8 sps:$4 sm:$0xff]  }
  0x3f   : > { %825 = vmatprep.subr.bf16.mxu1 %v1518_v5  ;;  %v1576_v5 = vld [vmem:[%s1996_s2 + $0x290] ss:$8 sps:$4 sm:$0xff]  }
  0x41   : > { %625 = vmatpush2.bf16.msra.mxu0 %v1520_v8  ;;  %v875_v8 = vrot.slane %v1858_v24, 1  ;;  %v1096_v24 = vld [vmem:[%s301_s26] sm:$0xff] }
  0x42   : > { %826 = vmatpush2.bf16.msra.mxu1 %v1521_v9  ;;  %626 = vmatprep.subr.bf16.mxu0 %v1522_v10 }
  0x43   : > { %827 = vmatprep.subr.bf16.mxu1 %v1524_v13 }
  0x45   : > { %627 = vmatpush2.bf16.msra.mxu0 %v1526_v14 }
  0x46   : > { %828 = vmatpush2.bf16.msra.mxu1 %v1527_v19  ;;  %628 = vmatprep.subr.bf16.mxu0 %v1528_v23  ;;  %v1087_v19 = vrot.slane %v1082_v17, %v1786_v47  ;;  %v1091_v23 = vrot.slane %v1082_v17, %v1788_v48 }
  0x47   : > { %829 = vmatprep.subr.bf16.mxu1 %v1530_v25 }
  0x49   : > { %629 = vmatpush2.bf16.msra.mxu0 %v1532_v29 }
  0x4a   : > { %830 = vmatpush2.bf16.msra.mxu1 %v1533_v32  ;;  %1039 = vmatprep.subr.bf16.mxu0 %v1536_v35 }
  0x4c   : > { %631 = vmatmul.mubr.bf16.vlgmr.msra.gmra.mxu0 %v428_v36 }
  0x4d   : > { %1358 = vmatmul.mubr.msk.bf16.vlgmr.msra.gmra.mxu1 %vm1850_vm2, %v1357_v37  ;;  %1040 = vmatpush1.bf16.msra.mxu0 %v1534_v38 }
  0x4e   : > { %1071 = vmatprep.mubr.bf16.mxu0 %v876_v39  ;;  %1041 = vmatprep.subr.bf16.mxu0 %v1539_v40 }
  0x51   : > { %1042 = vmatpush1.bf16.msra.mxu0 %v1537_v41 }
  0x52   : > { %1043 = vmatprep.subr.bf16.mxu0 %v1542_v42 }
  0x55   : > { %1044 = vmatpush1.bf16.msra.mxu0 %v1540_v43 }
  0x56   : > { %1045 = vmatprep.subr.bf16.mxu0 %v1545_v44 }
  0x59   : > { %1046 = vmatpush1.bf16.msra.mxu0 %v1543_v45 }
  0x5a   : > { %1047 = vmatprep.subr.bf16.mxu0 %v1548_v46 }
  0x5d   : > { %1048 = vmatpush1.bf16.msra.mxu0 %v1546_v49 }
  0x5e   : > { %1049 = vmatprep.subr.bf16.mxu0 %v1551_v50 }
  0x61   : > { %1050 = vmatpush1.bf16.msra.mxu0 %v1549_v51 }
  0x62   : > { %1051 = vmatprep.subr.bf16.mxu0 %v1554_v52 }
  0x65   : > { %1052 = vmatpush1.bf16.msra.mxu0 %v1552_v53 }
  0x66   : > { %1053 = vmatprep.subr.bf16.mxu0 %v1557_v54 }
  0x69   : > { %1054 = vmatpush1.bf16.msra.mxu0 %v1555_v55 }
  0x6a   : > { %1055 = vmatprep.subr.bf16.mxu0 %v1560_v56 }
  0x6d   : > { %1056 = vmatpush2.bf16.msra.mxu0 %v1558_v57 }
  0x6e   : > { %1057 = vmatprep.subr.bf16.mxu0 %v1563_v58 }
  0x71   : > { %1058 = vmatpush2.bf16.msra.mxu0 %v1561_v59 }
  0x72   : > { %1059 = vmatprep.subr.bf16.mxu0 %v1566_v60 }
  0x75   : > { %1060 = vmatpush2.bf16.msra.mxu0 %v1564_v61 }
  0x76   : > { %1061 = vmatprep.subr.bf16.mxu0 %v1569_v62 }
  0x79   : > { %1062 = vmatpush2.bf16.msra.mxu0 %v1567_v63 }
  0x7a   : > { %1063 = vmatprep.subr.bf16.mxu0 %v1572_v0 }
  0x7d   : > { %1064 = vmatpush2.bf16.msra.mxu0 %v1570_v1 }
  0x7e   : > { %1065 = vmatprep.subr.bf16.mxu0 %v1575_v2 }
  0x81   : > { %1066 = vmatpush2.bf16.msra.mxu0 %v1573_v3 }
  0x82   : > { %1067 = vmatprep.subr.bf16.mxu0 %v1578_v4 }
  0x85   : > { %1068 = vmatpush2.bf16.msra.mxu0 %v1576_v5 }
  0x86   : > { %1069 = vmatprep.subr.bf16.mxu0 %v1581_v6 }
  0x89   : > { %1070 = vmatpush2.bf16.msra.mxu0 %v1579_v7 }
  0x8c   : > { %1072 = vmatmul.mubr.bf16.vlgmr.msra.gmra.mxu0 %v875_v8 }
 0x10c   : > { %v632_v9 = vpop.f32.mrf.mxu0 }
 0x10d   : > { %v833_v10 = vpop.f32.mrf.mxu1 }
 0x10e   : > { %v634_v11 = vpop.f32.mrf.mxu0  ;;  %v834_v18 = vadd.f32 %v833_v10, %v632_v9 }
 0x10f   : > { %v835_v12 = vpop.f32.mrf.mxu1 }
 0x110   : > { %v636_v13 = vpop.f32.mrf.mxu0  ;;  %v836_v21 = vadd.f32 %v835_v12, %v634_v11 }
 0x111   : > { %v837_v14 = vpop.f32.mrf.mxu1 }
 0x112   : > { %v637_v15 = vpop.f32.mrf.mxu0 }
 0x113   : > { %v838_v16 = vpop.f32.mrf.mxu1 }
 0x14c   : > { %v1073_v20 = vpop.f32.mrf.mxu0 }
 0x14d   : > { %v1080_v22 = vadd.f32 %v1073_v20, %v834_v18 }
 0x14e   : > { %v1075_v25 = vpop.f32.mrf.mxu0 }
 0x14f   : > { %v1094_v26 = vadd.f32 %v1087_v19, %v1080_v22  ;;  %v1081_v27 = vadd.f32 %v1075_v25, %v836_v21 }
 0x150   : > { %v1077_v29 = vpop.f32.mrf.mxu0 }
 0x151   : > { %v1098_v30 = vadd.f32 %v1096_v24, %v1094_v26  ;;  %v1095_v31 = vadd.f32 %v1091_v23, %v1081_v27 }
 0x152   : > { %v1078_v32 = vpop.f32.mrf.mxu0 }
 0x153   : > { %v1100_v33 = vrot.slane %v1098_v30, 4  ;;  %v1112_v47 = vmul.f32 %v1098_v30, %v1098_v30  ;;  %1140 = vst [vmem:[%s306_s29] sm:$0xff] %v1098_v30  ;;  %v1099_v34 = vadd.f32 %v1097_v28, %v1095_v31 }
 0x155   : > { %v1101_v35 = vadd.f32 %v1100_v33, %v1098_v30  ;;  %v1114_v36 = vrot.slane %v1112_v47, 4  ;;  %v1106_v48 = vrot.slane %v1099_v34, 4  ;;  %v1113_v37 = vmul.f32 %v1099_v34, %v1099_v34  ;;  %1141 = vst [vmem:[%s306_s29 + $0x8] sm:$0xff] %v1099_v34 }
 0x157   : > { %v1102_v38 = vrot.slane %v1101_v35, 2  ;;  %v1115_v39 = vadd.f32 %v1114_v36, %v1112_v47  ;;  %v1107_v40 = vadd.f32 %v1106_v48, %v1099_v34  ;;  %v1120_v41 = vrot.slane %v1113_v37, 4 }
 0x159   : > { %v1103_v42 = vadd.f32 %v1102_v38, %v1101_v35  ;;  %v1116_v43 = vrot.slane %v1115_v39, 2  ;;  %v1108_v44 = vrot.slane %v1107_v40, 2  ;;  %v1121_v45 = vadd.f32 %v1120_v41, %v1113_v37 }
 0x15b   : > { %v1117_v46 = vadd.f32 %v1116_v43, %v1115_v39  ;;  %v1109_v49 = vadd.f32 %v1108_v44, %v1107_v40  ;;  %v1122_v50 = vrot.slane %v1121_v45, 2  ;;  %v1104_v51 = vrot.slane %v1103_v42, 1 }
 0x15d   : > { %v1118_v52 = vrot.slane %v1117_v46, 1  ;;  %v1110_v53 = vrot.slane %v1109_v49, 1  ;;  %v1123_v54 = vadd.f32 %v1122_v50, %v1121_v45  ;;  %v1105_v57 = vadd.f32 %v1104_v51, %v1103_v42 }
 0x15f   : > { %v1119_v55 = vadd.f32 %v1118_v52, %v1117_v46  ;;  %v1124_v56 = vrot.slane %v1123_v54, 1  ;;  %v1111_v58 = vadd.f32 %v1110_v53, %v1109_v49 }
 0x161   : > { %v1125_v59 = vadd.f32 %v1124_v56, %v1123_v54  ;;  %v1126_v60 = vsel %vm350_vm0, %v1105_v57, %v1119_v55 }
 0x163   : > { %v1127_v61 = vsel %vm350_vm0, %v1111_v58, %v1125_v59 }
 0x164   : > { %v1130_v62 = vcombine.low %v1126_v60, %v1127_v61 }
 0x166   : > { %1423 = vst.sshfl [vmem:[%s311_s9] sm:$0x33 pattern:$0x76325410] %v1130_v62 }
 0x167 PF: > { %s18_s24 = sadd.s32 1, %s1588_s24  }
 0x168   : > { %p15_p4 = scmp.ge.s32.totalorder %s18_s24, 4  }
 0x16a   :  { %17 = sbr.rel (!%p15_p4) target bundleno = 1 (0x1), region = 91 }

// kernel: tile.98
= control target key start
LH: loop header
LB: loop body
LE: loop exit
PB: predicated region body
PF: predicated region fallthrough
CT: control target
= control target key end

     0   :  { %s64_s0 = inlined_call_operand.vmem [shape: f32[8], index: 0, kind: input, shape index: {}]   ;;  %s65_s1 = inlined_call_operand.vmem [shape: f32[64,8], index: 1, kind: output, shape index: {}]  }
   0x1   :  { %v4_v0 = vld [vmem:[%s64_s0] ss:$0 sm:$0xff] }
   0x2   :  { %5 = vst [vmem:[%s65_s1] sm:$0xff] %v4_v0  ;;  %20 = vst [vmem:[%s65_s1 + $0x8] sm:$0xff] %v4_v0 }
   0x3   :  { %21 = vst [vmem:[%s65_s1 + $0x10] sm:$0xff] %v4_v0  ;;  %22 = vst [vmem:[%s65_s1 + $0x18] sm:$0xff] %v4_v0 }
   0x4   :  { %23 = vst [vmem:[%s65_s1 + $0x20] sm:$0xff] %v4_v0  ;;  %24 = vst [vmem:[%s65_s1 + $0x28] sm:$0xff] %v4_v0 }
   0x5   :  { %25 = vst [vmem:[%s65_s1 + $0x30] sm:$0xff] %v4_v0  ;;  %26 = vst [vmem:[%s65_s1 + $0x38] sm:$0xff] %v4_v0 }

// kernel: tile.99
= control target key start
LH: loop header
LB: loop body
LE: loop exit
PB: predicated region body
PF: predicated region fallthrough
CT: control target
= control target key end

     0   :  { %vm6_vm0 = vcmask 1043458   ;;  %s11_s6 = smov 3  ;;  %s14_s7 = smov 12  ;;  %vm8_vm1 = vcmask 64512   ;;  %vm20_vm2 = vcmask 1048512   ;;  %vm32_vm3 = vcmask 982912   ;;  %s417_s0 = inlined_call_operand.vmem [shape: f32[64,8], index: 0, kind: input, shape index: {}]   ;;  %s418_s1 = inlined_call_operand.vmem [shape: f32[1,512], index: 1, kind: output, shape index: {}]  }
   0x1   :  { %v220_v0 = vld [vmem:[%s417_s0 + $0xf] ss:$16 sm:%s11_s6]   ;;  %s35_s12 = smov 3  ;;  %s38_s15 = smov 12  ;;  %vm44_vm4 = vcmask 917312   ;;  %vm56_vm5 = vcmask 851712  }
   0x2   :  { %v221_v1 = vld [vmem:[%s417_s0 + $0xf] ss:$16 sm:%s14_s7]   ;;  %v224_v3 = vld [vmem:[%s417_s0 + $0xd] ss:$16 sm:%s35_s12]   ;;  %s268_s16 = smov 120   ;;  %s23_s19 = smov 3 }
   0x3   :  { %v17_v2 = vsel %vm6_vm0, %v221_v1, %v220_v0  ;;  %v225_v4 = vld [vmem:[%s417_s0 + $0xd] ss:$16 sm:%s38_s15]   ;;  %s26_s20 = smov 12  ;;  %v222_v6 = vld [vmem:[%s417_s0 + $0xe] ss:$16 sm:%s23_s19]   ;;  %s47_s25 = smov 3 }
   0x4   :  { %18 = vrot.lane.b32.xlu0 %v17_v2, %s268_s16  ;;  %v41_v5 = vsel %vm6_vm0, %v225_v4, %v224_v3  ;;  %v223_v7 = vld [vmem:[%s417_s0 + $0xe] ss:$16 sm:%s26_s20]   ;;  %s269_s26 = smov 104   ;;  %s50_s29 = smov 12  ;;  %vm68_vm6 = vcmask 786112   ;;  %vm80_vm7 = vcmask 720512  }
   0x5   :  { %42 = vrot.lane.b32.xlu1 %v41_v5, %s269_s26  ;;  %v29_v8 = vsel %vm6_vm0, %v223_v7, %v222_v6  ;;  %v226_v9 = vld [vmem:[%s417_s0 + $0xc] ss:$16 sm:%s47_s25]   ;;  %s59_s3 = smov 3  ;;  %s62_s4 = smov 12  ;;  %vm92_vm8 = vcmask 654912   ;;  %vm104_vm9 = vcmask 589312  }
   0x6   :  { %v227_v10 = vld [vmem:[%s417_s0 + $0xc] ss:$16 sm:%s50_s29]   ;;  %s270_s5 = smov 112   ;;  %v228_v12 = vld [vmem:[%s417_s0 + $0xb] ss:$16 sm:%s59_s3]   ;;  %s71_s8 = smov 3 }
   0x7   :  { %v53_v11 = vsel %vm6_vm0, %v227_v10, %v226_v9  ;;  %v229_v13 = vld [vmem:[%s417_s0 + $0xb] ss:$16 sm:%s62_s4]   ;;  %v230_v14 = vld [vmem:[%s417_s0 + $0xa] ss:$16 sm:%s71_s8]   ;;  %s74_s13 = smov 12  ;;  %s271_s14 = smov 96  }
   0x8   :  { %30 = vrot.lane.b32.xlu0 %v29_v8, %s270_s5  ;;  %v65_v15 = vsel %vm6_vm0, %v229_v13, %v228_v12  ;;  %v231_v16 = vld [vmem:[%s417_s0 + $0xa] ss:$16 sm:%s74_s13]   ;;  %s83_s17 = smov 3  ;;  %s86_s18 = smov 12  ;;  %vm116_vm10 = vcmask 523712   ;;  %vm128_vm11 = vcmask 458112  }
   0x9   :  { %54 = vrot.lane.b32.xlu1 %v53_v11, %s271_s14  ;;  %v77_v17 = vsel %vm6_vm0, %v231_v16, %v230_v14  ;;  %v232_v18 = vld [vmem:[%s417_s0 + $0x9] ss:$16 sm:%s83_s17]   ;;  %s95_s23 = smov 3  ;;  %s272_s24 = smov 88   ;;  %vm140_vm12 = vcmask 392512   ;;  %vm152_vm13 = vcmask 326912  }
   0xa   :  { %v233_v19 = vld [vmem:[%s417_s0 + $0x9] ss:$16 sm:%s86_s18]   ;;  %v234_v20 = vld [vmem:[%s417_s0 + $0x8] ss:$16 sm:%s95_s23]   ;;  %s98_s27 = smov 12  ;;  %s107_s30 = smov 3 }
   0xb   :  { %v89_v21 = vsel %vm6_vm0, %v233_v19, %v232_v18  ;;  %v235_v22 = vld [vmem:[%s417_s0 + $0x8] ss:$16 sm:%s98_s27]   ;;  %s110_s2 = smov 12  ;;  %s273_s3 = smov 80   ;;  %v236_v23 = vld [vmem:[%s417_s0 + $0x7] ss:$16 sm:%s107_s30]  }
   0xc   :  { %66 = vrot.lane.b32.xlu0 %v65_v15, %s272_s24  ;;  %s119_s6 = smov 3  ;;  %v101_v24 = vsel %vm6_vm0, %v235_v22, %v234_v20  ;;  %v237_v25 = vld [vmem:[%s417_s0 + $0x7] ss:$16 sm:%s110_s2]   ;;  %s122_s11 = smov 12  ;;  %vm164_vm14 = vcmask 261312   ;;  %vm176_vm15 = vcmask 195712  }
   0xd   :  { %78 = vrot.lane.b32.xlu1 %v77_v17, %s273_s3  ;;  %v238_v26 = vld [vmem:[%s417_s0 + $0x6] ss:$16 sm:%s119_s6]   ;;  %s274_s12 = smov 72   ;;  %s131_s15 = smov 3  ;;  %v113_v28 = vsel %vm6_vm0, %v237_v25, %v236_v23 }
   0xe   :  { %v239_v27 = vld [vmem:[%s417_s0 + $0x6] ss:$16 sm:%s122_s11]   ;;  %s134_s16 = smov 12  ;;  %v240_v29 = vld [vmem:[%s417_s0 + $0x5] ss:$16 sm:%s131_s15]   ;;  %s143_s19 = smov 3 }
   0xf   :  { %s275_s20 = smov 64   ;;  %v241_v30 = vld [vmem:[%s417_s0 + $0x5] ss:$16 sm:%s134_s16]   ;;  %s146_s23 = smov 12  ;;  %v125_v31 = vsel %vm6_vm0, %v239_v27, %v238_v26  ;;  %v242_v32 = vld [vmem:[%s417_s0 + $0x4] ss:$16 sm:%s143_s19]  }
  0x10   :  { %90 = vrot.lane.b32.xlu0 %v89_v21, %s274_s12  ;;  %s155_s26 = smov 3  ;;  %s158_s27 = smov 12  ;;  %v243_v33 = vld [vmem:[%s417_s0 + $0x4] ss:$16 sm:%s146_s23]   ;;  %v137_v34 = vsel %vm6_vm0, %v241_v30, %v240_v29 }
  0x11   :  { %102 = vrot.lane.b32.xlu1 %v101_v24, %s275_s20  ;;  %s276_s28 = smov 56   ;;  %s167_s2 = smov 3  ;;  %v244_v35 = vld [vmem:[%s417_s0 + $0x3] ss:$16 sm:%s155_s26]   ;;  %v149_v37 = vsel %vm6_vm0, %v243_v33, %v242_v32 }
  0x12   :  { %s170_s5 = smov 12  ;;  %s277_s6 = smov 48   ;;  %v245_v36 = vld [vmem:[%s417_s0 + $0x3] ss:$16 sm:%s158_s27]   ;;  %v246_v38 = vld [vmem:[%s417_s0 + $0x2] ss:$16 sm:%s167_s2]  }
  0x13   :  { %s179_s9 = smov 3  ;;  %v247_v39 = vld [vmem:[%s417_s0 + $0x2] ss:$16 sm:%s170_s5]   ;;  %s182_s14 = smov 12  ;;  %v161_v41 = vsel %vm6_vm0, %v245_v36, %v244_v35 }
  0x14   :  { %114 = vrot.lane.b32.xlu0 %v113_v28, %s276_s28  ;;  %s2_s15 = smov 3  ;;  %s278_s16 = smov 40   ;;  %v248_v42 = vld [vmem:[%s417_s0 + $0x1] ss:$16 sm:%s179_s9]   ;;  %v173_v46 = vsel %vm6_vm0, %v247_v39, %v246_v38 }
  0x15   :  { %126 = vrot.lane.b32.xlu1 %v125_v31, %s277_s6  ;;  %v3_v40 = vld [vmem:[%s417_s0] ss:$16 sm:%s2_s15]   ;;  %s4_s19 = smov 12  ;;  %s279_s24 = smov 32  }
  0x16   :  { %v5_v43 = vld [vmem:[%s417_s0] ss:$16 sm:%s4_s19]   ;;  %v249_v44 = vld [vmem:[%s417_s0 + $0x1] ss:$16 sm:%s182_s14]   ;;  %s280_s0 = smov 24   ;;  %s281_s27 = smov 16  }
  0x17   :  { %v7_v45 = vsel %vm6_vm0, %v5_v43, %v3_v40  ;;  %v185_v47 = vsel %vm6_vm0, %v249_v44, %v248_v42  ;;  %s282_s28 = smov 8   ;;  %vm188_vm0 = vcmask 130112  }
  0x18   :  { %138 = vrot.lane.b32.xlu0 %v137_v34, %s278_s16  ;;  %9 = vst.msk [vmem:[#allocation0] ss:$8 sm:$0xf] %vm8_vm1, %v7_v45  }
  0x19   :  { %150 = vrot.lane.b32.xlu1 %v149_v37, %s279_s24 }
  0x1c   :  { %162 = vrot.lane.b32.xlu0 %v161_v41, %s280_s0 }
  0x1d   :  { %174 = vrot.lane.b32.xlu1 %v173_v46, %s281_s27 }
  0x20   :  { %186 = vrot.lane.b32.xlu0 %v185_v47, %s282_s28 }
  0x76   :  { %v19_v48 = vpop.permute.xlu0 %18  }
  0x77   :  { %21 = vst.msk [vmem:[#allocation0] ss:$8 sm:$0xf] %vm20_vm2, %v19_v48   ;;  %v43_v49 = vpop.permute.xlu1 %42  }
  0x7a   :  { %v31_v50 = vpop.permute.xlu0 %30  }
  0x7b   :  { %33 = vst.msk [vmem:[#allocation0] ss:$8 sm:$0xf] %vm32_vm3, %v31_v50   ;;  %v55_v51 = vpop.permute.xlu1 %54  }
  0x7c   :  { %45 = vst.msk [vmem:[#allocation0] ss:$8 sm:$0xf] %vm44_vm4, %v43_v49  }
  0x7d   :  { %57 = vst.msk [vmem:[#allocation0] ss:$8 sm:$0xf] %vm56_vm5, %v55_v51  }
  0x7e   :  { %v67_v52 = vpop.permute.xlu0 %66  }
  0x7f   :  { %69 = vst.msk [vmem:[#allocation0] ss:$8 sm:$0xf] %vm68_vm6, %v67_v52   ;;  %v79_v53 = vpop.permute.xlu1 %78  }
  0x80   :  { %81 = vst.msk [vmem:[#allocation0] ss:$8 sm:$0xf] %vm80_vm7, %v79_v53  }
  0x82   :  { %v91_v54 = vpop.permute.xlu0 %90  }
  0x83   :  { %93 = vst.msk [vmem:[#allocation0] ss:$8 sm:$0xf] %vm92_vm8, %v91_v54   ;;  %v103_v55 = vpop.permute.xlu1 %102  }
  0x84   :  { %105 = vst.msk [vmem:[#allocation0] ss:$8 sm:$0xf] %vm104_vm9, %v103_v55  }
  0x86   :  { %v115_v56 = vpop.permute.xlu0 %114  }
  0x87   :  { %117 = vst.msk [vmem:[#allocation0] ss:$8 sm:$0xf] %vm116_vm10, %v115_v56   ;;  %v127_v57 = vpop.permute.xlu1 %126  }
  0x88   :  { %129 = vst.msk [vmem:[#allocation0] ss:$8 sm:$0xf] %vm128_vm11, %v127_v57  }
  0x8a   :  { %v139_v58 = vpop.permute.xlu0 %138  }
  0x8b   :  { %141 = vst.msk [vmem:[#allocation0] ss:$8 sm:$0xf] %vm140_vm12, %v139_v58   ;;  %v151_v59 = vpop.permute.xlu1 %150  }
  0x8c   :  { %153 = vst.msk [vmem:[#allocation0] ss:$8 sm:$0xf] %vm152_vm13, %v151_v59  }
  0x8e   :  { %v163_v60 = vpop.permute.xlu0 %162  }
  0x8f   :  { %165 = vst.msk [vmem:[#allocation0] ss:$8 sm:$0xf] %vm164_vm14, %v163_v60   ;;  %v175_v61 = vpop.permute.xlu1 %174  }
  0x90   :  { %177 = vst.msk [vmem:[#allocation0] ss:$8 sm:$0xf] %vm176_vm15, %v175_v61  }
  0x92   :  { %v187_v62 = vpop.permute.xlu0 %186  }
  0x93   :  { %189 = vst.msk [vmem:[#allocation0] ss:$8 sm:$0xf] %vm188_vm0, %v187_v62  }
  0x9a   :  { %v194_v63 = vld [vmem:[#allocation0] sm:$0x1]  ;;  %v199_v0 = vld [vmem:[#allocation0 + $0x8] sm:$0x1]  ;;  %v205_v1 = vld [vmem:[#allocation0 + $0x10] sm:$0x1] }
  0x9b   :  { %197 = vst [vmem:[%s418_s1] sm:$0x1] %v194_v63  ;;  %250 = vst [vmem:[%s418_s1 + $0x1] sm:$0x1] %v199_v0  ;;  %v212_v2 = vld [vmem:[#allocation0 + $0x18] sm:$0x1] }
  0x9c   :  { %251 = vst [vmem:[%s418_s1 + $0x2] sm:$0x1] %v205_v1  ;;  %252 = vst [vmem:[%s418_s1 + $0x3] sm:$0x1] %v212_v2 }

// kernel: down_block3d.6
= control target key start
LH: loop header
LB: loop body
LE: loop exit
PB: predicated region body
PF: predicated region fallthrough
CT: control target
= control target key end

     0   :  { %s2626_s21 = smov 0   ;;  %s3295_s0 = inlined_call_operand.vmem [shape: f32[2,8,256], index: 0, kind: input, shape index: {}]   ;;  %s3296_s1 = inlined_call_operand.vmem [shape: bf16[3,256,512], index: 1, kind: input, shape index: {}]   ;;  %s3297_s2 = inlined_call_operand.vmem [shape: f32[1,512], index: 2, kind: input, shape index: {}]   ;;  %s3298_s3 = inlined_call_operand.vmem [shape: f32[1,256], index: 3, kind: input, shape index: {}]   ;;  %s3299_s4 = inlined_call_operand.vmem [shape: f32[1,256], index: 4, kind: input, shape index: {}]   ;;  %s3300_s5 = inlined_call_operand.vmem [shape: f32[2,8,512], index: 5, kind: output, shape index: {0}]   ;;  %s3301_s6 = inlined_call_operand.vmem [shape: f32[2,2,512], index: 6, kind: output, shape index: {1}]  }
   0x1 LB: > { %s1933_s22 = sadd.s32 4294967295, %s2588_s21   ;;  %p1937_p0 = scmp.ge.s32.totalorder %s2588_s21, 1  ;;  %s2588_s21 = sphi %s2626_s21, %s17_s21  }
   0x2   : > { %p215_p1 = scmp.lt.s32.totalorder %s2588_s21, 3 }
   0x4   : > { %p216_p2 = pnand %p1937_p0, %p215_p1 }
   0x5   : > { %p250_p3 = scmp.lt.s32.totalorder (!%p216_p2), %s1933_s22, 1 }
   0x6   : > { %219 = sbr.rel (%p216_p2) target bundleno = 426 (0x1aa), region = 40 }
   0xb   : > { %v2294_v0 = vld [vmem:[%s3296_s1 + $0x2e4] ss:$16 sps:$4 sm:$0xff]   ;;  %v2296_v1 = vld [vmem:[%s3296_s1 + $0x2ec] ss:$16 sps:$4 sm:$0xff]   ;;  %v2298_v2 = vld [vmem:[%s3296_s1 + $0x2e0] ss:$16 sps:$4 sm:$0xff]   ;;  %v269_v36 = vlaneseq }
   0xc   : > { %775 = vmatprep.subr.bf16.mxu0 %v2294_v0  ;;  %v2299_v3 = vld [vmem:[%s3296_s1 + $0x2e8] ss:$16 sps:$4 sm:$0xff]   ;;  %816 = vmatprep.subr.bf16.mxu1 %v2296_v1  ;;  %v2300_v4 = vld [vmem:[%s3296_s1 + $0x2c4] ss:$16 sps:$4 sm:$0xff]   ;;  %v2302_v5 = vld [vmem:[%s3296_s1 + $0x2cc] ss:$16 sps:$4 sm:$0xff]  }
   0xd   : > { %776 = vmatpush1.bf16.msra.mxu0 %v2298_v2  ;;  %817 = vmatpush1.bf16.msra.mxu1 %v2299_v3  ;;  %v2304_v6 = vld [vmem:[%s3296_s1 + $0x2c0] ss:$16 sps:$4 sm:$0xff]   ;;  %v2305_v7 = vld [vmem:[%s3296_s1 + $0x2c8] ss:$16 sps:$4 sm:$0xff]   ;;  %v2306_v8 = vld [vmem:[%s3296_s1 + $0x2a4] ss:$16 sps:$4 sm:$0xff]  }
   0xe   : > { %777 = vmatprep.subr.bf16.mxu0 %v2300_v4  ;;  %818 = vmatprep.subr.bf16.mxu1 %v2302_v5  ;;  %v2308_v9 = vld [vmem:[%s3296_s1 + $0x2ac] ss:$16 sps:$4 sm:$0xff]   ;;  %v2310_v10 = vld [vmem:[%s3296_s1 + $0x2a0] ss:$16 sps:$4 sm:$0xff]   ;;  %v2311_v11 = vld [vmem:[%s3296_s1 + $0x2a8] ss:$16 sps:$4 sm:$0xff]  }
   0xf   : > { %v2312_v12 = vld [vmem:[%s3296_s1 + $0x284] ss:$16 sps:$4 sm:$0xff]   ;;  %v2314_v13 = vld [vmem:[%s3296_s1 + $0x28c] ss:$16 sps:$4 sm:$0xff]   ;;  %v2316_v14 = vld [vmem:[%s3296_s1 + $0x280] ss:$16 sps:$4 sm:$0xff]  }
  0x10   : > { %v2317_v15 = vld [vmem:[%s3296_s1 + $0x288] ss:$16 sps:$4 sm:$0xff]   ;;  %v2318_v16 = vld [vmem:[%s3296_s1 + $0x264] ss:$16 sps:$4 sm:$0xff]   ;;  %v2320_v17 = vld [vmem:[%s3296_s1 + $0x26c] ss:$16 sps:$4 sm:$0xff]  }
  0x11   : > { %778 = vmatpush1.bf16.msra.mxu0 %v2304_v6  ;;  %819 = vmatpush1.bf16.msra.mxu1 %v2305_v7  ;;  %v2322_v18 = vld [vmem:[%s3296_s1 + $0x260] ss:$16 sps:$4 sm:$0xff]   ;;  %v2323_v19 = vld [vmem:[%s3296_s1 + $0x268] ss:$16 sps:$4 sm:$0xff]   ;;  %v2324_v20 = vld [vmem:[%s3296_s1 + $0x244] ss:$16 sps:$4 sm:$0xff]  }
  0x12   : > { %779 = vmatprep.subr.bf16.mxu0 %v2306_v8  ;;  %820 = vmatprep.subr.bf16.mxu1 %v2308_v9  ;;  %v2326_v21 = vld [vmem:[%s3296_s1 + $0x24c] ss:$16 sps:$4 sm:$0xff]   ;;  %v2328_v22 = vld [vmem:[%s3296_s1 + $0x240] ss:$16 sps:$4 sm:$0xff]   ;;  %v2329_v23 = vld [vmem:[%s3296_s1 + $0x248] ss:$16 sps:$4 sm:$0xff]  }
  0x13   : > { %v2330_v24 = vld [vmem:[%s3296_s1 + $0x224] ss:$16 sps:$4 sm:$0xff]   ;;  %v2332_v25 = vld [vmem:[%s3296_s1 + $0x22c] ss:$16 sps:$4 sm:$0xff]   ;;  %v2334_v26 = vld [vmem:[%s3296_s1 + $0x220] ss:$16 sps:$4 sm:$0xff]  }
  0x14   : > { %v2335_v27 = vld [vmem:[%s3296_s1 + $0x228] ss:$16 sps:$4 sm:$0xff]   ;;  %v2336_v28 = vld [vmem:[%s3296_s1 + $0x204] ss:$16 sps:$4 sm:$0xff]   ;;  %v2338_v29 = vld [vmem:[%s3296_s1 + $0x20c] ss:$16 sps:$4 sm:$0xff]  }
  0x15   : > { %780 = vmatpush1.bf16.msra.mxu0 %v2310_v10  ;;  %821 = vmatpush1.bf16.msra.mxu1 %v2311_v11  ;;  %v2340_v30 = vld [vmem:[%s3296_s1 + $0x200] ss:$16 sps:$4 sm:$0xff]   ;;  %v2341_v31 = vld [vmem:[%s3296_s1 + $0x208] ss:$16 sps:$4 sm:$0xff]   ;;  %v2342_v32 = vld [vmem:[%s3296_s1 + $0x3e4] ss:$16 sps:$4 sm:$0xff]  }
  0x16   : > { %781 = vmatprep.subr.bf16.mxu0 %v2312_v12  ;;  %822 = vmatprep.subr.bf16.mxu1 %v2314_v13  ;;  %v2344_v33 = vld [vmem:[%s3296_s1 + $0x3ec] ss:$16 sps:$4 sm:$0xff]   ;;  %v2346_v34 = vld [vmem:[%s3296_s1 + $0x3e0] ss:$16 sps:$4 sm:$0xff]   ;;  %v2347_v35 = vld [vmem:[%s3296_s1 + $0x3e8] ss:$16 sps:$4 sm:$0xff]  }
  0x17   : > { %v2348_v37 = vld [vmem:[%s3296_s1 + $0x3c4] ss:$16 sps:$4 sm:$0xff]   ;;  %s3305_s22 = smov (!%p250_p3, %s1933_s22), 1  ;;  %v2350_v38 = vld [vmem:[%s3296_s1 + $0x3cc] ss:$16 sps:$4 sm:$0xff]   ;;  %v2757_v40 = vshrl.u32 %v269_v36, 7 }
  0x18   : > { %v2352_v39 = vld [vmem:[%s3296_s1 + $0x3c0] ss:$16 sps:$4 sm:$0xff]   ;;  %v2353_v41 = vld [vmem:[%s3296_s1 + $0x3c8] ss:$16 sps:$4 sm:$0xff]   ;;  %v2354_v42 = vld [vmem:[%s3296_s1 + $0x3a4] ss:$16 sps:$4 sm:$0xff]  }
  0x19   : > { %782 = vmatpush1.bf16.msra.mxu0 %v2316_v14  ;;  %823 = vmatpush1.bf16.msra.mxu1 %v2317_v15  ;;  %s2282_s15 = sshll.u32 %s3305_s22, 4  ;;  %v2356_v43 = vld [vmem:[%s3296_s1 + $0x3ac] ss:$16 sps:$4 sm:$0xff]   ;;  %v2358_v44 = vld [vmem:[%s3296_s1 + $0x3a0] ss:$16 sps:$4 sm:$0xff]   ;;  %v2782_v47 = vsub.s32 0, %v2757_v40 }
  0x1a   : > { %783 = vmatprep.subr.bf16.mxu0 %v2318_v16  ;;  %824 = vmatprep.subr.bf16.mxu1 %v2320_v17  ;;  %v2359_v45 = vld [vmem:[%s3296_s1 + $0x3a8] ss:$16 sps:$4 sm:$0xff]   ;;  %s254_s26 = scalar_lea.vmem %s3295_s0, %s2282_s15  ;;  %v2360_v46 = vld [vmem:[%s3296_s1 + $0x384] ss:$16 sps:$4 sm:$0xff]   ;;  %v2785_v48 = vsub.s32 1, %v2757_v40  ;;  %vm303_vm0 = vcmask 1040384  }
  0x1b   : > { %v2362_v49 = vld [vmem:[%s3296_s1 + $0x38c] ss:$16 sps:$4 sm:$0xff]   ;;  %v2364_v50 = vld [vmem:[%s3296_s1 + $0x380] ss:$16 sps:$4 sm:$0xff]   ;;  %v2365_v51 = vld [vmem:[%s3296_s1 + $0x388] ss:$16 sps:$4 sm:$0xff]  }
  0x1c   : > { %v265_v52 = vld [vmem:[%s254_s26] sm:$0xff]  ;;  %v266_v53 = vld [vmem:[%s254_s26 + $0x8] sm:$0xff]  ;;  %vm2136_vm1 = vmneg %vm303_vm0  ;;  %s2283_s19 = sshll.u32 %s3305_s22, 5  ;;  %s2284_s25 = sshll.u32 %s3305_s22, 3 }
  0x1d   : > { %784 = vmatpush1.bf16.msra.mxu0 %v2322_v18  ;;  %825 = vmatpush1.bf16.msra.mxu1 %v2323_v19  ;;  %v267_v54 = vld [vmem:[%s3298_s3] sm:$0x3]  ;;  %v2366_v56 = vld [vmem:[%s3296_s1 + $0x364] ss:$16 sps:$4 sm:$0xff]   ;;  %v2368_v60 = vld [vmem:[%s3296_s1 + $0x36c] ss:$16 sps:$4 sm:$0xff]   ;;  %s259_s24 = scalar_lea.vmem %s3300_s5, %s2283_s19  ;;  %s264_s28 = scalar_lea.vmem %s3301_s6, %s2284_s25 }
  0x1e   : > { %785 = vmatprep.subr.bf16.mxu0 %v2324_v20  ;;  %826 = vmatprep.subr.bf16.mxu1 %v2326_v21  ;;  %v281_v55 = vld [vmem:[%s3299_s4] sm:$0x3]  ;;  %v272_v57 = vrot.slane %v267_v54, %v2782_v47  ;;  %v276_v58 = vrot.slane %v267_v54, %v2785_v48  ;;  %v2371_v1 = vld [vmem:[%s3296_s1 + $0x368] ss:$16 sps:$4 sm:$0xff]   ;;  %v2372_v2 = vld [vmem:[%s3296_s1 + $0x344] ss:$16 sps:$4 sm:$0xff]  }
  0x1f   : > { %v286_v59 = vrot.slane %v281_v55, %v2782_v47  ;;  %v290_v61 = vrot.slane %v281_v55, %v2785_v48  ;;  %v2370_v0 = vld [vmem:[%s3296_s1 + $0x360] ss:$16 sps:$4 sm:$0xff]   ;;  %v2374_v5 = vld [vmem:[%s3296_s1 + $0x34c] ss:$16 sps:$4 sm:$0xff]   ;;  %v2377_v9 = vld [vmem:[%s3296_s1 + $0x348] ss:$16 sps:$4 sm:$0xff]  }
  0x20   : > { %v280_v62 = vmul.f32 %v276_v58, %v266_v53  ;;  %v279_v63 = vmul.f32 %v272_v57, %v265_v52  ;;  %v2376_v8 = vld [vmem:[%s3296_s1 + $0x340] ss:$16 sps:$4 sm:$0xff]   ;;  %v2378_v12 = vld [vmem:[%s3296_s1 + $0x324] ss:$16 sps:$4 sm:$0xff]   ;;  %v2380_v13 = vld [vmem:[%s3296_s1 + $0x32c] ss:$16 sps:$4 sm:$0xff]  }
  0x21   : > { %786 = vmatpush1.bf16.msra.mxu0 %v2328_v22  ;;  %827 = vmatpush1.bf16.msra.mxu1 %v2329_v23  ;;  %v2382_v18 = vld [vmem:[%s3296_s1 + $0x320] ss:$16 sps:$4 sm:$0xff]   ;;  %v2383_v19 = vld [vmem:[%s3296_s1 + $0x328] ss:$16 sps:$4 sm:$0xff]   ;;  %v2384_v22 = vld [vmem:[%s3296_s1 + $0x304] ss:$16 sps:$4 sm:$0xff]  }
  0x22   : > { %787 = vmatprep.subr.bf16.mxu0 %v2330_v24  ;;  %828 = vmatprep.subr.bf16.mxu1 %v2332_v25  ;;  %v294_v3 = vadd.f32 %v290_v61, %v280_v62  ;;  %v293_v4 = vadd.f32 %v286_v59, %v279_v63  ;;  %v2386_v23 = vld [vmem:[%s3296_s1 + $0x30c] ss:$16 sps:$4 sm:$0xff]   ;;  %vm2896_vm2 = vmpackc.low %vm303_vm0, %vm2136_vm1  ;;  %v2408_v53 = vld [vmem:[%s3296_s1 + $0x80] ss:$16 sps:$4 sm:$0xff]  }
  0x23   : > { %v2413_v52 = vld [vmem:[%s3296_s1 + $0x8c] ss:$16 sps:$4 sm:$0xff]   ;;  %v2411_v54 = vld [vmem:[%s3296_s1 + $0x88] ss:$16 sps:$4 sm:$0xff]   ;;  %v2416_v55 = vld [vmem:[%s3296_s1 + $0x64] ss:$16 sps:$4 sm:$0xff]  }
  0x24   : > { %v296_v6 = vmax.f32 %v294_v3, 0.0  ;;  %v295_v7 = vmax.f32 %v293_v4, 0.0  ;;  %v2414_v57 = vld [vmem:[%s3296_s1 + $0x60] ss:$16 sps:$4 sm:$0xff]   ;;  %v2417_v58 = vld [vmem:[%s3296_s1 + $0x68] ss:$16 sps:$4 sm:$0xff]  }
  0x25   : > { %788 = vmatpush1.bf16.msra.mxu0 %v2334_v26  ;;  %829 = vmatpush1.bf16.msra.mxu1 %v2335_v27  ;;  %v2388_v27 = vld [vmem:[%s3296_s1 + $0x300] ss:$16 sps:$4 sm:$0xff]   ;;  %v2422_v59 = vld [vmem:[%s3296_s1 + $0x44] ss:$16 sps:$4 sm:$0xff]   ;;  %v2423_v62 = vld [vmem:[%s3296_s1 + $0x48] ss:$16 sps:$4 sm:$0xff]  }
  0x26   : > { %789 = vmatprep.subr.bf16.mxu0 %v2336_v28  ;;  %830 = vmatprep.subr.bf16.mxu1 %v2338_v29  ;;  %v300_v10 = vrot.slane %v296_v6, 7  ;;  %v2830_v11 = vrot.slane %v295_v7, 7  ;;  %v2389_v28 = vld [vmem:[%s3296_s1 + $0x308] ss:$16 sps:$4 sm:$0xff]   ;;  %v2420_v61 = vld [vmem:[%s3296_s1 + $0x40] ss:$16 sps:$4 sm:$0xff]  }
  0x27   : > { %v2428_v63 = vld [vmem:[%s3296_s1 + $0x24] ss:$16 sps:$4 sm:$0xff]   ;;  %v2437_v4 = vld [vmem:[%s3296_s1 + $0xc] ss:$16 sps:$4 sm:$0xff]   ;;  %v2435_v6 = vld [vmem:[%s3296_s1 + $0x8] ss:$16 sps:$4 sm:$0xff]  }
  0x28   : > { %v305_v14 = vsel %vm303_vm0, 0.0, %v300_v10  ;;  %v307_v15 = vsel %vm303_vm0, %v300_v10, 0.0  ;;  %v304_v16 = vsel %vm303_vm0, 0.0, %v2830_v11  ;;  %v306_v17 = vsel %vm303_vm0, %v2830_v11, 0.0  ;;  %v2434_v3 = vld [vmem:[%s3296_s1 + $0x4] ss:$16 sps:$4 sm:$0xff]  }
  0x29   : > { %790 = vmatpush1.bf16.msra.mxu0 %v2340_v30  ;;  %831 = vmatpush1.bf16.msra.mxu1 %v2341_v31  ;;  %v2850_v20 = vpack.c.bf16 %v307_v15, %v305_v14  ;;  %v2852_v21 = vpack.c.bf16 %v306_v17, %v304_v16  ;;  %v2440_v7 = vld [vmem:[%s3296_s1 + $0x1e4] ss:$16 sps:$4 sm:$0xff]   ;;  %v2444_v14 = vld [vmem:[%s3296_s1 + $0x1c0] ss:$16 sps:$4 sm:$0xff]   ;;  %v2447_v15 = vld [vmem:[%s3296_s1 + $0x1c8] ss:$16 sps:$4 sm:$0xff]  }
  0x2a   : > { %791 = vmatprep.subr.bf16.mxu0 %v2342_v32  ;;  %832 = vmatprep.subr.bf16.mxu1 %v2344_v33  ;;  %v2392_v32 = vld [vmem:[%s3296_s1 + $0xe4] ss:$16 sps:$4 sm:$0xff]   ;;  %v2455_v17 = vld [vmem:[%s3296_s1 + $0x1ac] ss:$16 sps:$4 sm:$0xff]  }
  0x2b   : > { %v447_v24 = vshrl.u32 %v2850_v20, 16  ;;  %v449_v25 = vshll.u32 %v2850_v20, 16  ;;  %v442_v26 = vshll.u32 %v2852_v21, 16  ;;  %v440_v30 = vshrl.u32 %v2852_v21, 16  ;;  %v2452_v16 = vld [vmem:[%s3296_s1 + $0x1a4] ss:$16 sps:$4 sm:$0xff]  }
  0x2d   : > { %792 = vmatpush2.bf16.msra.mxu0 %v2346_v34  ;;  %833 = vmatpush2.bf16.msra.mxu1 %v2347_v35  ;;  %v451_v29 = vrot.slane %v449_v25, 1  ;;  %v444_v31 = vrot.slane %v442_v26, 1  ;;  %v2395_v34 = vld [vmem:[%s3296_s1 + $0xec] ss:$16 sps:$4 sm:$0xff]   ;;  %v2390_v35 = vld [vmem:[%s3296_s1 + $0xe0] ss:$16 sps:$4 sm:$0xff]  }
  0x2e   : > { %793 = vmatprep.subr.bf16.mxu0 %v2348_v37  ;;  %834 = vmatprep.subr.bf16.mxu1 %v2350_v38  ;;  %v2393_v37 = vld [vmem:[%s3296_s1 + $0xe8] ss:$16 sps:$4 sm:$0xff]   ;;  %v2398_v38 = vld [vmem:[%s3296_s1 + $0xc4] ss:$16 sps:$4 sm:$0xff]  }
  0x2f   : > { %v452_v33 = vor.u32 %v451_v29, %v447_v24  ;;  %v445_v36 = vor.u32 %v444_v31, %v440_v30  ;;  %v2456_v24 = vld [vmem:[%s3296_s1 + $0x180] ss:$16 sps:$4 sm:$0xff]   ;;  %v2459_v25 = vld [vmem:[%s3296_s1 + $0x188] ss:$16 sps:$4 sm:$0xff]   ;;  %v2464_v26 = vld [vmem:[%s3296_s1 + $0x164] ss:$16 sps:$4 sm:$0xff]  }
  0x30   : > { %v2465_v29 = vld [vmem:[%s3296_s1 + $0x168] ss:$16 sps:$4 sm:$0xff]   ;;  %v2470_v30 = vld [vmem:[%s3296_s1 + $0x144] ss:$16 sps:$4 sm:$0xff]   ;;  %v2473_v31 = vld [vmem:[%s3296_s1 + $0x14c] ss:$16 sps:$4 sm:$0xff]  }
  0x31   : > { %794 = vmatpush2.bf16.msra.mxu0 %v2352_v39  ;;  %835 = vmatpush2.bf16.msra.mxu1 %v2353_v41  ;;  %v2401_v39 = vld [vmem:[%s3296_s1 + $0xcc] ss:$16 sps:$4 sm:$0xff]   ;;  %v2396_v41 = vld [vmem:[%s3296_s1 + $0xc0] ss:$16 sps:$4 sm:$0xff]  }
  0x32   : > { %795 = vmatprep.subr.bf16.mxu0 %v2354_v42  ;;  %836 = vmatprep.subr.bf16.mxu1 %v2356_v43  ;;  %v2138_v42 = vpack.c.bf16 %v300_v10, %v300_v10  ;;  %v2399_v43 = vld [vmem:[%s3296_s1 + $0xc8] ss:$16 sps:$4 sm:$0xff]  }
  0x33   : > { %807 = vmatprep.mubr.bf16.mxu0 %v452_v33  ;;  %848 = vmatprep.mubr.bf16.mxu1 %v452_v33  ;;  %v2441_v10 = vld [vmem:[%s3296_s1 + $0x1e8] ss:$16 sps:$4 sm:$0xff]  }
  0x34   : > { %v2471_v33 = vld [vmem:[%s3296_s1 + $0x148] ss:$16 sps:$4 sm:$0xff]  }
  0x35   : > { %796 = vmatpush2.bf16.msra.mxu0 %v2358_v44  ;;  %837 = vmatpush2.bf16.msra.mxu1 %v2359_v45  ;;  %v2404_v45 = vld [vmem:[%s3296_s1 + $0xa4] ss:$16 sps:$4 sm:$0xff]   ;;  %v2503_v44 = vld [vmem:[%s3296_s1 + $0x4ac] ss:$16 sps:$4 sm:$0xff]  }
  0x36   : > { %797 = vmatprep.subr.bf16.mxu0 %v2360_v46  ;;  %838 = vmatprep.subr.bf16.mxu1 %v2362_v49  ;;  %v2407_v46 = vld [vmem:[%s3296_s1 + $0xac] ss:$16 sps:$4 sm:$0xff]   ;;  %v2402_v49 = vld [vmem:[%s3296_s1 + $0xa0] ss:$16 sps:$4 sm:$0xff]  }
  0x39   : > { %798 = vmatpush2.bf16.msra.mxu0 %v2364_v50  ;;  %839 = vmatpush2.bf16.msra.mxu1 %v2365_v51  ;;  %v2405_v50 = vld [vmem:[%s3296_s1 + $0xa8] ss:$16 sps:$4 sm:$0xff]   ;;  %v2410_v51 = vld [vmem:[%s3296_s1 + $0x84] ss:$16 sps:$4 sm:$0xff]  }
  0x3a   : > { %799 = vmatprep.subr.bf16.mxu0 %v2366_v56  ;;  %840 = vmatprep.subr.bf16.mxu1 %v2368_v60  ;;  %v2419_v56 = vld [vmem:[%s3296_s1 + $0x6c] ss:$16 sps:$4 sm:$0xff]  }
  0x3b   : > { %v2425_v60 = vld [vmem:[%s3296_s1 + $0x4c] ss:$16 sps:$4 sm:$0xff]  }
  0x3d   : > { %800 = vmatpush2.bf16.msra.mxu0 %v2370_v0  ;;  %841 = vmatpush2.bf16.msra.mxu1 %v2371_v1  ;;  %v2431_v0 = vld [vmem:[%s3296_s1 + $0x2c] ss:$16 sps:$4 sm:$0xff]   ;;  %v2426_v1 = vld [vmem:[%s3296_s1 + $0x20] ss:$16 sps:$4 sm:$0xff]  }
  0x3e   : > { %801 = vmatprep.subr.bf16.mxu0 %v2372_v2  ;;  %842 = vmatprep.subr.bf16.mxu1 %v2374_v5  ;;  %v2429_v2 = vld [vmem:[%s3296_s1 + $0x28] ss:$16 sps:$4 sm:$0xff]   ;;  %v2432_v5 = vld [vmem:[%s3296_s1] ss:$16 sps:$4 sm:$0xff]  }
  0x41   : > { %802 = vmatpush2.bf16.msra.mxu0 %v2376_v8  ;;  %843 = vmatpush2.bf16.msra.mxu1 %v2377_v9  ;;  %v2443_v8 = vld [vmem:[%s3296_s1 + $0x1ec] ss:$16 sps:$4 sm:$0xff]   ;;  %v2438_v9 = vld [vmem:[%s3296_s1 + $0x1e0] ss:$16 sps:$4 sm:$0xff]  }
  0x42   : > { %803 = vmatprep.subr.bf16.mxu0 %v2378_v12  ;;  %844 = vmatprep.subr.bf16.mxu1 %v2380_v13  ;;  %v2446_v12 = vld [vmem:[%s3296_s1 + $0x1c4] ss:$16 sps:$4 sm:$0xff]   ;;  %v2449_v13 = vld [vmem:[%s3296_s1 + $0x1cc] ss:$16 sps:$4 sm:$0xff]  }
  0x45   : > { %804 = vmatpush2.bf16.msra.mxu0 %v2382_v18  ;;  %845 = vmatpush2.bf16.msra.mxu1 %v2383_v19  ;;  %v2450_v18 = vld [vmem:[%s3296_s1 + $0x1a0] ss:$16 sps:$4 sm:$0xff]   ;;  %v2453_v19 = vld [vmem:[%s3296_s1 + $0x1a8] ss:$16 sps:$4 sm:$0xff]  }
  0x46   : > { %805 = vmatprep.subr.bf16.mxu0 %v2384_v22  ;;  %846 = vmatprep.subr.bf16.mxu1 %v2386_v23  ;;  %v2458_v22 = vld [vmem:[%s3296_s1 + $0x184] ss:$16 sps:$4 sm:$0xff]   ;;  %v2461_v23 = vld [vmem:[%s3296_s1 + $0x18c] ss:$16 sps:$4 sm:$0xff]  }
  0x49   : > { %806 = vmatpush2.bf16.msra.mxu0 %v2388_v27  ;;  %847 = vmatpush2.bf16.msra.mxu1 %v2389_v28  ;;  %v2467_v27 = vld [vmem:[%s3296_s1 + $0x16c] ss:$16 sps:$4 sm:$0xff]   ;;  %v2462_v28 = vld [vmem:[%s3296_s1 + $0x160] ss:$16 sps:$4 sm:$0xff]  }
  0x4a   : > { %1177 = vmatprep.subr.bf16.mxu0 %v2392_v32  ;;  %1218 = vmatprep.subr.bf16.mxu1 %v2395_v34  ;;  %v2468_v32 = vld [vmem:[%s3296_s1 + $0x140] ss:$16 sps:$4 sm:$0xff]   ;;  %v2476_v34 = vld [vmem:[%s3296_s1 + $0x124] ss:$16 sps:$4 sm:$0xff]  }
  0x4c   : > { %808 = vmatmul.mubr.bf16.vlgmr.msra.gmra.mxu0 %v445_v36  ;;  %849 = vmatmul.mubr.bf16.vlgmr.msra.gmra.mxu1 %v445_v36  ;;  %v2474_v36 = vld [vmem:[%s3296_s1 + $0x120] ss:$16 sps:$4 sm:$0xff]  }
  0x4d   : > { %1178 = vmatpush1.bf16.msra.mxu0 %v2390_v35  ;;  %1219 = vmatpush1.bf16.msra.mxu1 %v2393_v37  ;;  %v2479_v35 = vld [vmem:[%s3296_s1 + $0x12c] ss:$16 sps:$4 sm:$0xff]   ;;  %v2477_v37 = vld [vmem:[%s3296_s1 + $0x128] ss:$16 sps:$4 sm:$0xff]  }
  0x4e   : > { %1179 = vmatprep.subr.bf16.mxu0 %v2398_v38  ;;  %1220 = vmatprep.subr.bf16.mxu1 %v2401_v39  ;;  %v2482_v38 = vld [vmem:[%s3296_s1 + $0x104] ss:$16 sps:$4 sm:$0xff]   ;;  %v2485_v39 = vld [vmem:[%s3296_s1 + $0x10c] ss:$16 sps:$4 sm:$0xff]  }
  0x4f   : > { %2139 = vmatprep.mubr.msk.bf16.mxu0 %vm2896_vm2, %v2138_v42  ;;  %2147 = vmatprep.mubr.msk.bf16.mxu1 %vm2896_vm2, %v2138_v42  ;;  %v2483_v42 = vld [vmem:[%s3296_s1 + $0x108] ss:$16 sps:$4 sm:$0xff]  }
  0x51   : > { %1180 = vmatpush1.bf16.msra.mxu0 %v2396_v41  ;;  %1221 = vmatpush1.bf16.msra.mxu1 %v2399_v43  ;;  %v2480_v41 = vld [vmem:[%s3296_s1 + $0x100] ss:$16 sps:$4 sm:$0xff]   ;;  %v2488_v43 = vld [vmem:[%s3296_s1 + $0x4e4] ss:$16 sps:$4 sm:$0xff]  }
  0x52   : > { %1181 = vmatprep.subr.bf16.mxu0 %v2404_v45  ;;  %1222 = vmatprep.subr.bf16.mxu1 %v2407_v46  ;;  %v2491_v45 = vld [vmem:[%s3296_s1 + $0x4ec] ss:$16 sps:$4 sm:$0xff]   ;;  %v2142_v46 = vpack.c.bf16 %v2830_v11, %v2830_v11 }
  0x53   : > { %v2497_v11 = vld [vmem:[%s3296_s1 + $0x4cc] ss:$16 sps:$4 sm:$0xff]  }
  0x55   : > { %1182 = vmatpush1.bf16.msra.mxu0 %v2402_v49  ;;  %1223 = vmatpush1.bf16.msra.mxu1 %v2405_v50  ;;  %v2486_v49 = vld [vmem:[%s3296_s1 + $0x4e0] ss:$16 sps:$4 sm:$0xff]   ;;  %v2489_v50 = vld [vmem:[%s3296_s1 + $0x4e8] ss:$16 sps:$4 sm:$0xff]  }
  0x56   : > { %1183 = vmatprep.subr.bf16.mxu0 %v2410_v51  ;;  %1224 = vmatprep.subr.bf16.mxu1 %v2413_v52  ;;  %v2494_v51 = vld [vmem:[%s3296_s1 + $0x4c4] ss:$16 sps:$4 sm:$0xff]   ;;  %v1327_v52 = vrot.slane %v2850_v20, 1 }
  0x57   : > { %v2500_v20 = vld [vmem:[%s3296_s1 + $0x4a4] ss:$16 sps:$4 sm:$0xff]  }
  0x59   : > { %1184 = vmatpush1.bf16.msra.mxu0 %v2408_v53  ;;  %1225 = vmatpush1.bf16.msra.mxu1 %v2411_v54  ;;  %v2492_v53 = vld [vmem:[%s3296_s1 + $0x4c0] ss:$16 sps:$4 sm:$0xff]   ;;  %v2495_v54 = vld [vmem:[%s3296_s1 + $0x4c8] ss:$16 sps:$4 sm:$0xff]  }
  0x5a   : > { %1185 = vmatprep.subr.bf16.mxu0 %v2416_v55  ;;  %1226 = vmatprep.subr.bf16.mxu1 %v2419_v56  ;;  %v2498_v55 = vld [vmem:[%s3296_s1 + $0x4a0] ss:$16 sps:$4 sm:$0xff]   ;;  %v2501_v56 = vld [vmem:[%s3296_s1 + $0x4a8] ss:$16 sps:$4 sm:$0xff]  }
  0x5d   : > { %1186 = vmatpush1.bf16.msra.mxu0 %v2414_v57  ;;  %1227 = vmatpush1.bf16.msra.mxu1 %v2417_v58  ;;  %v2506_v57 = vld [vmem:[%s3296_s1 + $0x484] ss:$16 sps:$4 sm:$0xff]   ;;  %v2509_v58 = vld [vmem:[%s3296_s1 + $0x48c] ss:$16 sps:$4 sm:$0xff]  }
  0x5e   : > { %1187 = vmatprep.subr.bf16.mxu0 %v2422_v59  ;;  %1228 = vmatprep.subr.bf16.mxu1 %v2425_v60  ;;  %v2504_v59 = vld [vmem:[%s3296_s1 + $0x480] ss:$16 sps:$4 sm:$0xff]   ;;  %v2507_v60 = vld [vmem:[%s3296_s1 + $0x488] ss:$16 sps:$4 sm:$0xff]  }
  0x61   : > { %1188 = vmatpush1.bf16.msra.mxu0 %v2420_v61  ;;  %1229 = vmatpush1.bf16.msra.mxu1 %v2423_v62  ;;  %v2512_v61 = vld [vmem:[%s3296_s1 + $0x464] ss:$16 sps:$4 sm:$0xff]   ;;  %v2515_v62 = vld [vmem:[%s3296_s1 + $0x46c] ss:$16 sps:$4 sm:$0xff]  }
  0x62   : > { %1189 = vmatprep.subr.bf16.mxu0 %v2428_v63  ;;  %1230 = vmatprep.subr.bf16.mxu1 %v2431_v0  ;;  %v2510_v63 = vld [vmem:[%s3296_s1 + $0x460] ss:$16 sps:$4 sm:$0xff]   ;;  %v2513_v0 = vld [vmem:[%s3296_s1 + $0x468] ss:$16 sps:$4 sm:$0xff]  }
  0x65   : > { %1190 = vmatpush1.bf16.msra.mxu0 %v2426_v1  ;;  %1231 = vmatpush1.bf16.msra.mxu1 %v2429_v2  ;;  %v2518_v1 = vld [vmem:[%s3296_s1 + $0x444] ss:$16 sps:$4 sm:$0xff]   ;;  %v2521_v2 = vld [vmem:[%s3296_s1 + $0x44c] ss:$16 sps:$4 sm:$0xff]  }
  0x66   : > { %1191 = vmatprep.subr.bf16.mxu0 %v2434_v3  ;;  %1232 = vmatprep.subr.bf16.mxu1 %v2437_v4  ;;  %v2516_v3 = vld [vmem:[%s3296_s1 + $0x440] ss:$16 sps:$4 sm:$0xff]   ;;  %v2519_v4 = vld [vmem:[%s3296_s1 + $0x448] ss:$16 sps:$4 sm:$0xff]  }
  0x69   : > { %1192 = vmatpush1.bf16.msra.mxu0 %v2432_v5  ;;  %1233 = vmatpush1.bf16.msra.mxu1 %v2435_v6  ;;  %v2524_v5 = vld [vmem:[%s3296_s1 + $0x424] ss:$16 sps:$4 sm:$0xff]   ;;  %v2527_v6 = vld [vmem:[%s3296_s1 + $0x42c] ss:$16 sps:$4 sm:$0xff]  }
  0x6a   : > { %1193 = vmatprep.subr.bf16.mxu0 %v2440_v7  ;;  %1234 = vmatprep.subr.bf16.mxu1 %v2443_v8  ;;  %v2522_v7 = vld [vmem:[%s3296_s1 + $0x420] ss:$16 sps:$4 sm:$0xff]   ;;  %v2525_v8 = vld [vmem:[%s3296_s1 + $0x428] ss:$16 sps:$4 sm:$0xff]  }
  0x6d   : > { %1194 = vmatpush2.bf16.msra.mxu0 %v2438_v9  ;;  %1235 = vmatpush2.bf16.msra.mxu1 %v2441_v10  ;;  %v2530_v9 = vld [vmem:[%s3296_s1 + $0x404] ss:$16 sps:$4 sm:$0xff]   ;;  %v2533_v10 = vld [vmem:[%s3296_s1 + $0x40c] ss:$16 sps:$4 sm:$0xff]  }
  0x6e   : > { %1195 = vmatprep.subr.bf16.mxu0 %v2446_v12  ;;  %1236 = vmatprep.subr.bf16.mxu1 %v2449_v13  ;;  %v2528_v12 = vld [vmem:[%s3296_s1 + $0x400] ss:$16 sps:$4 sm:$0xff]   ;;  %v2531_v13 = vld [vmem:[%s3296_s1 + $0x408] ss:$16 sps:$4 sm:$0xff]  }
  0x71   : > { %1196 = vmatpush2.bf16.msra.mxu0 %v2444_v14  ;;  %1237 = vmatpush2.bf16.msra.mxu1 %v2447_v15  ;;  %v2536_v14 = vld [vmem:[%s3296_s1 + $0x5e4] ss:$16 sps:$4 sm:$0xff]   ;;  %v2539_v15 = vld [vmem:[%s3296_s1 + $0x5ec] ss:$16 sps:$4 sm:$0xff]  }
  0x72   : > { %1197 = vmatprep.subr.bf16.mxu0 %v2452_v16  ;;  %1238 = vmatprep.subr.bf16.mxu1 %v2455_v17  ;;  %v2534_v16 = vld [vmem:[%s3296_s1 + $0x5e0] ss:$16 sps:$4 sm:$0xff]   ;;  %v2537_v17 = vld [vmem:[%s3296_s1 + $0x5e8] ss:$16 sps:$4 sm:$0xff]  }
  0x75   : > { %1198 = vmatpush2.bf16.msra.mxu0 %v2450_v18  ;;  %1239 = vmatpush2.bf16.msra.mxu1 %v2453_v19  ;;  %v2542_v18 = vld [vmem:[%s3296_s1 + $0x5c4] ss:$16 sps:$4 sm:$0xff]   ;;  %v2545_v19 = vld [vmem:[%s3296_s1 + $0x5cc] ss:$16 sps:$4 sm:$0xff]  }
  0x76   : > { %1199 = vmatprep.subr.bf16.mxu0 %v2458_v22  ;;  %1240 = vmatprep.subr.bf16.mxu1 %v2461_v23  ;;  %v2540_v22 = vld [vmem:[%s3296_s1 + $0x5c0] ss:$16 sps:$4 sm:$0xff]   ;;  %v2543_v23 = vld [vmem:[%s3296_s1 + $0x5c8] ss:$16 sps:$4 sm:$0xff]  }
  0x79   : > { %1200 = vmatpush2.bf16.msra.mxu0 %v2456_v24  ;;  %1241 = vmatpush2.bf16.msra.mxu1 %v2459_v25  ;;  %v2548_v24 = vld [vmem:[%s3296_s1 + $0x5a4] ss:$16 sps:$4 sm:$0xff]   ;;  %v2551_v25 = vld [vmem:[%s3296_s1 + $0x5ac] ss:$16 sps:$4 sm:$0xff]  }
  0x7a   : > { %1201 = vmatprep.subr.bf16.mxu0 %v2464_v26  ;;  %1242 = vmatprep.subr.bf16.mxu1 %v2467_v27  ;;  %v2546_v26 = vld [vmem:[%s3296_s1 + $0x5a0] ss:$16 sps:$4 sm:$0xff]   ;;  %v2549_v27 = vld [vmem:[%s3296_s1 + $0x5a8] ss:$16 sps:$4 sm:$0xff]  }
  0x7d   : > { %1202 = vmatpush2.bf16.msra.mxu0 %v2462_v28  ;;  %1243 = vmatpush2.bf16.msra.mxu1 %v2465_v29  ;;  %v2554_v28 = vld [vmem:[%s3296_s1 + $0x584] ss:$16 sps:$4 sm:$0xff]   ;;  %v2557_v29 = vld [vmem:[%s3296_s1 + $0x58c] ss:$16 sps:$4 sm:$0xff]  }
  0x7e   : > { %1203 = vmatprep.subr.bf16.mxu0 %v2470_v30  ;;  %1244 = vmatprep.subr.bf16.mxu1 %v2473_v31  ;;  %v2552_v30 = vld [vmem:[%s3296_s1 + $0x580] ss:$16 sps:$4 sm:$0xff]   ;;  %v2555_v31 = vld [vmem:[%s3296_s1 + $0x588] ss:$16 sps:$4 sm:$0xff]  }
  0x81   : > { %1204 = vmatpush2.bf16.msra.mxu0 %v2468_v32  ;;  %1245 = vmatpush2.bf16.msra.mxu1 %v2471_v33  ;;  %v2560_v32 = vld [vmem:[%s3296_s1 + $0x564] ss:$16 sps:$4 sm:$0xff]   ;;  %v2563_v33 = vld [vmem:[%s3296_s1 + $0x56c] ss:$16 sps:$4 sm:$0xff]  }
  0x82   : > { %1205 = vmatprep.subr.bf16.mxu0 %v2476_v34  ;;  %1246 = vmatprep.subr.bf16.mxu1 %v2479_v35  ;;  %v2558_v34 = vld [vmem:[%s3296_s1 + $0x560] ss:$16 sps:$4 sm:$0xff]   ;;  %v2561_v35 = vld [vmem:[%s3296_s1 + $0x568] ss:$16 sps:$4 sm:$0xff]  }
  0x85   : > { %1206 = vmatpush2.bf16.msra.mxu0 %v2474_v36  ;;  %1247 = vmatpush2.bf16.msra.mxu1 %v2477_v37  ;;  %v2566_v36 = vld [vmem:[%s3296_s1 + $0x544] ss:$16 sps:$4 sm:$0xff]   ;;  %v2569_v37 = vld [vmem:[%s3296_s1 + $0x54c] ss:$16 sps:$4 sm:$0xff]  }
  0x86   : > { %1207 = vmatprep.subr.bf16.mxu0 %v2482_v38  ;;  %1248 = vmatprep.subr.bf16.mxu1 %v2485_v39  ;;  %v2564_v38 = vld [vmem:[%s3296_s1 + $0x540] ss:$16 sps:$4 sm:$0xff]   ;;  %v2567_v39 = vld [vmem:[%s3296_s1 + $0x548] ss:$16 sps:$4 sm:$0xff]  }
  0x89   : > { %1208 = vmatpush2.bf16.msra.mxu0 %v2480_v41  ;;  %1249 = vmatpush2.bf16.msra.mxu1 %v2483_v42  ;;  %v2572_v41 = vld [vmem:[%s3296_s1 + $0x524] ss:$16 sps:$4 sm:$0xff]   ;;  %v2575_v42 = vld [vmem:[%s3296_s1 + $0x52c] ss:$16 sps:$4 sm:$0xff]  }
  0x8a   : > { %1650 = vmatprep.subr.bf16.mxu0 %v2488_v43  ;;  %1691 = vmatprep.subr.bf16.mxu1 %v2491_v45  ;;  %v2570_v43 = vld [vmem:[%s3296_s1 + $0x520] ss:$16 sps:$4 sm:$0xff]   ;;  %v2573_v45 = vld [vmem:[%s3296_s1 + $0x528] ss:$16 sps:$4 sm:$0xff]  }
  0x8c   : > { %2143 = vmatmul.mubr.msk.bf16.vlgmr.msra.gmra.mxu0 %vm2896_vm2, %v2142_v46  ;;  %2151 = vmatmul.mubr.msk.bf16.vlgmr.msra.gmra.mxu1 %vm2896_vm2, %v2142_v46  ;;  %v2578_v46 = vld [vmem:[%s3296_s1 + $0x504] ss:$16 sps:$4 sm:$0xff]  }
  0x8d   : > { %1651 = vmatpush1.bf16.msra.mxu0 %v2486_v49  ;;  %1692 = vmatpush1.bf16.msra.mxu1 %v2489_v50  ;;  %v2581_v49 = vld [vmem:[%s3296_s1 + $0x50c] ss:$16 sps:$4 sm:$0xff]   ;;  %v2576_v50 = vld [vmem:[%s3296_s1 + $0x500] ss:$16 sps:$4 sm:$0xff]  }
  0x8e   : > { %1652 = vmatprep.subr.bf16.mxu0 %v2494_v51  ;;  %1693 = vmatprep.subr.bf16.mxu1 %v2497_v11  ;;  %v2579_v51 = vld [vmem:[%s3296_s1 + $0x508] ss:$16 sps:$4 sm:$0xff]   ;;  %v1326_v11 = vrot.slane %v2852_v21, 1 }
  0x8f   : > { %1682 = vmatprep.mubr.bf16.mxu0 %v1327_v52  ;;  %1723 = vmatprep.mubr.bf16.mxu1 %v1327_v52 }
  0x91   : > { %1653 = vmatpush1.bf16.msra.mxu0 %v2492_v53  ;;  %1694 = vmatpush1.bf16.msra.mxu1 %v2495_v54 }
  0x92   : > { %1654 = vmatprep.subr.bf16.mxu0 %v2500_v20  ;;  %1695 = vmatprep.subr.bf16.mxu1 %v2503_v44 }
  0x95   : > { %1655 = vmatpush1.bf16.msra.mxu0 %v2498_v55  ;;  %1696 = vmatpush1.bf16.msra.mxu1 %v2501_v56 }
  0x96   : > { %1656 = vmatprep.subr.bf16.mxu0 %v2506_v57  ;;  %1697 = vmatprep.subr.bf16.mxu1 %v2509_v58 }
  0x99   : > { %1657 = vmatpush1.bf16.msra.mxu0 %v2504_v59  ;;  %1698 = vmatpush1.bf16.msra.mxu1 %v2507_v60 }
  0x9a   : > { %1658 = vmatprep.subr.bf16.mxu0 %v2512_v61  ;;  %1699 = vmatprep.subr.bf16.mxu1 %v2515_v62 }
  0x9d   : > { %1659 = vmatpush1.bf16.msra.mxu0 %v2510_v63  ;;  %1700 = vmatpush1.bf16.msra.mxu1 %v2513_v0 }
  0x9e   : > { %1660 = vmatprep.subr.bf16.mxu0 %v2518_v1  ;;  %1701 = vmatprep.subr.bf16.mxu1 %v2521_v2  ;;  %v1748_v1 = vsub.s32 2, %v2757_v40  ;;  %v1736_v2 = vld [vmem:[%s3297_s2] sm:$0xf] }
  0xa1   : > { %1661 = vmatpush1.bf16.msra.mxu0 %v2516_v3  ;;  %1702 = vmatpush1.bf16.msra.mxu1 %v2519_v4  ;;  %v1752_v3 = vsub.s32 3, %v2757_v40 }
  0xa2   : > { %1662 = vmatprep.subr.bf16.mxu0 %v2524_v5  ;;  %1703 = vmatprep.subr.bf16.mxu1 %v2527_v6  ;;  %v1741_v6 = vrot.slane %v1736_v2, %v2782_v47 }
  0xa5   : > { %1663 = vmatpush1.bf16.msra.mxu0 %v2522_v7  ;;  %1704 = vmatpush1.bf16.msra.mxu1 %v2525_v8  ;;  %v1749_v7 = vrot.slane %v1736_v2, %v1748_v1 }
  0xa6   : > { %1664 = vmatprep.subr.bf16.mxu0 %v2530_v9  ;;  %1705 = vmatprep.subr.bf16.mxu1 %v2533_v10 }
  0xa9   : > { %1665 = vmatpush1.bf16.msra.mxu0 %v2528_v12  ;;  %1706 = vmatpush1.bf16.msra.mxu1 %v2531_v13 }
  0xaa   : > { %1666 = vmatprep.subr.bf16.mxu0 %v2536_v14  ;;  %1707 = vmatprep.subr.bf16.mxu1 %v2539_v15 }
  0xad   : > { %1667 = vmatpush2.bf16.msra.mxu0 %v2534_v16  ;;  %1708 = vmatpush2.bf16.msra.mxu1 %v2537_v17  ;;  %v1745_v16 = vrot.slane %v1736_v2, %v2785_v48 }
  0xae   : > { %1668 = vmatprep.subr.bf16.mxu0 %v2542_v18  ;;  %1709 = vmatprep.subr.bf16.mxu1 %v2545_v19  ;;  %v1753_v18 = vrot.slane %v1736_v2, %v1752_v3 }
  0xb1   : > { %1669 = vmatpush2.bf16.msra.mxu0 %v2540_v22  ;;  %1710 = vmatpush2.bf16.msra.mxu1 %v2543_v23 }
  0xb2   : > { %1670 = vmatprep.subr.bf16.mxu0 %v2548_v24  ;;  %1711 = vmatprep.subr.bf16.mxu1 %v2551_v25 }
  0xb5   : > { %1671 = vmatpush2.bf16.msra.mxu0 %v2546_v26  ;;  %1712 = vmatpush2.bf16.msra.mxu1 %v2549_v27 }
  0xb6   : > { %1672 = vmatprep.subr.bf16.mxu0 %v2554_v28  ;;  %1713 = vmatprep.subr.bf16.mxu1 %v2557_v29 }
  0xb9   : > { %1673 = vmatpush2.bf16.msra.mxu0 %v2552_v30  ;;  %1714 = vmatpush2.bf16.msra.mxu1 %v2555_v31 }
  0xba   : > { %1674 = vmatprep.subr.bf16.mxu0 %v2560_v32  ;;  %1715 = vmatprep.subr.bf16.mxu1 %v2563_v33 }
  0xbd   : > { %1675 = vmatpush2.bf16.msra.mxu0 %v2558_v34  ;;  %1716 = vmatpush2.bf16.msra.mxu1 %v2561_v35 }
  0xbe   : > { %1676 = vmatprep.subr.bf16.mxu0 %v2566_v36  ;;  %1717 = vmatprep.subr.bf16.mxu1 %v2569_v37 }
  0xc1   : > { %1677 = vmatpush2.bf16.msra.mxu0 %v2564_v38  ;;  %1718 = vmatpush2.bf16.msra.mxu1 %v2567_v39 }
  0xc2   : > { %1678 = vmatprep.subr.bf16.mxu0 %v2572_v41  ;;  %1719 = vmatprep.subr.bf16.mxu1 %v2575_v42 }
  0xc5   : > { %1679 = vmatpush2.bf16.msra.mxu0 %v2570_v43  ;;  %1720 = vmatpush2.bf16.msra.mxu1 %v2573_v45 }
  0xc6   : > { %1680 = vmatprep.subr.bf16.mxu0 %v2578_v46  ;;  %1721 = vmatprep.subr.bf16.mxu1 %v2581_v49 }
  0xc9   : > { %1681 = vmatpush2.bf16.msra.mxu0 %v2576_v50  ;;  %1722 = vmatpush2.bf16.msra.mxu1 %v2579_v51 }
  0xcc   : > { %1683 = vmatmul.mubr.bf16.vlgmr.msra.gmra.mxu0 %v1326_v11  ;;  %1724 = vmatmul.mubr.bf16.vlgmr.msra.gmra.mxu1 %v1326_v11 }
 0x10c   : > { %v809_v52 = vpop.f32.mrf.mxu0  ;;  %v850_v53 = vpop.f32.mrf.mxu1 }
 0x10e   : > { %v811_v54 = vpop.f32.mrf.mxu0  ;;  %v852_v20 = vpop.f32.mrf.mxu1 }
 0x110   : > { %v813_v44 = vpop.f32.mrf.mxu0  ;;  %v854_v55 = vpop.f32.mrf.mxu1 }
 0x112   : > { %v814_v56 = vpop.f32.mrf.mxu0  ;;  %v855_v57 = vpop.f32.mrf.mxu1 }
 0x14c   : > { %v1211_v58 = vpop.f32.mrf.mxu0  ;;  %v1252_v59 = vpop.f32.mrf.mxu1 }
 0x14d   : > { %v1212_v4 = vadd.f32 %v1211_v58, %v809_v52  ;;  %v1253_v5 = vadd.f32 %v1252_v59, %v850_v53 }
 0x14e   : > { %v1213_v60 = vpop.f32.mrf.mxu0  ;;  %v1254_v61 = vpop.f32.mrf.mxu1 }
 0x14f   : > { %v1214_v10 = vadd.f32 %v1213_v60, %v811_v54  ;;  %v1255_v12 = vadd.f32 %v1254_v61, %v852_v20  ;;  %v2590_v60 = vmov 1983009808  }
 0x150   : > { %v1215_v62 = vpop.f32.mrf.mxu0  ;;  %v1256_v63 = vpop.f32.mrf.mxu1  ;;  %v1825_v61 = vunpack.c.l.s4 %v2590_v60 }
 0x152   : > { %v1216_v21 = vpop.f32.mrf.mxu0  ;;  %v1257_v0 = vpop.f32.mrf.mxu1 }
 0x18c   : > { %v1684_v8 = vpop.f32.mrf.mxu0  ;;  %v1725_v9 = vpop.f32.mrf.mxu1 }
 0x18d   : > { %v1732_v13 = vadd.f32 %v1684_v8, %v1212_v4  ;;  %v1734_v14 = vadd.f32 %v1725_v9, %v1253_v5  ;;  %v1826_v9 = vunpack.c.0.s8 %v1825_v61 }
 0x18e   : > { %v1686_v15 = vpop.f32.mrf.mxu0  ;;  %v1727_v17 = vpop.f32.mrf.mxu1 }
 0x18f   : > { %v1758_v19 = vadd.f32 %v1741_v6, %v1732_v13  ;;  %v1760_v22 = vadd.f32 %v1749_v7, %v1734_v14  ;;  %v1733_v23 = vadd.f32 %v1686_v15, %v1214_v10  ;;  %v1735_v47 = vadd.f32 %v1727_v17, %v1255_v12 }
 0x190   : > { %v1688_v24 = vpop.f32.mrf.mxu0  ;;  %v1729_v25 = vpop.f32.mrf.mxu1 }
 0x191   : > { %v1762_v26 = vrot.slane %v1758_v19, 4  ;;  %v1786_v27 = vmul.f32 %v1758_v19, %v1758_v19  ;;  %1841 = vst [vmem:[%s259_s24] sm:$0xff] %v1758_v19  ;;  %v1774_v28 = vrot.slane %v1760_v22, 4  ;;  %v1788_v29 = vmul.f32 %v1760_v22, %v1760_v22  ;;  %1843 = vst [vmem:[%s259_s24 + $0x10] sm:$0xff] %v1760_v22 }
 0x192   : > { %v1759_v30 = vadd.f32 %v1745_v16, %v1733_v23  ;;  %v1761_v31 = vadd.f32 %v1753_v18, %v1735_v47  ;;  %v1689_v32 = vpop.f32.mrf.mxu0  ;;  %v1730_v33 = vpop.f32.mrf.mxu1  ;;  %v1829_v23 = vsub.s32 %v1826_v9, %v2757_v40 }
 0x193   : > { %v1763_v34 = vadd.f32 %v1762_v26, %v1758_v19  ;;  %v1790_v48 = vrot.slane %v1786_v27, 4  ;;  %v1775_v35 = vadd.f32 %v1774_v28, %v1760_v22  ;;  %v1802_v36 = vrot.slane %v1788_v29, 4 }
 0x194   : > { %v1768_v37 = vrot.slane %v1759_v30, 4  ;;  %v1787_v38 = vmul.f32 %v1759_v30, %v1759_v30  ;;  %1842 = vst [vmem:[%s259_s24 + $0x8] sm:$0xff] %v1759_v30  ;;  %v1780_v39 = vrot.slane %v1761_v31, 4  ;;  %v1789_v41 = vmul.f32 %v1761_v31, %v1761_v31  ;;  %1844 = vst [vmem:[%s259_s24 + $0x18] sm:$0xff] %v1761_v31 }
 0x195   : > { %v1764_v42 = vrot.slane %v1763_v34, 2  ;;  %v1791_v43 = vadd.f32 %v1790_v48, %v1786_v27  ;;  %v1776_v45 = vrot.slane %v1775_v35, 2  ;;  %v1803_v46 = vadd.f32 %v1802_v36, %v1788_v29 }
 0x196   : > { %v1769_v49 = vadd.f32 %v1768_v37, %v1759_v30  ;;  %v1796_v50 = vrot.slane %v1787_v38, 4  ;;  %v1781_v51 = vadd.f32 %v1780_v39, %v1761_v31  ;;  %v1808_v11 = vrot.slane %v1789_v41, 4 }
 0x197   : > { %v1765_v52 = vadd.f32 %v1764_v42, %v1763_v34  ;;  %v1792_v53 = vrot.slane %v1791_v43, 2  ;;  %v1777_v54 = vadd.f32 %v1776_v45, %v1775_v35  ;;  %v1804_v20 = vrot.slane %v1803_v46, 2 }
 0x198   : > { %v1770_v44 = vrot.slane %v1769_v49, 2  ;;  %v1797_v55 = vadd.f32 %v1796_v50, %v1787_v38  ;;  %v1782_v56 = vrot.slane %v1781_v51, 2  ;;  %v1809_v57 = vadd.f32 %v1808_v11, %v1789_v41 }
 0x199   : > { %v1793_v58 = vadd.f32 %v1792_v53, %v1791_v43  ;;  %v1805_v59 = vadd.f32 %v1804_v20, %v1803_v46  ;;  %v1766_v1 = vrot.slane %v1765_v52, 1  ;;  %v1778_v3 = vrot.slane %v1777_v54, 1 }
 0x19a   : > { %v1771_v62 = vadd.f32 %v1770_v44, %v1769_v49  ;;  %v1798_v63 = vrot.slane %v1797_v55, 2  ;;  %v1783_v21 = vadd.f32 %v1782_v56, %v1781_v51  ;;  %v1810_v0 = vrot.slane %v1809_v57, 2 }
 0x19b   : > { %v1794_v2 = vrot.slane %v1793_v58, 1  ;;  %v1806_v4 = vrot.slane %v1805_v59, 1  ;;  %v1767_v15 = vadd.f32 %v1766_v1, %v1765_v52  ;;  %v1779_v16 = vadd.f32 %v1778_v3, %v1777_v54 }
 0x19c   : > { %v1772_v5 = vrot.slane %v1771_v62, 1  ;;  %v1799_v6 = vadd.f32 %v1798_v63, %v1797_v55  ;;  %v1784_v7 = vrot.slane %v1783_v21, 1  ;;  %v1811_v8 = vadd.f32 %v1810_v0, %v1809_v57 }
 0x19d   : > { %v1795_v10 = vadd.f32 %v1794_v2, %v1793_v58  ;;  %v1807_v12 = vadd.f32 %v1806_v4, %v1805_v59 }
 0x19e   : > { %v1800_v13 = vrot.slane %v1799_v6, 1  ;;  %v1812_v14 = vrot.slane %v1811_v8, 1  ;;  %v1773_v17 = vadd.f32 %v1772_v5, %v1771_v62  ;;  %v1785_v19 = vadd.f32 %v1784_v7, %v1783_v21 }
 0x19f   : > { %v1814_v47 = vsel %vm303_vm0, %v1767_v15, %v1795_v10  ;;  %v1816_v24 = vsel %vm303_vm0, %v1779_v16, %v1807_v12 }
 0x1a0   : > { %v1801_v18 = vadd.f32 %v1800_v13, %v1799_v6  ;;  %v1813_v22 = vadd.f32 %v1812_v14, %v1811_v8 }
 0x1a2   : > { %v1815_v25 = vsel %vm303_vm0, %v1773_v17, %v1801_v18  ;;  %v1817_v26 = vsel %vm303_vm0, %v1785_v19, %v1813_v22 }
 0x1a3   : > { %v1822_v27 = vcombine.low %v1814_v47, %v1815_v25  ;;  %v1823_v28 = vcombine.low %v1816_v24, %v1817_v26 }
 0x1a5   : > { %v1830_v29 = vrot.slane %v1822_v27, %v1829_v23  ;;  %v1837_v30 = vrot.slane %v1823_v28, %v1829_v23 }
 0x1a7   : > { %v1838_v31 = vcombine.low %v1830_v29, %v1837_v30 }
 0x1a9   : > { %1840 = vst [vmem:[%s264_s28] sm:$0xff] %v1838_v31 }
 0x1aa PF: > { %s17_s21 = sadd.s32 1, %s2588_s21  }
 0x1ab   : > { %p14_p4 = scmp.ge.s32.totalorder %s17_s21, 4  }
 0x1ad   :  { %16 = sbr.rel (!%p14_p4) target bundleno = 1 (0x1), region = 84 }

// kernel: down_block3d.7
= control target key start
LH: loop header
LB: loop body
LE: loop exit
PB: predicated region body
PF: predicated region fallthrough
CT: control target
= control target key end

     0   :  { %s819_s18 = smov 0   ;;  %s1041_s0 = inlined_call_operand.vmem [shape: f32[2,8,512], index: 0, kind: input, shape index: {}]   ;;  %s1042_s1 = inlined_call_operand.vmem [shape: f32[1,512], index: 1, kind: input, shape index: {}]   ;;  %s1043_s2 = inlined_call_operand.vmem [shape: f32[1,512], index: 2, kind: input, shape index: {}]   ;;  %s1044_s3 = inlined_call_operand.vmem [shape: f32[4,8], index: 3, kind: input, shape index: {}]   ;;  %s1045_s4 = inlined_call_operand.vmem [shape: f32[512,128], index: 4, kind: input, shape index: {}]   ;;  %s1046_s5 = inlined_call_operand.vmem [shape: f32[2,4,128], index: 5, kind: output, shape index: {}]  }
   0x1 LB: > { %s688_s19 = sadd.s32 4294967295, %s786_s18   ;;  %p692_p0 = scmp.ge.s32.totalorder %s786_s18, 1  ;;  %s786_s18 = sphi %s819_s18, %s15_s18  }
   0x2   : > { %p187_p1 = scmp.lt.s32.totalorder %s786_s18, 3 }
   0x4   : > { %p188_p2 = pnand %p692_p0, %p187_p1 }
   0x5   : > { %p214_p3 = scmp.lt.s32.totalorder (!%p188_p2), %s688_s19, 1 }
   0x6   : > { %191 = sbr.rel (%p188_p2) target bundleno = 423 (0x1a7), region = 40 }
   0xb   : > { %v229_v0 = vlaneseq  ;;  %v788_v1 = vmov 0.0   ;;  %s1048_s19 = smov (!%p214_p3, %s688_s19), 1  ;;  %v227_v3 = vld [vmem:[%s1042_s1] sm:$0xf]  ;;  %vm284_vm0 = vcmask 64512   ;;  %v461_v34 = vld [vmem:[%s1045_s4 + $0xf8] sm:$0xff] }
   0xc   : > { %352 = vmatprep.mubr.f32.mxu0 %v788_v1  ;;  %423 = vmatprep.mubr.f32.mxu1 %v788_v1  ;;  %v253_v4 = vld [vmem:[%s1043_s2] sm:$0xf]  ;;  %s700_s24 = sshll.u32 %s1048_s19, 5  ;;  %v493_v35 = vld [vmem:[%s1045_s4 + $0x1f8] sm:$0xff]  ;;  %v460_v38 = vld [vmem:[%s1045_s4 + $0xf0] sm:$0xff]  ;;  %s695_s20 = sshll.u32 %s1048_s19, 2 }
   0xd   : > { %v230_v2 = vshrl.u32 %v229_v0, 7  ;;  %s218_s27 = scalar_lea.vmem %s1041_s0, %s700_s24  ;;  %v283_v33 = vld [vmem:[%s1044_s3] sm:$0xf]  ;;  %v445_v36 = vld [vmem:[%s1045_s4 + $0x78] sm:$0xff]  ;;  %v492_v39 = vld [vmem:[%s1045_s4 + $0x1f0] sm:$0xff]  ;;  %s222_s23 = scalar_lea.vmem %s1046_s5, %s695_s20 }
   0xe   : > { %v224_v9 = vld [vmem:[%s218_s27 + $0x8] sm:$0xff]  ;;  %v226_v12 = vld [vmem:[%s218_s27 + $0x18] sm:$0xff]  ;;  %v223_v15 = vld [vmem:[%s218_s27] sm:$0xff] }
   0xf   : > { %v235_v5 = vsub.s32 1, %v230_v2  ;;  %v243_v6 = vsub.s32 3, %v230_v2  ;;  %v231_v7 = vsub.s32 0, %v230_v2  ;;  %v239_v8 = vsub.s32 2, %v230_v2  ;;  %v225_v18 = vld [vmem:[%s218_s27 + $0x10] sm:$0xff]  ;;  %v477_v37 = vld [vmem:[%s1045_s4 + $0x178] sm:$0xff] }
  0x10   : > { %v444_v40 = vld [vmem:[%s1045_s4 + $0x70] sm:$0xff]  ;;  %v459_v42 = vld [vmem:[%s1045_s4 + $0xe8] sm:$0xff]  ;;  %v458_v46 = vld [vmem:[%s1045_s4 + $0xe0] sm:$0xff] }
  0x11   : > { %v236_v10 = vrot.slane %v227_v3, %v235_v5  ;;  %v262_v11 = vrot.slane %v253_v4, %v235_v5  ;;  %v244_v13 = vrot.slane %v227_v3, %v243_v6  ;;  %v270_v14 = vrot.slane %v253_v4, %v243_v6  ;;  %v476_v41 = vld [vmem:[%s1045_s4 + $0x170] sm:$0xff]  ;;  %v491_v43 = vld [vmem:[%s1045_s4 + $0x1e8] sm:$0xff]  ;;  %v490_v47 = vld [vmem:[%s1045_s4 + $0x1e0] sm:$0xff] }
  0x12   : > { %v232_v16 = vrot.slane %v227_v3, %v231_v7  ;;  %v258_v17 = vrot.slane %v253_v4, %v231_v7  ;;  %v240_v19 = vrot.slane %v227_v3, %v239_v8  ;;  %v266_v20 = vrot.slane %v253_v4, %v239_v8  ;;  %v443_v44 = vld [vmem:[%s1045_s4 + $0x68] sm:$0xff]  ;;  %v442_v48 = vld [vmem:[%s1045_s4 + $0x60] sm:$0xff]  ;;  %v457_v50 = vld [vmem:[%s1045_s4 + $0xd8] sm:$0xff] }
  0x13   : > { %v250_v21 = vmul.f32 %v236_v10, %v224_v9  ;;  %v252_v22 = vmul.f32 %v244_v13, %v226_v12  ;;  %v475_v45 = vld [vmem:[%s1045_s4 + $0x168] sm:$0xff]  ;;  %v474_v49 = vld [vmem:[%s1045_s4 + $0x160] sm:$0xff]  ;;  %v489_v51 = vld [vmem:[%s1045_s4 + $0x1d8] sm:$0xff] }
  0x14   : > { %v249_v23 = vmul.f32 %v232_v16, %v223_v15  ;;  %v251_v24 = vmul.f32 %v240_v19, %v225_v18  ;;  %v441_v52 = vld [vmem:[%s1045_s4 + $0x58] sm:$0xff]  ;;  %v456_v54 = vld [vmem:[%s1045_s4 + $0xd0] sm:$0xff]  ;;  %v455_v58 = vld [vmem:[%s1045_s4 + $0xc8] sm:$0xff] }
  0x15   : > { %v276_v25 = vadd.f32 %v262_v11, %v250_v21  ;;  %v278_v26 = vadd.f32 %v270_v14, %v252_v22  ;;  %v473_v53 = vld [vmem:[%s1045_s4 + $0x158] sm:$0xff]  ;;  %v488_v55 = vld [vmem:[%s1045_s4 + $0x1d0] sm:$0xff]  ;;  %v487_v59 = vld [vmem:[%s1045_s4 + $0x1c8] sm:$0xff] }
  0x16   : > { %v275_v27 = vadd.f32 %v258_v17, %v249_v23  ;;  %v277_v28 = vadd.f32 %v266_v20, %v251_v24  ;;  %v440_v56 = vld [vmem:[%s1045_s4 + $0x50] sm:$0xff]  ;;  %v439_v60 = vld [vmem:[%s1045_s4 + $0x48] sm:$0xff]  ;;  %v454_v62 = vld [vmem:[%s1045_s4 + $0xc0] sm:$0xff] }
  0x17   : > { %v280_v29 = vmax.f32 %v276_v25, 0.0  ;;  %v282_v30 = vmax.f32 %v278_v26, 0.0  ;;  %v472_v57 = vld [vmem:[%s1045_s4 + $0x150] sm:$0xff]  ;;  %v471_v61 = vld [vmem:[%s1045_s4 + $0x148] sm:$0xff]  ;;  %v486_v63 = vld [vmem:[%s1045_s4 + $0x1c0] sm:$0xff] }
  0x18   : > { %v279_v31 = vmax.f32 %v275_v27, 0.0  ;;  %v281_v32 = vmax.f32 %v277_v28, 0.0  ;;  %v438_v0 = vld [vmem:[%s1045_s4 + $0x40] sm:$0xff]  ;;  %v453_v2 = vld [vmem:[%s1045_s4 + $0xb8] sm:$0xff]  ;;  %v452_v6 = vld [vmem:[%s1045_s4 + $0xb0] sm:$0xff] }
  0x19   : > { %318 = vmatprep.subr.mxu0 %v280_v29  ;;  %389 = vmatprep.subr.mxu1 %v282_v30  ;;  %v470_v1 = vld [vmem:[%s1045_s4 + $0x140] sm:$0xff]  ;;  %v485_v3 = vld [vmem:[%s1045_s4 + $0x1b8] sm:$0xff]  ;;  %v484_v7 = vld [vmem:[%s1045_s4 + $0x1b0] sm:$0xff] }
  0x1a   : > { %319 = vmatpush1.msra.mxu0 %v279_v31  ;;  %390 = vmatpush1.msra.mxu1 %v281_v32  ;;  %v437_v4 = vld [vmem:[%s1045_s4 + $0x38] sm:$0xff]  ;;  %v436_v8 = vld [vmem:[%s1045_s4 + $0x30] sm:$0xff]  ;;  %v451_v10 = vld [vmem:[%s1045_s4 + $0xa8] sm:$0xff] }
  0x1b   : > { %696 = vmatmul.mubr.msk.f32.vlgmr.msra.gmra.mxu0 %vm284_vm0, %v283_v33  ;;  %697 = vmatmul.mubr.msk.f32.vlgmr.msra.gmra.mxu1 %vm284_vm0, %v283_v33  ;;  %v469_v5 = vld [vmem:[%s1045_s4 + $0x138] sm:$0xff]  ;;  %v468_v9 = vld [vmem:[%s1045_s4 + $0x130] sm:$0xff]  ;;  %v483_v11 = vld [vmem:[%s1045_s4 + $0x1a8] sm:$0xff] }
  0x1c   : > { %701 = vmatprep.subr.mxu0 %v461_v34  ;;  %736 = vmatprep.subr.mxu1 %v493_v35  ;;  %v435_v12 = vld [vmem:[%s1045_s4 + $0x28] sm:$0xff]  ;;  %v450_v14 = vld [vmem:[%s1045_s4 + $0xa0] sm:$0xff]  ;;  %v449_v18 = vld [vmem:[%s1045_s4 + $0x98] sm:$0xff] }
  0x1d   : > { %702 = vmatpush3.msra.mxu0 %v445_v36  ;;  %737 = vmatpush3.msra.mxu1 %v477_v37  ;;  %v467_v13 = vld [vmem:[%s1045_s4 + $0x128] sm:$0xff]  ;;  %v482_v15 = vld [vmem:[%s1045_s4 + $0x1a0] sm:$0xff]  ;;  %v481_v19 = vld [vmem:[%s1045_s4 + $0x198] sm:$0xff] }
  0x1e   : > { %703 = vmatprep.subr.mxu0 %v460_v38  ;;  %738 = vmatprep.subr.mxu1 %v492_v39  ;;  %v434_v16 = vld [vmem:[%s1045_s4 + $0x20] sm:$0xff]  ;;  %v433_v20 = vld [vmem:[%s1045_s4 + $0x18] sm:$0xff]  ;;  %v448_v22 = vld [vmem:[%s1045_s4 + $0x90] sm:$0xff] }
  0x1f   : > { %704 = vmatpush3.msra.mxu0 %v444_v40  ;;  %739 = vmatpush3.msra.mxu1 %v476_v41  ;;  %v466_v17 = vld [vmem:[%s1045_s4 + $0x120] sm:$0xff]  ;;  %v465_v21 = vld [vmem:[%s1045_s4 + $0x118] sm:$0xff]  ;;  %v480_v23 = vld [vmem:[%s1045_s4 + $0x190] sm:$0xff] }
  0x20   : > { %705 = vmatprep.subr.mxu0 %v459_v42  ;;  %740 = vmatprep.subr.mxu1 %v491_v43  ;;  %v432_v24 = vld [vmem:[%s1045_s4 + $0x10] sm:$0xff]  ;;  %v447_v26 = vld [vmem:[%s1045_s4 + $0x88] sm:$0xff]  ;;  %v446_v30 = vld [vmem:[%s1045_s4 + $0x80] sm:$0xff] }
  0x21   : > { %706 = vmatpush3.msra.mxu0 %v443_v44  ;;  %741 = vmatpush3.msra.mxu1 %v475_v45  ;;  %v464_v25 = vld [vmem:[%s1045_s4 + $0x110] sm:$0xff]  ;;  %v479_v27 = vld [vmem:[%s1045_s4 + $0x188] sm:$0xff]  ;;  %v478_v31 = vld [vmem:[%s1045_s4 + $0x180] sm:$0xff] }
  0x22   : > { %707 = vmatprep.subr.mxu0 %v458_v46  ;;  %742 = vmatprep.subr.mxu1 %v490_v47  ;;  %v431_v28 = vld [vmem:[%s1045_s4 + $0x8] sm:$0xff]  ;;  %v430_v32 = vld [vmem:[%s1045_s4] sm:$0xff] }
  0x23   : > { %708 = vmatpush3.msra.mxu0 %v442_v48  ;;  %743 = vmatpush3.msra.mxu1 %v474_v49  ;;  %v463_v29 = vld [vmem:[%s1045_s4 + $0x108] sm:$0xff]  ;;  %v462_v33 = vld [vmem:[%s1045_s4 + $0x100] sm:$0xff] }
  0x24   : > { %709 = vmatprep.subr.mxu0 %v457_v50  ;;  %744 = vmatprep.subr.mxu1 %v489_v51 }
  0x25   : > { %710 = vmatpush3.msra.mxu0 %v441_v52  ;;  %745 = vmatpush3.msra.mxu1 %v473_v53 }
  0x26   : > { %711 = vmatprep.subr.mxu0 %v456_v54  ;;  %746 = vmatprep.subr.mxu1 %v488_v55 }
  0x27   : > { %712 = vmatpush3.msra.mxu0 %v440_v56  ;;  %747 = vmatpush3.msra.mxu1 %v472_v57 }
  0x28   : > { %713 = vmatprep.subr.mxu0 %v455_v58  ;;  %748 = vmatprep.subr.mxu1 %v487_v59 }
  0x29   : > { %714 = vmatpush3.msra.mxu0 %v439_v60  ;;  %749 = vmatpush3.msra.mxu1 %v471_v61 }
  0x2a   : > { %715 = vmatprep.subr.mxu0 %v454_v62  ;;  %750 = vmatprep.subr.mxu1 %v486_v63 }
  0x2b   : > { %716 = vmatpush3.msra.mxu0 %v438_v0  ;;  %751 = vmatpush3.msra.mxu1 %v470_v1 }
  0x2c   : > { %717 = vmatprep.subr.mxu0 %v453_v2  ;;  %752 = vmatprep.subr.mxu1 %v485_v3 }
  0x2d   : > { %718 = vmatpush3.msra.mxu0 %v437_v4  ;;  %753 = vmatpush3.msra.mxu1 %v469_v5 }
  0x2e   : > { %719 = vmatprep.subr.mxu0 %v452_v6  ;;  %754 = vmatprep.subr.mxu1 %v484_v7 }
  0x2f   : > { %720 = vmatpush3.msra.mxu0 %v436_v8  ;;  %755 = vmatpush3.msra.mxu1 %v468_v9 }
  0x30   : > { %721 = vmatprep.subr.mxu0 %v451_v10  ;;  %756 = vmatprep.subr.mxu1 %v483_v11 }
  0x31   : > { %722 = vmatpush3.msra.mxu0 %v435_v12  ;;  %757 = vmatpush3.msra.mxu1 %v467_v13 }
  0x32   : > { %723 = vmatprep.subr.mxu0 %v450_v14  ;;  %758 = vmatprep.subr.mxu1 %v482_v15 }
  0x33   : > { %724 = vmatpush3.msra.mxu0 %v434_v16  ;;  %759 = vmatpush3.msra.mxu1 %v466_v17 }
  0x34   : > { %725 = vmatprep.subr.mxu0 %v449_v18  ;;  %760 = vmatprep.subr.mxu1 %v481_v19 }
  0x35   : > { %726 = vmatpush3.msra.mxu0 %v433_v20  ;;  %761 = vmatpush3.msra.mxu1 %v465_v21 }
  0x36   : > { %727 = vmatprep.subr.mxu0 %v448_v22  ;;  %762 = vmatprep.subr.mxu1 %v480_v23 }
  0x37   : > { %728 = vmatpush3.msra.mxu0 %v432_v24  ;;  %763 = vmatpush3.msra.mxu1 %v464_v25 }
  0x38   : > { %729 = vmatprep.subr.mxu0 %v447_v26  ;;  %764 = vmatprep.subr.mxu1 %v479_v27 }
  0x39   : > { %730 = vmatpush3.msra.mxu0 %v431_v28  ;;  %765 = vmatpush3.msra.mxu1 %v463_v29 }
  0x3a   : > { %731 = vmatprep.subr.mxu0 %v446_v30  ;;  %766 = vmatprep.subr.mxu1 %v478_v31 }
  0x3b   : > { %732 = vmatpush3.msra.mxu0 %v430_v32  ;;  %767 = vmatpush3.msra.mxu1 %v462_v33 }
  0xdb   : > { %v354_v34 = vpop.f32.mrf.mxu0  ;;  %v425_v35 = vpop.f32.mrf.mxu1 }
  0xdd   : > { %v356_v36 = vpop.f32.mrf.mxu0  ;;  %v427_v37 = vpop.f32.mrf.mxu1 }
  0xde   : > { %558 = vmatprep.mubr.f32.mxu0 %v356_v36  ;;  %628 = vmatprep.mubr.f32.mxu1 %v427_v37 }
  0xdf   : > { %559 = vmatmul.mubr.f32.vlgmr.msra.gmra.mxu0 %v354_v34  ;;  %629 = vmatmul.mubr.f32.vlgmr.msra.gmra.mxu1 %v425_v35 }
 0x19f   : > { %v733_v38 = vpop.f32.mrf.mxu0  ;;  %v768_v39 = vpop.f32.mrf.mxu1 }
 0x1a1   : > { %v734_v40 = vpop.f32.mrf.mxu0  ;;  %v769_v41 = vpop.f32.mrf.mxu1 }
 0x1a2   : > { %v735_v42 = vadd.f32 %v734_v40, %v733_v38  ;;  %v770_v43 = vadd.f32 %v769_v41, %v768_v39 }
 0x1a4   : > { %v631_v44 = vadd.f32 %v770_v43, %v735_v42 }
 0x1a6   : > { %634 = vst [vmem:[%s222_s23] sm:$0xf] %v631_v44 }
 0x1a7 PF: > { %s15_s18 = sadd.s32 1, %s786_s18  }
 0x1a8   : > { %p12_p4 = scmp.ge.s32.totalorder %s15_s18, 4  }
 0x1aa   :  { %14 = sbr.rel (!%p12_p4) target bundleno = 1 (0x1), region = 70 }

</bundles_post_ra>
